<compile_context>
chip_gen: v7x
topology: tpu7x:2x2x1
jax: 0.10.0
libtpu: 0.0.40
codegen_flags: <defaults>
</compile_context>

<pallas_src>
import math

import jax
import jax.numpy as jnp
import numpy as np
from jax.experimental import pallas as pl
from jax.experimental.pallas import tpu as pltpu

_PREC_F32 = jax.lax.Precision.HIGHEST   # small f32 dots only (A, M); see header note
_INV_SQRT2 = 1.0 / math.sqrt(2.0)
_LN_EPS = 1e-5


def _gelu_exact(v):
    # PyTorch nn.GELU() default: 0.5 * x * (1 + erf(x / sqrt(2)))
    return 0.5 * v * (1.0 + jax.lax.erf(v * _INV_SQRT2))


def _dot_f32(a, b):
    return jnp.dot(a, b, preferred_element_type=jnp.float32, precision=_PREC_F32)


def _dot_bf16(a, b):
    # Native 1-pass bf16 MXU matmul with f32 accumulation.
    return jnp.dot(a.astype(jnp.bfloat16), b, preferred_element_type=jnp.float32)


# -----------------------------------------------------------------------------
# Fused kernel: [A matmul -> LN (two independent M matmuls) -> GELU] x n_layers
#               -> fc1 (permute folded into block-diag W1e, bf16) -> GELU
#               -> fc2 (block-diag W2e, bf16)
# -----------------------------------------------------------------------------
def build_fused_kernel(n_layers, x_dim):
    def kernel(*refs):
        x_ref = refs[0]
        a_refs = refs[1:1 + n_layers]                          # f32 folded layer mats
        m_ref, w1e_ref, b1e_ref, w2e_ref, const_ref, o_ref = refs[1 + n_layers:]

        h = x_ref[...]                                         # (Bt, cin0*N) f32
        m = m_ref[...].astype(jnp.float32)                     # (width*N, width*N); bf16-exact values
        cv = const_ref[...]                                    # (8, width*N) packed constants

        for l in range(n_layers):                              # small & static -> unrolled
            bias = cv[3 * l + 0:3 * l + 1, :]                  # conv bias  (1, width*N)
            gamma = cv[3 * l + 1:3 * l + 2, :]                 # LN gamma
            beta = cv[3 * l + 2:3 * l + 3, :]                  # LN beta
            # SpectralConv1d + Conv1d(1x1) folded into one matmul + bias.
            y = _dot_f32(h, a_refs[l][...]) + bias             # (Bt, width*N)
            # LayerNorm over x_dim via block-mean matrix M.
            # E[y] and E[y^2] are independent MXU ops (no serialization).
            mu = _dot_f32(y, m)
            msq = _dot_f32(y * y, m)
            var = jnp.maximum(msq - mu * mu, 0.0)
            yn = (y - mu) * jax.lax.rsqrt(var + _LN_EPS)
            h = _gelu_exact(yn * gamma + beta)

        # Head: permute(0,2,1)+fc1 folded into block-diagonal W1e, fc2 into W2e.
        # Dominant weight bytes -> stored bf16, dotted as 1-pass bf16 MXU matmuls.
        hh = _gelu_exact(_dot_bf16(h, w1e_ref[...])
                         + b1e_ref[...].astype(jnp.float32))   # (Bt, N*128)
        out = _dot_bf16(hh, w2e_ref[...])                      # (Bt, N)
        o_ref[...] = out + cv[3 * n_layers:3 * n_layers + 1, :x_dim]

    return kernel


def _rep_spec(arr):
    # Grid-invariant (constant) operand: full-array block, fixed index map.
    # TODO(synk): pipeline_mode=pl.Buffered(1) would drop the redundant second
    # VMEM buffer for these weights; left on the default path for compile safety
    # (grid is 1 at this problem size, so it has no runtime effect today).
    zeros = (0,) * arr.ndim
    return pl.BlockSpec(arr.shape, lambda i, _z=zeros: _z)


def fode_net_forward(t, x, folded, *, bt=None):
    """forward(t, x): t is ignored (same as the torch module)."""
    del t
    bs = x.shape[:-1]
    x_dim = x.shape[-1]
    b = int(np.prod(bs))
    x2d = x.reshape(b, x_dim).astype(jnp.float32)

    if bt is None:
        bt = b                       # single grid step at small batch
    assert b % bt == 0 and (bt == b or bt % 8 == 0)

    n_layers = len(folded["As"])
    args = ([x2d] + list(folded["As"])
            + [folded["M"], folded["W1e"], folded["b1e"], folded["W2e"], folded["const"]])
    in_specs = [pl.BlockSpec((bt, x_dim), lambda i: (i, 0))]
    in_specs += [_rep_spec(a) for a in args[1:]]

    out = pl.pallas_call(
        build_fused_kernel(n_layers, x_dim),
        out_shape=jax.ShapeDtypeStruct((b, x_dim), jnp.float32),
        grid=(b // bt,),
        in_specs=in_specs,
        out_specs=pl.BlockSpec((bt, x_dim), lambda i: (i, 0)),
        compiler_params=pltpu.CompilerParams(dimension_semantics=("parallel",)),
    )(*args)
    return out.reshape(*bs, x_dim)


# -----------------------------------------------------------------------------
# Offline folding (numpy float64): DFT bases + complex mix + irfft + 1x1 conv
# -> single A per layer (f32); permute+fc1 -> W1e (bf16); fc2 -> W2e (bf16);
# LN block-mean -> M (bf16, values exact); small vectors packed into one array.
# -----------------------------------------------------------------------------
def make_dft_mats_np(n, modes):
    n_idx = np.arange(n, dtype=np.float64)
    k_idx = np.arange(modes, dtype=np.float64)
    ang = 2.0 * np.pi * n_idx[:, None] * k_idx[None, :] / n        # (N, K)
    cf = np.cos(ang)                                               # rfft real part
    sf = -np.sin(ang)                                              # rfft imag part
    coef = np.where((k_idx == 0) | (2.0 * k_idx == n), 1.0, 2.0)   # DC/Nyquist = 1
    ci = (coef[:, None] * np.cos(ang).T) / n                       # (K, N)
    si = (-coef[:, None] * np.sin(ang).T) / n
    return cf, sf, ci, si


def fold_params(layer_params, head_params, x_dim, modes):
    N = x_dim
    cf, sf, ci, si = make_dft_mats_np(N, modes)
    eye = np.eye(N)
    As = []
    const_rows = []
    width = None
    for p in layer_params:
        wre = np.asarray(p["wre"], np.float64)                      # (cin, width, K)
        wim = np.asarray(p["wim"], np.float64)
        wc = np.asarray(p["wc"], np.float64)                        # (width, cin)
        bc = np.asarray(p["bc"], np.float64)[0, :, 0]               # (width,)
        gamma = np.asarray(p["gamma"], np.float64)[0, 0]            # (N,)
        beta = np.asarray(p["beta"], np.float64)[0, 0]
        cin, width, _ = wre.shape
        # A[(i*N+n),(o*N+m)] = spectral(i,n->o,m) + wc[o,i] * delta(n,m)
        A = (np.einsum("iok,nk,km->inom", wre, cf, ci)
             + np.einsum("iok,nk,km->inom", wre, sf, si)
             + np.einsum("iok,nk,km->inom", wim, cf, si)
             - np.einsum("iok,nk,km->inom", wim, sf, ci)
             + np.einsum("oi,nm->inom", wc, eye)).reshape(cin * N, width * N)
        As.append(jnp.asarray(A, jnp.float32))
        const_rows.append(np.repeat(bc, N))        # conv bias  (channel-major layout)
        const_rows.append(np.tile(gamma, width))   # LN gamma
        const_rows.append(np.tile(beta, width))    # LN beta

    n_layers = len(layer_params)
    W1 = np.asarray(head_params["w1"], np.float64)                  # (width, H)
    b1 = np.asarray(head_params["b1"], np.float64)[0]               # (H,)
    w2 = np.asarray(head_params["w2"], np.float64)[:, 0]            # (H,)
    b2 = float(np.asarray(head_params["b2"], np.float64)[0, 0])
    H = W1.shape[1]
    W1e = np.einsum("cj,mn->cmnj", W1, eye).reshape(width * N, N * H)   # fold permute+fc1
    b1e = np.tile(b1, N)[None, :]                                        # (1, N*H)
    W2e = np.einsum("j,nm->njm", w2, eye).reshape(N * H, N)              # fold fc2
    M = np.kron(np.eye(width), np.full((N, N), 1.0 / N))                 # LN block-mean

    const_rows.append(np.full(width * N, b2))       # fc2 bias row (first x_dim lanes used)
    R = len(const_rows)                             # 3*n_layers + 1
    Rp = -(-R // 8) * 8                             # pad rows to a multiple of 8
    const = np.zeros((Rp, width * N), np.float64)
    const[:R] = np.stack(const_rows)

    return dict(
        As=As,                                           # f32: small, accuracy-critical
        M=jnp.asarray(M, jnp.bfloat16),                  # values 0 / 1/N: exact in bf16
        W1e=jnp.asarray(W1e, jnp.bfloat16),              # dominant DMA -> bf16
        b1e=jnp.asarray(b1e, jnp.bfloat16),
        W2e=jnp.asarray(W2e, jnp.bfloat16),
        const=jnp.asarray(const, jnp.float32),           # packed small constants
    )


# -----------------------------------------------------------------------------
# Parameter construction (deterministic; mirrors the torch module's shapes)
# -----------------------------------------------------------------------------
def make_params(key, x_dim, width, n_layers, modes):
    layer_params = []
    for i in range(n_layers):
        cin = 1 if i == 0 else width
        key, k1, k2, k3, k4 = jax.random.split(key, 5)
        scale = 1.0 / (cin * width)
        wre = scale * jax.random.uniform(k1, (cin, width, modes), jnp.float32)
        wim = scale * jax.random.uniform(k2, (cin, width, modes), jnp.float32)
        bound = 1.0 / math.sqrt(cin)
        wc = jax.random.uniform(k3, (width, cin), jnp.float32, -bound, bound)
        bc = jax.random.uniform(k4, (1, width, 1), jnp.float32, -bound, bound)
        gamma = jnp.ones((1, 1, x_dim), jnp.float32)
        beta = jnp.zeros((1, 1, x_dim), jnp.float32)
        layer_params.append(dict(wre=wre, wim=wim, wc=wc, bc=bc,
                                 gamma=gamma, beta=beta))
    key, k1, k2, k3, k4 = jax.random.split(key, 5)
    b = 1.0 / math.sqrt(width)
    w1 = jax.random.uniform(k1, (width, 128), jnp.float32, -b, b)
    b1 = jax.random.uniform(k2, (1, 128), jnp.float32, -b, b)
    b = 1.0 / math.sqrt(128)
    w2 = jax.random.uniform(k3, (128, 1), jnp.float32, -b, b)
    b2 = jax.random.uniform(k4, (1, 1), jnp.float32, -b, b)
    head_params = dict(w1=w1, b1=b1, w2=w2, b2=b2)
    return layer_params, head_params


# -----------------------------------------------------------------------------
# float64 numpy reference (true rfft/irfft)
# -----------------------------------------------------------------------------
def fode_net_reference_np(x, layer_params, head_params, x_dim, modes):
    erf = np.vectorize(math.erf)
    gelu = lambda v: 0.5 * v * (1.0 + erf(v / math.sqrt(2.0)))
    x = np.asarray(x, dtype=np.float64)
    bs = x.shape[:-1]
    batch = int(np.prod(bs))
    h = x.reshape(batch, 1, x_dim)
    for p in layer_params:
        wre = np.asarray(p["wre"], np.float64)
        wim = np.asarray(p["wim"], np.float64)
        w = wre + 1j * wim
        xft = np.fft.rfft(h, axis=-1)
        out_ft = np.zeros((batch, wre.shape[1], x_dim // 2 + 1), dtype=np.complex128)
        out_ft[:, :, :modes] = np.einsum("bik,iok->bok", xft[:, :, :modes], w)
        x1 = np.fft.irfft(out_ft, n=x_dim, axis=-1)
        x2 = np.einsum("oi,bin->bon", np.asarray(p["wc"], np.float64), h) \
            + np.asarray(p["bc"], np.float64)
        y = x1 + x2
        mean = y.mean(-1, keepdims=True)
        var = ((y - mean) ** 2).mean(-1, keepdims=True)
        y = (y - mean) / np.sqrt(var + 1e-5)
        y = y * np.asarray(p["gamma"], np.float64) + np.asarray(p["beta"], np.float64)
        h = gelu(y)
    h = np.transpose(h, (0, 2, 1))
    h = h @ np.asarray(head_params["w1"], np.float64) + np.asarray(head_params["b1"], np.float64)
    h = gelu(h)
    out = h @ np.asarray(head_params["w2"], np.float64) + np.asarray(head_params["b2"], np.float64)
    return out[..., 0].reshape(*bs, x_dim)


# -----------------------------------------------------------------------------
if __name__ == "__main__":
    x_dim = 16
    width = 8                            # width * x_dim = 128 -> lane-dense layer matmuls
    n_layers = 2
    modes = min(12, x_dim // 2 + 1)      # = 9 (includes the Nyquist bin)
    bs = (2, 8)                          # leading batch dims -> B = 16

    key = jax.random.PRNGKey(0)
    key, kx = jax.random.split(key)
    x = jax.random.normal(kx, (*bs, x_dim), jnp.float32)
    t = jnp.zeros(())                    # unused, mirrors torch forward(t, x)

    layer_params, head_params = make_params(key, x_dim, width, n_layers, modes)
    folded = fold_params(layer_params, head_params, x_dim, modes)

    # Single fused pallas_call; bt=B -> grid of one step (grow bt in multiples
    # of 8 — ideally B/2 per TensorCore — only if the batch itself grows).
    out = fode_net_forward(t, x, folded, bt=None)
    out = jax.block_until_ready(out)
    assert out.shape == (*bs, x_dim) and out.dtype == jnp.float32

    ref = fode_net_reference_np(x, layer_params, head_params, x_dim, modes)
    np.testing.assert_allclose(np.asarray(out), ref, rtol=1e-2, atol=1e-2)

    print("KERNEL_OK")
</pallas_src>

<mosaic_0001>
module attributes {stable_mosaic.version = 11 : i64} {
  func.func @kernel(%arg0: i32, %arg1: memref<16x16xf32, #tpu.memory_space<vmem>>, %arg2: memref<16x128xf32, #tpu.memory_space<vmem>>, %arg3: memref<128x128xf32, #tpu.memory_space<vmem>>, %arg4: memref<128x128xbf16, #tpu.memory_space<vmem>>, %arg5: memref<128x2048xbf16, #tpu.memory_space<vmem>>, %arg6: memref<1x2048xbf16, #tpu.memory_space<vmem>>, %arg7: memref<2048x16xbf16, #tpu.memory_space<vmem>>, %arg8: memref<8x128xf32, #tpu.memory_space<vmem>>, %arg9: memref<16x16xf32, #tpu.memory_space<vmem>>) attributes {dimension_semantics = [#tpu.dimension_semantics<parallel>], iteration_bounds = array<i64: 1>, scalar_prefetch = 0 : i64, scratch_operands = 0 : i64, tpu.core_type = #tpu.core_type<tc>, window_params = [{transform_indices = @transform_0, window_bounds = array<i64: 16, 16>}, {pipeline_mode = #tpu.pipeline_mode<synchronous>, transform_indices = @transform_1, window_bounds = array<i64: 16, 128>}, {pipeline_mode = #tpu.pipeline_mode<synchronous>, transform_indices = @transform_2, window_bounds = array<i64: 128, 128>}, {pipeline_mode = #tpu.pipeline_mode<synchronous>, transform_indices = @transform_3, window_bounds = array<i64: 128, 128>}, {pipeline_mode = #tpu.pipeline_mode<synchronous>, transform_indices = @transform_4, window_bounds = array<i64: 128, 2048>}, {pipeline_mode = #tpu.pipeline_mode<synchronous>, transform_indices = @transform_5, window_bounds = array<i64: 1, 2048>}, {pipeline_mode = #tpu.pipeline_mode<synchronous>, transform_indices = @transform_6, window_bounds = array<i64: 2048, 16>}, {pipeline_mode = #tpu.pipeline_mode<synchronous>, transform_indices = @transform_7, window_bounds = array<i64: 8, 128>}, {transform_indices = @transform_8, window_bounds = array<i64: 16, 16>}]} {
    %c0 = arith.constant 0 : index
    %c0_0 = arith.constant 0 : index
    %0 = vector.load %arg1[%c0, %c0_0] : memref<16x16xf32, #tpu.memory_space<vmem>>, vector<16x16xf32>
    %c0_1 = arith.constant 0 : index
    %c0_2 = arith.constant 0 : index
    %1 = vector.load %arg4[%c0_1, %c0_2] : memref<128x128xbf16, #tpu.memory_space<vmem>>, vector<128x128xbf16>
    %2 = arith.extf %1 : vector<128x128xbf16> to vector<128x128xf32>
    %c0_3 = arith.constant 0 : index
    %c0_4 = arith.constant 0 : index
    %3 = vector.load %arg8[%c0_3, %c0_4] : memref<8x128xf32, #tpu.memory_space<vmem>>, vector<8x128xf32>
    %4 = vector.extract_strided_slice %3 {offsets = [0, 0], sizes = [1, 128], strides = [1, 1]} : vector<8x128xf32> to vector<1x128xf32>
    %5 = vector.extract_strided_slice %3 {offsets = [1, 0], sizes = [1, 128], strides = [1, 1]} : vector<8x128xf32> to vector<1x128xf32>
    %6 = vector.extract_strided_slice %3 {offsets = [2, 0], sizes = [1, 128], strides = [1, 1]} : vector<8x128xf32> to vector<1x128xf32>
    %c0_5 = arith.constant 0 : index
    %c0_6 = arith.constant 0 : index
    %7 = vector.load %arg2[%c0_5, %c0_6] : memref<16x128xf32, #tpu.memory_space<vmem>>, vector<16x128xf32>
    %cst = arith.constant dense<0.000000e+00> : vector<16x128xf32>
    %8 = tpu.matmul %0, %7, %cst {dimension_numbers = #tpu.dot_dimension_numbers<[1], [0], [0], [1], [0, 0, 1, 1], [], []>, precision = #tpu.contract_precision<fp32>} : vector<16x16xf32>, vector<16x128xf32>, vector<16x128xf32> -> vector<16x128xf32>
    %9 = vector.broadcast %4 : vector<1x128xf32> to vector<16x128xf32>
    %10 = arith.addf %8, %9 : vector<16x128xf32>
    %cst_7 = arith.constant dense<0.000000e+00> : vector<16x128xf32>
    %11 = tpu.matmul %10, %2, %cst_7 {dimension_numbers = #tpu.dot_dimension_numbers<[1], [0], [0], [1], [0, 0, 1, 1], [], []>, precision = #tpu.contract_precision<fp32>} : vector<16x128xf32>, vector<128x128xf32>, vector<16x128xf32> -> vector<16x128xf32>
    %12 = arith.mulf %10, %10 : vector<16x128xf32>
    %cst_8 = arith.constant dense<0.000000e+00> : vector<16x128xf32>
    %13 = tpu.matmul %12, %2, %cst_8 {dimension_numbers = #tpu.dot_dimension_numbers<[1], [0], [0], [1], [0, 0, 1, 1], [], []>, precision = #tpu.contract_precision<fp32>} : vector<16x128xf32>, vector<128x128xf32>, vector<16x128xf32> -> vector<16x128xf32>
    %14 = arith.mulf %11, %11 : vector<16x128xf32>
    %15 = arith.subf %13, %14 : vector<16x128xf32>
    %cst_9 = arith.constant 0.000000e+00 : f32
    %16 = vector.broadcast %cst_9 : f32 to vector<16x128xf32>
    %17 = arith.maximumf %15, %16 : vector<16x128xf32>
    %18 = arith.subf %10, %11 : vector<16x128xf32>
    %cst_10 = arith.constant 9.99999974E-6 : f32
    %19 = vector.broadcast %cst_10 : f32 to vector<16x128xf32>
    %20 = arith.addf %17, %19 : vector<16x128xf32>
    %21 = math.rsqrt %20 : vector<16x128xf32>
    %22 = arith.mulf %18, %21 : vector<16x128xf32>
    %23 = vector.broadcast %5 : vector<1x128xf32> to vector<16x128xf32>
    %24 = arith.mulf %22, %23 : vector<16x128xf32>
    %25 = vector.broadcast %6 : vector<1x128xf32> to vector<16x128xf32>
    %26 = arith.addf %24, %25 : vector<16x128xf32>
    %cst_11 = arith.constant 5.000000e-01 : f32
    %27 = vector.broadcast %cst_11 : f32 to vector<16x128xf32>
    %28 = arith.mulf %27, %26 : vector<16x128xf32>
    %cst_12 = arith.constant 0.707106769 : f32
    %29 = vector.broadcast %cst_12 : f32 to vector<16x128xf32>
    %30 = arith.mulf %26, %29 : vector<16x128xf32>
    %31 = math.erf %30 : vector<16x128xf32>
    %cst_13 = arith.constant 1.000000e+00 : f32
    %32 = vector.broadcast %cst_13 : f32 to vector<16x128xf32>
    %33 = arith.addf %32, %31 : vector<16x128xf32>
    %34 = arith.mulf %28, %33 : vector<16x128xf32>
    %35 = vector.extract_strided_slice %3 {offsets = [3, 0], sizes = [1, 128], strides = [1, 1]} : vector<8x128xf32> to vector<1x128xf32>
    %36 = vector.extract_strided_slice %3 {offsets = [4, 0], sizes = [1, 128], strides = [1, 1]} : vector<8x128xf32> to vector<1x128xf32>
    %37 = vector.extract_strided_slice %3 {offsets = [5, 0], sizes = [1, 128], strides = [1, 1]} : vector<8x128xf32> to vector<1x128xf32>
    %c0_14 = arith.constant 0 : index
    %c0_15 = arith.constant 0 : index
    %38 = vector.load %arg3[%c0_14, %c0_15] : memref<128x128xf32, #tpu.memory_space<vmem>>, vector<128x128xf32>
    %cst_16 = arith.constant dense<0.000000e+00> : vector<16x128xf32>
    %39 = tpu.matmul %34, %38, %cst_16 {dimension_numbers = #tpu.dot_dimension_numbers<[1], [0], [0], [1], [0, 0, 1, 1], [], []>, precision = #tpu.contract_precision<fp32>} : vector<16x128xf32>, vector<128x128xf32>, vector<16x128xf32> -> vector<16x128xf32>
    %40 = vector.broadcast %35 : vector<1x128xf32> to vector<16x128xf32>
    %41 = arith.addf %39, %40 : vector<16x128xf32>
    %cst_17 = arith.constant dense<0.000000e+00> : vector<16x128xf32>
    %42 = tpu.matmul %41, %2, %cst_17 {dimension_numbers = #tpu.dot_dimension_numbers<[1], [0], [0], [1], [0, 0, 1, 1], [], []>, precision = #tpu.contract_precision<fp32>} : vector<16x128xf32>, vector<128x128xf32>, vector<16x128xf32> -> vector<16x128xf32>
    %43 = arith.mulf %41, %41 : vector<16x128xf32>
    %cst_18 = arith.constant dense<0.000000e+00> : vector<16x128xf32>
    %44 = tpu.matmul %43, %2, %cst_18 {dimension_numbers = #tpu.dot_dimension_numbers<[1], [0], [0], [1], [0, 0, 1, 1], [], []>, precision = #tpu.contract_precision<fp32>} : vector<16x128xf32>, vector<128x128xf32>, vector<16x128xf32> -> vector<16x128xf32>
    %45 = arith.mulf %42, %42 : vector<16x128xf32>
    %46 = arith.subf %44, %45 : vector<16x128xf32>
    %cst_19 = arith.constant 0.000000e+00 : f32
    %47 = vector.broadcast %cst_19 : f32 to vector<16x128xf32>
    %48 = arith.maximumf %46, %47 : vector<16x128xf32>
    %49 = arith.subf %41, %42 : vector<16x128xf32>
    %cst_20 = arith.constant 9.99999974E-6 : f32
    %50 = vector.broadcast %cst_20 : f32 to vector<16x128xf32>
    %51 = arith.addf %48, %50 : vector<16x128xf32>
    %52 = math.rsqrt %51 : vector<16x128xf32>
    %53 = arith.mulf %49, %52 : vector<16x128xf32>
    %54 = vector.broadcast %36 : vector<1x128xf32> to vector<16x128xf32>
    %55 = arith.mulf %53, %54 : vector<16x128xf32>
    %56 = vector.broadcast %37 : vector<1x128xf32> to vector<16x128xf32>
    %57 = arith.addf %55, %56 : vector<16x128xf32>
    %cst_21 = arith.constant 5.000000e-01 : f32
    %58 = vector.broadcast %cst_21 : f32 to vector<16x128xf32>
    %59 = arith.mulf %58, %57 : vector<16x128xf32>
    %cst_22 = arith.constant 0.707106769 : f32
    %60 = vector.broadcast %cst_22 : f32 to vector<16x128xf32>
    %61 = arith.mulf %57, %60 : vector<16x128xf32>
    %62 = math.erf %61 : vector<16x128xf32>
    %cst_23 = arith.constant 1.000000e+00 : f32
    %63 = vector.broadcast %cst_23 : f32 to vector<16x128xf32>
    %64 = arith.addf %63, %62 : vector<16x128xf32>
    %65 = arith.mulf %59, %64 : vector<16x128xf32>
    %c0_24 = arith.constant 0 : index
    %c0_25 = arith.constant 0 : index
    %66 = vector.load %arg5[%c0_24, %c0_25] : memref<128x2048xbf16, #tpu.memory_space<vmem>>, vector<128x2048xbf16>
    %67 = arith.truncf %65 : vector<16x128xf32> to vector<16x128xbf16>
    %cst_26 = arith.constant dense<0.000000e+00> : vector<16x2048xf32>
    %68 = tpu.matmul %67, %66, %cst_26 {dimension_numbers = #tpu.dot_dimension_numbers<[1], [0], [0], [1], [0, 0, 1, 1], [], []>} : vector<16x128xbf16>, vector<128x2048xbf16>, vector<16x2048xf32> -> vector<16x2048xf32>
    %c0_27 = arith.constant 0 : index
    %c0_28 = arith.constant 0 : index
    %69 = vector.load %arg6[%c0_27, %c0_28] : memref<1x2048xbf16, #tpu.memory_space<vmem>>, vector<1x2048xbf16>
    %70 = arith.extf %69 : vector<1x2048xbf16> to vector<1x2048xf32>
    %71 = vector.broadcast %70 : vector<1x2048xf32> to vector<16x2048xf32>
    %72 = arith.addf %68, %71 : vector<16x2048xf32>
    %cst_29 = arith.constant 5.000000e-01 : f32
    %73 = vector.broadcast %cst_29 : f32 to vector<16x2048xf32>
    %74 = arith.mulf %73, %72 : vector<16x2048xf32>
    %cst_30 = arith.constant 0.707106769 : f32
    %75 = vector.broadcast %cst_30 : f32 to vector<16x2048xf32>
    %76 = arith.mulf %72, %75 : vector<16x2048xf32>
    %77 = math.erf %76 : vector<16x2048xf32>
    %cst_31 = arith.constant 1.000000e+00 : f32
    %78 = vector.broadcast %cst_31 : f32 to vector<16x2048xf32>
    %79 = arith.addf %78, %77 : vector<16x2048xf32>
    %80 = arith.mulf %74, %79 : vector<16x2048xf32>
    %c0_32 = arith.constant 0 : index
    %c0_33 = arith.constant 0 : index
    %81 = vector.load %arg7[%c0_32, %c0_33] : memref<2048x16xbf16, #tpu.memory_space<vmem>>, vector<2048x16xbf16>
    %82 = arith.truncf %80 : vector<16x2048xf32> to vector<16x2048xbf16>
    %cst_34 = arith.constant dense<0.000000e+00> : vector<16x16xf32>
    %83 = tpu.matmul %82, %81, %cst_34 {dimension_numbers = #tpu.dot_dimension_numbers<[1], [0], [0], [1], [0, 0, 1, 1], [], []>} : vector<16x2048xbf16>, vector<2048x16xbf16>, vector<16x16xf32> -> vector<16x16xf32>
    %84 = vector.extract_strided_slice %3 {offsets = [6, 0], sizes = [1, 16], strides = [1, 1]} : vector<8x128xf32> to vector<1x16xf32>
    %85 = vector.broadcast %84 : vector<1x16xf32> to vector<16x16xf32>
    %86 = arith.addf %83, %85 : vector<16x16xf32>
    %c0_35 = arith.constant 0 : index
    %c0_36 = arith.constant 0 : index
    %87 = vector.load %arg9[%c0_35, %c0_36] : memref<16x16xf32, #tpu.memory_space<vmem>>, vector<16x16xf32>
    tpu.vector_store %arg9[%c0_35, %c0_36], %86 {strides = array<i32>} : memref<16x16xf32, #tpu.memory_space<vmem>>, vector<16x16xf32>,
    return
  }
  func.func @transform_0(%arg0: i32) -> (i32, i32) {
    %c0_i32 = arith.constant 0 : i32
    %c0_i32_0 = arith.constant 0 : i32
    return %arg0, %c0_i32 : i32, i32
  }
  func.func @transform_1(%arg0: i32) -> (i32, i32) {
    %c0_i32 = arith.constant 0 : i32
    %c0_i32_0 = arith.constant 0 : i32
    %c0_i32_1 = arith.constant 0 : i32
    return %c0_i32, %c0_i32_0 : i32, i32
  }
  func.func @transform_2(%arg0: i32) -> (i32, i32) {
    %c0_i32 = arith.constant 0 : i32
    %c0_i32_0 = arith.constant 0 : i32
    %c0_i32_1 = arith.constant 0 : i32
    return %c0_i32, %c0_i32_0 : i32, i32
  }
  func.func @transform_3(%arg0: i32) -> (i32, i32) {
    %c0_i32 = arith.constant 0 : i32
    %c0_i32_0 = arith.constant 0 : i32
    %c0_i32_1 = arith.constant 0 : i32
    return %c0_i32, %c0_i32_0 : i32, i32
  }
  func.func @transform_4(%arg0: i32) -> (i32, i32) {
    %c0_i32 = arith.constant 0 : i32
    %c0_i32_0 = arith.constant 0 : i32
    %c0_i32_1 = arith.constant 0 : i32
    return %c0_i32, %c0_i32_0 : i32, i32
  }
  func.func @transform_5(%arg0: i32) -> (i32, i32) {
    %c0_i32 = arith.constant 0 : i32
    %c0_i32_0 = arith.constant 0 : i32
    %c0_i32_1 = arith.constant 0 : i32
    return %c0_i32, %c0_i32_0 : i32, i32
  }
  func.func @transform_6(%arg0: i32) -> (i32, i32) {
    %c0_i32 = arith.constant 0 : i32
    %c0_i32_0 = arith.constant 0 : i32
    %c0_i32_1 = arith.constant 0 : i32
    return %c0_i32, %c0_i32_0 : i32, i32
  }
  func.func @transform_7(%arg0: i32) -> (i32, i32) {
    %c0_i32 = arith.constant 0 : i32
    %c0_i32_0 = arith.constant 0 : i32
    %c0_i32_1 = arith.constant 0 : i32
    return %c0_i32, %c0_i32_0 : i32, i32
  }
  func.func @transform_8(%arg0: i32) -> (i32, i32) {
    %c0_i32 = arith.constant 0 : i32
    %c0_i32_0 = arith.constant 0 : i32
    return %arg0, %c0_i32 : i32, i32
  }
}

</mosaic_0001>

<bundles_post_ra>
// kernel: tpu_custom_call.1
= control target key start
LH: loop header
LB: loop body
LE: loop exit
PB: predicated region body
PF: predicated region fallthrough
CT: control target
= control target key end

     0   :  { %13 = vsyncpa [#allocation3], 0  ;;  %s12326_s0 = inlined_call_operand.hbm [shape: f32[16,16], index: 0, kind: input, shape index: {}]   ;;  %s12327_s1 = inlined_call_operand.hbm [shape: f32[16,128], index: 1, kind: input, shape index: {}]   ;;  %s12328_s2 = inlined_call_operand.vmem [shape: f32[128,128], index: 2, kind: input, shape index: {}]   ;;  %s12329_s3 = inlined_call_operand.hbm [shape: bf16[128,128], index: 3, kind: input, shape index: {}]   ;;  %s12330_s4 = inlined_call_operand.vmem [shape: bf16[128,2048], index: 4, kind: input, shape index: {}]   ;;  %s12331_s5 = inlined_call_operand.hbm [shape: bf16[1,2048], index: 5, kind: input, shape index: {}]   ;;  %s12332_s6 = inlined_call_operand.vmem [shape: bf16[2048,16], index: 6, kind: input, shape index: {}]   ;;  %s12333_s7 = inlined_call_operand.vmem [shape: f32[8,128], index: 7, kind: input, shape index: {}]   ;;  %s12334_s8 = inlined_call_operand.hbm [shape: f32[16,16], index: 8, kind: output, shape index: {}]  }
   0x1   :  { %14 = vsyncpa [#allocation6], 0 }
   0x2   :  { %15 = vsyncpa [#allocation9], 0 }
   0x3   :  { %16 = vsyncpa [#allocation4], 0  ;;  %s10110_s27 = smov [#allocation5]   ;;  %s10111_s29 = smov [#allocation2]  }
   0x4   :  { %s34_s28 = sshll.u32 %s10110_s27, 4  ;;  %s22_s30 = sshll.u32 %s10111_s29, 4  ;;  %s35_s28 = int_to_ptr.vmem [resolvable:$true] %s34_s28  ;;  %s10165_s30 = int_to_ptr.vmem [resolvable:$true] %s22_s30 }
   0x5   :  { %s9992_s11 = scalar_lea.hbm %s12327_s1, 256 }
   0x6   :  { %p9993_p0 = scmp.ne.s32.totalorder %s12327_s1, %s9992_s11  ;;  %p9996_p1 = scmp.lt.u32.totalorder %s9992_s11, %s12327_s1 }
   0x8   :  { %p9998_p2 = pnand %p9996_p1, %p9993_p0 }
   0xa   :  { %10001 = shalt.err (!%p9998_p2)
}
   0xb   :  { %s10002_s16 = scalar_lea.vmem %s35_s28, 256  ;;  %p10007_p4 = scmp.lt.s32.totalorder %s35_s28, %s35_s28 }
   0xc   :  { %p10003_p3 = scmp.ne.s32.totalorder %s35_s28, %s10002_s16  ;;  %p10008_p5 = scmp.lt.s32.totalorder %s10002_s16, %s10002_s16 }
   0xe   :  { %p10009_p6 = por %p10008_p5, %p10007_p4 }
  0x10   :  { %p10010_p7 = pnand %p10009_p6, %p10003_p3 }
  0x12   :  { %10013 = shalt.err (!%p10010_p7)
}
  0x13   :  { %s10112_s17 = smov 128   ;;  %s10113_s18 = smov 8  }
  0x14   :  { %40 = dma.hbm_to_vmem [thread:$0]  %s12327_s1, 256, %s35_s28, [#allocation6], %s10112_s17, %s10112_s17, %s10113_s18  }
  0x15   :  { %s10014_s23 = scalar_lea.hbm %s12326_s0, 256 }
  0x16   :  { %p10015_p8 = scmp.ne.s32.totalorder %s12326_s0, %s10014_s23  ;;  %p10018_p9 = scmp.lt.u32.totalorder %s10014_s23, %s12326_s0 }
  0x18   :  { %p10020_p10 = pnand %p10018_p9, %p10015_p8 }
  0x1a   :  { %10023 = shalt.err (!%p10020_p10)
}
  0x1b   :  { %s10024_s29 = scalar_lea.vmem %s10165_s30, 256  ;;  %p10029_p12 = scmp.lt.s32.totalorder %s10165_s30, %s10165_s30 }
  0x1c   :  { %p10025_p11 = scmp.ne.s32.totalorder %s10165_s30, %s10024_s29  ;;  %p10030_p13 = scmp.lt.s32.totalorder %s10024_s29, %s10024_s29 }
  0x1e   :  { %p10031_p0 = por %p10030_p13, %p10029_p12 }
  0x20   :  { %p10032_p1 = pnand %p10031_p0, %p10025_p11 }
  0x22   :  { %10035 = shalt.err (!%p10032_p1)
}
  0x23   :  { %28 = dma.hbm_to_vmem [thread:$0]  %s12326_s0, 256, %s10165_s30, [#allocation3], %s10112_s17, %s10112_s17, %s10113_s18  }
  0x24   :  { %s10114_s9 = smov [#allocation7]   ;;  %s10036_s13 = scalar_lea.hbm %s12329_s3, 1024 }
  0x25   :  { %s48_s10 = sshll.u32 %s10114_s9, 4  ;;  %p10037_p2 = scmp.ne.s32.totalorder %s12329_s3, %s10036_s13  ;;  %s49_s10 = int_to_ptr.vmem [resolvable:$true] %s48_s10 }
  0x26   :  { %p10040_p3 = scmp.lt.u32.totalorder %s10036_s13, %s12329_s3 }
  0x28   :  { %p10042_p4 = pnand %p10040_p3, %p10037_p2 }
  0x2a   :  { %10045 = shalt.err (!%p10042_p4)
}
  0x2b   :  { %s10046_s20 = scalar_lea.vmem %s49_s10, 1024  ;;  %p10051_p6 = scmp.lt.s32.totalorder %s49_s10, %s49_s10 }
  0x2c   :  { %p10047_p5 = scmp.ne.s32.totalorder %s49_s10, %s10046_s20  ;;  %p10052_p7 = scmp.lt.s32.totalorder %s10046_s20, %s10046_s20 }
  0x2e   :  { %p10053_p8 = por %p10052_p7, %p10051_p6 }
  0x30   :  { %p10054_p9 = pnand %p10053_p8, %p10047_p5 }
  0x32   :  { %10057 = shalt.err (!%p10054_p9)
}
  0x33   :  { %s10115_s0 = smov 64   ;;  %s10116_s30 = smov 4  }
  0x34   :  { %54 = dma.hbm_to_vmem [thread:$0]  %s12329_s3, 1024, %s49_s10, [#allocation6], %s10115_s0, %s10115_s0, %s10116_s30  }
  0x35   :  { %s10117_s23 = smov [#allocation8]   ;;  %s10058_s27 = scalar_lea.hbm %s12331_s5, 256 }
  0x36   :  { %s63_s24 = sshll.u32 %s10117_s23, 4  ;;  %p10059_p10 = scmp.ne.s32.totalorder %s12331_s5, %s10058_s27  ;;  %s64_s24 = int_to_ptr.vmem [resolvable:$true] %s63_s24 }
  0x37   :  { %p10062_p11 = scmp.lt.u32.totalorder %s10058_s27, %s12331_s5 }
  0x39   :  { %p10064_p12 = pnand %p10062_p11, %p10059_p10 }
  0x3b   :  { %10067 = shalt.err (!%p10064_p12)
}
  0x3c   :  { %s10068_s11 = scalar_lea.vmem %s64_s24, 256  ;;  %p10073_p0 = scmp.lt.s32.totalorder %s64_s24, %s64_s24 }
  0x3d   :  { %p10069_p13 = scmp.ne.s32.totalorder %s64_s24, %s10068_s11  ;;  %p10074_p1 = scmp.lt.s32.totalorder %s10068_s11, %s10068_s11 }
  0x3f   :  { %p10075_p2 = por %p10074_p1, %p10073_p0 }
  0x41   :  { %p10076_p3 = pnand %p10075_p2, %p10069_p13 }
  0x43   :  { %10079 = shalt.err (!%p10076_p3)
}
  0x44   :  { %66 = dma.hbm_to_vmem [thread:$0]  %s12331_s5, 256, %s64_s24, [#allocation9]  }
  0x45   :  { %10102 = dma.done.wait [#allocation3], 256  }
  0x46   :  { %10103 = vsyncadd [#allocation3], 4294967040 }
  0x47   :  { %10104 = dma.done.wait [#allocation6], 1280  }
  0x48   :  { %10105 = vsyncadd [#allocation6], 4294966016 }
  0x49   :  { %10106 = dma.done.wait [#allocation9], 256  }
  0x4a   :  { %10107 = vsyncadd [#allocation9], 4294967040  ;;  %vm125_vm0 = vcmask 130048   ;;  %v119_v0 = vld [vmem:[#allocation5] sm:$0xff]  ;;  %v120_v1 = vld [vmem:[#allocation5 + $0x8] sm:$0xff]  ;;  %v121_v50 = vlaneseq }
  0x4b   :  { %v84_v2 = vld [vmem:[#allocation2] sm:$0xff]  ;;  %v133_v3 = vand.u32 4294901760, %v119_v0  ;;  %v136_v4 = vand.u32 4294901760, %v120_v1  ;;  %v85_v6 = vld [vmem:[#allocation2 + $0x8] sm:$0xff]  ;;  %v10236_v32 = vld [vmem:[#allocation7 + $0x10] sm:$0xff]  }
  0x4c   :  { %v127_v5 = vsel %vm125_vm0, %v84_v2, 0  ;;  %v130_v8 = vsel %vm125_vm0, %v85_v6, 0  ;;  %v10228_v30 = vld [vmem:[#allocation7] sm:$0xff]   ;;  %v10232_v31 = vld [vmem:[#allocation7 + $0x8] sm:$0xff]   ;;  %v10246_v33 = vld [vmem:[#allocation7 + $0x18] sm:$0xff]   ;;  %v10298_v51 = vshrl.u32 %v121_v50, 7  ;;  %v6852_v56 = vunpack.c.l.bf16 %v10236_v32 }
  0x4d   :  { %v199_v7 = vand.u32 4294901760, %v127_v5  ;;  %v8713_v9 = vpack.c.bf16 %v136_v4, %v133_v3  ;;  %v209_v10 = vand.u32 4294901760, %v130_v8  ;;  %v221_v11 = vsub.f32 %v119_v0, %v133_v3  ;;  %v10252_v34 = vld [vmem:[#allocation7 + $0x20] sm:$0xff]   ;;  %v10258_v35 = vld [vmem:[#allocation7 + $0x28] sm:$0xff]   ;;  %v10270_v40 = vld [vmem:[#allocation7 + $0x30] sm:$0xff]  }
  0x4e   :  { %v228_v12 = vsub.f32 %v120_v1, %v136_v4  ;;  %v6844_v36 = vunpack.c.l.bf16 %v10228_v30  ;;  %v6845_v37 = vunpack.c.h.bf16 %v10228_v30  ;;  %v10274_v41 = vld [vmem:[#allocation7 + $0x38] sm:$0xff]   ;;  %12426 = vst [vmem:[#allocation17_spill] sm:$0xff] %v10298_v51  ;;  %v10301_v52 = vsub.s32 0, %v10298_v51  ;;  %v10307_v54 = vld [vmem:[%s12333_s7] sm:$0xff] }
  0x4f   :  { %v200_v13 = vsub.f32 %v127_v5, %v199_v7  ;;  %8726 = vmatprep.subr.bf16.mxu0 %v8713_v9  ;;  %8714 = vmatprep.subr.bf16.mxu1 %v8713_v9  ;;  %v210_v14 = vsub.f32 %v130_v8, %v209_v10  ;;  %v222_v15 = vand.u32 4294901760, %v221_v11  ;;  %v6848_v53 = vunpack.c.l.bf16 %v10232_v31 }
  0x50   :  { %v229_v16 = vand.u32 4294901760, %v228_v12  ;;  %8728 = vmatpush3.bf16.msra.mxu0 %v8713_v9  ;;  %8716 = vmatpush3.bf16.msra.mxu1 %v8713_v9  ;;  %v8721_v29 = vpack.c.bf16 %v228_v12, %v221_v11  ;;  %v10266_v38 = vsub.f32 %v6844_v36, %v6844_v36  ;;  %v10268_v39 = vsub.f32 %v6845_v37, %v6845_v37 }
  0x51   :  { %v201_v17 = vand.u32 4294901760, %v200_v13  ;;  %v211_v18 = vand.u32 4294901760, %v210_v14  ;;  %v223_v19 = vsub.f32 %v221_v11, %v222_v15  ;;  %12427 = vst [vmem:[#allocation18_spill] sm:$0xff] %v10301_v52  ;;  %v6849_v55 = vunpack.c.h.bf16 %v10232_v31 }
  0x52   :  { %v230_v20 = vsub.f32 %v228_v12, %v229_v16  ;;  %v8729_v21 = vpack.c.bf16 %v229_v16, %v222_v15  ;;  %v721_v42 = vand.u32 4294901760, %v10266_v38  ;;  %v727_v43 = vand.u32 4294901760, %v10268_v39 }
  0x53   :  { %7646 = vmatprep.mubr.f32.mxu0 %v201_v17  ;;  %v202_v22 = vsub.f32 %v200_v13, %v201_v17  ;;  %v212_v23 = vsub.f32 %v210_v14, %v211_v18  ;;  %v224_v24 = vand.u32 4294901760, %v223_v19  ;;  %v10296_v49 = vpack.c.bf16 %v10268_v39, %v10266_v38 }
  0x54   :  { %7647 = vmatmul.mubr.f32.vlgmr.msra.gmra.mrb[0].mxu0 %v211_v18  ;;  %v231_v25 = vand.u32 4294901760, %v230_v20  ;;  %8730 = vmatprep.subr.bf16.mxu0 %v8729_v21  ;;  %v722_v44 = vsub.f32 %v10266_v38, %v721_v42  ;;  %v728_v45 = vsub.f32 %v10268_v39, %v727_v43  ;;  %v6853_v57 = vunpack.c.h.bf16 %v10236_v32 }
  0x55   :  { %v203_v26 = vand.u32 4294901760, %v202_v22  ;;  %8732 = vmatpush3.bf16.msra.mxu0 %v8729_v21  ;;  %7653 = vmatprep.mubr.f32.mxu0 %v199_v7  ;;  %v213_v27 = vand.u32 4294901760, %v212_v23  ;;  %12425 = vst [vmem:[#allocation16_spill] sm:$0xff] %v10296_v49  ;;  %v124_v60 = vrot.slane %v10307_v54, %v10301_v52  ;;  %v10314_v61 = vsub.f32 %v6848_v53, %v6848_v53  ;;  %v10849_v52 = vld [vmem:[%s12328_s2 + $0x70] sm:$0xff] }
  0x56   :  { %v8717_v28 = vpack.c.bf16 %v231_v25, %v224_v24  ;;  %8734 = vmatprep.subr.bf16.mxu0 %v8713_v9  ;;  %v723_v46 = vand.u32 4294901760, %v722_v44  ;;  %v729_v47 = vand.u32 4294901760, %v728_v45  ;;  %v10316_v62 = vsub.f32 %v6849_v55, %v6849_v55 }
  0x57   :  { %7625 = vmatprep.mubr.f32.mxu1 %v203_v26  ;;  %v10318_v63 = vsub.f32 %v6852_v56, %v6852_v56  ;;  %v10320_v0 = vsub.f32 %v6853_v57, %v6853_v57  ;;  %v6856_v1 = vunpack.c.l.bf16 %v10246_v33  ;;  %v6857_v3 = vunpack.c.h.bf16 %v10246_v33 }
  0x58   :  { %7626 = vmatmul.mubr.f32.vlgmr.msra.gmra.mrb[0].mxu1 %v213_v27  ;;  %8718 = vmatprep.subr.bf16.mxu1 %v8717_v28  ;;  %v10290_v48 = vpack.c.bf16 %v729_v47, %v723_v46  ;;  %v733_v6 = vand.u32 4294901760, %v10314_v61  ;;  %v739_v8 = vand.u32 4294901760, %v10316_v62  ;;  %v6860_v15 = vunpack.c.l.bf16 %v10252_v34 }
  0x59   :  { %8720 = vmatpush3.bf16.msra.mxu1 %v8717_v28  ;;  %7632 = vmatprep.mubr.f32.mxu1 %v199_v7  ;;  %v12337_v11 = vand.u32 4294901760, %v10320_v0  ;;  %v10330_v12 = vsub.f32 %v6856_v1, %v6856_v1  ;;  %v6861_v19 = vunpack.c.h.bf16 %v10252_v34  ;;  %v6864_v47 = vunpack.c.l.bf16 %v10258_v35 }
  0x5a   :  { %8722 = vmatprep.subr.bf16.mxu1 %v8721_v29  ;;  %12424 = vst [vmem:[#allocation15_spill] sm:$0xff] %v10290_v48  ;;  %v734_v18 = vsub.f32 %v10314_v61, %v733_v6  ;;  %v740_v22 = vsub.f32 %v10316_v62, %v739_v8  ;;  %v10374_v37 = vsub.f32 %v6860_v15, %v6860_v15  ;;  %v6865_v56 = vunpack.c.h.bf16 %v10258_v35 }
  0x5b   :  { %v752_v26 = vsub.f32 %v10320_v0, %v12337_v11  ;;  %v12336_v27 = vand.u32 4294901760, %v10330_v12  ;;  %v10380_v46 = vsub.f32 %v6861_v19, %v6861_v19  ;;  %v12445_v38 = vand.u32 4294901760, %v10320_v0 }
  0x5c   :  { %7654 = vmatmul.mubr.f32.vlgmr.msra.gmra.mrb[0].mxu0 %v209_v10  ;;  %v735_v55 = vand.u32 4294901760, %v734_v18 }
  0x5d   :  { %8736 = vmatpush3.bf16.msra.mxu0 %v8713_v9  ;;  %7660 = vmatprep.mubr.f32.mxu0 %v199_v7  ;;  %v12338_v9 = vand.u32 4294901760, %v10318_v63  ;;  %v775_v15 = vand.u32 4294901760, %v10380_v46 }
  0x5e   :  { %8930 = vmatprep.subr.bf16.mxu0 %v10228_v30 }
  0x5f   :  { %v746_v23 = vsub.f32 %v10318_v63, %v12338_v9 }
  0x60   :  { %7633 = vmatmul.mubr.f32.vlgmr.msra.gmra.mrb[0].mxu1 %v209_v10 }
  0x61   :  { %8724 = vmatpush3.bf16.msra.mxu1 %v8721_v29  ;;  %7639 = vmatprep.mubr.f32.mxu1 %v200_v13 }
  0x62   :  { %8738 = vmatprep.subr.bf16.mxu1 %v10228_v30 }
  0x64   :  { %7661 = vmatmul.mubr.f32.vlgmr.msra.gmra.mrb[0].mxu0 %v209_v10 }
  0x65   :  { %8932 = vmatpush3.bf16.msra.mxu0 %v10228_v30 }
  0x66   :  { %8934 = vmatprep.subr.bf16.mxu0 %v10232_v31 }
  0x68   :  { %7640 = vmatmul.mubr.f32.vlgmr.msra.gmra.mrb[0].mxu1 %v210_v14  ;;  %v10334_v14 = vsub.f32 %v6857_v3, %v6857_v3  ;;  %v753_v3 = vand.u32 4294901760, %v752_v26 }
  0x69   :  { %8740 = vmatpush3.bf16.msra.mxu1 %v10228_v30  ;;  %8936 = vmatpush3.bf16.msra.mxu0 %v10232_v31 }
  0x6a   :  { %8742 = vmatprep.subr.bf16.mxu1 %v10232_v31  ;;  %8938 = vmatprep.subr.bf16.mxu0 %v10236_v32  ;;  %v12335_v36 = vand.u32 4294901760, %v10334_v14 }
  0x6d   :  { %8744 = vmatpush3.bf16.msra.mxu1 %v10232_v31  ;;  %8940 = vmatpush3.bf16.msra.mxu0 %v10236_v32 }
  0x6e   :  { %8746 = vmatprep.subr.bf16.mxu1 %v10236_v32  ;;  %8942 = vmatprep.subr.bf16.mxu0 %v10246_v33 }
  0x71   :  { %8748 = vmatpush3.bf16.msra.mxu1 %v10236_v32  ;;  %8944 = vmatpush3.bf16.msra.mxu0 %v10246_v33 }
  0x72   :  { %8750 = vmatprep.subr.bf16.mxu1 %v10246_v33  ;;  %8946 = vmatprep.subr.bf16.mxu0 %v10252_v34 }
  0x75   :  { %8752 = vmatpush3.bf16.msra.mxu1 %v10246_v33  ;;  %8948 = vmatpush3.bf16.msra.mxu0 %v10252_v34 }
  0x76   :  { %8754 = vmatprep.subr.bf16.mxu1 %v10252_v34  ;;  %8950 = vmatprep.subr.bf16.mxu0 %v10258_v35 }
  0x79   :  { %8756 = vmatpush3.bf16.msra.mxu1 %v10252_v34  ;;  %8952 = vmatpush3.bf16.msra.mxu0 %v10258_v35 }
  0x7a   :  { %8758 = vmatprep.subr.bf16.mxu1 %v10258_v35  ;;  %8954 = vmatprep.subr.bf16.mxu0 %v10270_v40 }
  0x7d   :  { %8760 = vmatpush3.bf16.msra.mxu1 %v10258_v35  ;;  %8956 = vmatpush3.bf16.msra.mxu0 %v10270_v40 }
  0x7e   :  { %8762 = vmatprep.subr.bf16.mxu1 %v10270_v40  ;;  %8958 = vmatprep.subr.bf16.mxu0 %v10274_v41 }
  0x81   :  { %8764 = vmatpush3.bf16.msra.mxu1 %v10270_v40  ;;  %8960 = vmatpush3.bf16.msra.mxu0 %v10274_v41 }
  0x82   :  { %8766 = vmatprep.subr.bf16.mxu1 %v10274_v41  ;;  %8962 = vmatprep.subr.bf16.mxu0 %v10290_v48 }
  0x85   :  { %8768 = vmatpush3.bf16.msra.mxu1 %v10274_v41 }
  0x86   :  { %8770 = vmatprep.subr.bf16.mxu1 %v10290_v48 }
 0x137   :  { %v7662_v58 = vpop.f32.mrb[0].mxu0 }
 0x138   :  { %v624_v59 = vpop.f32.mrb[1].mxu0 }
 0x13b   :  { %v7641_v2 = vpop.f32.mrb[0].mxu1 }
 0x13c   :  { %v9697_v4 = vadd.f32 %v7641_v2, %v124_v60  ;;  %v378_v5 = vpop.f32.mrb[1].mxu1 }
 0x13d   :  { %v9699_v7 = vadd.f32 %v378_v5, %v124_v60  ;;  %v747_v60 = vand.u32 4294901760, %v746_v23  ;;  %v764_v5 = vsub.f32 %v10334_v14, %v12335_v36  ;;  %v6868_v36 = vunpack.c.l.bf16 %v10270_v40 }
 0x13e   :  { %v10327_v10 = vadd.f32 %v9697_v4, %v7662_v58  ;;  %v758_v4 = vsub.f32 %v10330_v12, %v12336_v27  ;;  %v6869_v27 = vunpack.c.h.bf16 %v10270_v40 }
 0x13f   :  { %v10332_v13 = vadd.f32 %v9699_v7, %v624_v59  ;;  %v741_v59 = vand.u32 4294901760, %v740_v22  ;;  %v769_v7 = vand.u32 4294901760, %v10374_v37  ;;  %v10412_v22 = vsub.f32 %v6865_v56, %v6865_v56 }
 0x140   :  { %v10338_v16 = vand.u32 4294901760, %v10327_v10  ;;  %v1223_v17 = vmul.f32 %v10327_v10, %v10327_v10  ;;  %v759_v11 = vand.u32 4294901760, %v758_v4  ;;  %v765_v9 = vand.u32 4294901760, %v764_v5 }
 0x141   :  { %v10347_v20 = vand.u32 4294901760, %v10332_v13  ;;  %v1222_v21 = vmul.f32 %v10332_v13, %v10332_v13  ;;  %v10414_v26 = vpack.c.bf16 %v741_v59, %v735_v55  ;;  %v776_v56 = vsub.f32 %v10380_v46, %v775_v15 }
 0x142   :  { %v10359_v24 = vsub.f32 %v10327_v10, %v10338_v16  ;;  %v10361_v25 = vand.u32 4294901760, %v1223_v17  ;;  %v12340_v59 = vand.u32 4294901760, %v10412_v22  ;;  %v6872_v4 = vunpack.c.l.bf16 %v10274_v41 }
 0x143   :  { %v10367_v28 = vand.u32 4294901760, %v1222_v21  ;;  %v10371_v29 = vsub.f32 %v10332_v13, %v10347_v20  ;;  %12428 = vst [vmem:[#allocation19_spill] sm:$0xff] %v10414_v26  ;;  %v6873_v5 = vunpack.c.h.bf16 %v10274_v41 }
 0x144   :  { %v711_v44 = vand.u32 4294901760, %v10359_v24  ;;  %v10378_v45 = vsub.f32 %v1223_v17, %v10361_v25  ;;  %v10404_v17 = vsub.f32 %v6864_v47, %v6864_v47 }
 0x145   :  { %v701_v50 = vand.u32 4294901760, %v10371_v29  ;;  %v10385_v53 = vsub.f32 %v1222_v21, %v10367_v28 }
 0x146   :  { %v712_v57 = vsub.f32 %v10359_v24, %v711_v44  ;;  %v12339_v58 = vand.u32 4294901760, %v10378_v45 }
 0x147   :  { %v702_v1 = vsub.f32 %v10371_v29, %v701_v50  ;;  %v1291_v2 = vand.u32 4294901760, %v10385_v53 }
 0x148   :  { %v1302_v21 = vsub.f32 %v10378_v45, %v12339_v58  ;;  %v713_v23 = vand.u32 4294901760, %v712_v57  ;;  %v770_v58 = vsub.f32 %v10374_v37, %v769_v7  ;;  %v12341_v57 = vand.u32 4294901760, %v10404_v17 }
 0x149   :  { %v703_v18 = vand.u32 4294901760, %v702_v1  ;;  %v1292_v19 = vsub.f32 %v10385_v53, %v1291_v2  ;;  %v10418_v1 = vpack.c.bf16 %v753_v3, %v747_v60  ;;  %v10431_v60 = vsub.f32 %v6868_v36, %v6868_v36 }
 0x14a   :  { %v1303_v55 = vand.u32 4294901760, %v1302_v21  ;;  %v10433_v3 = vsub.f32 %v6869_v27, %v6869_v27  ;;  %v777_v36 = vand.u32 4294901760, %v776_v56  ;;  %v782_v27 = vsub.f32 %v10404_v17, %v12341_v57 }
 0x14b   :  { %7695 = vmatprep.mubr.f32.mxu1 %v703_v18  ;;  %v1293_v47 = vand.u32 4294901760, %v1292_v19  ;;  %12429 = vst [vmem:[#allocation20_spill] sm:$0xff] %v10418_v1  ;;  %v10439_v18 = vpack.c.bf16 %v765_v9, %v759_v11  ;;  %v771_v19 = vand.u32 4294901760, %v770_v58  ;;  %v788_v21 = vsub.f32 %v10412_v22, %v12340_v59 }
 0x14c   :  { %7696 = vmatmul.mubr.f32.vlgmr.msra.gmra.mrb[2].mxu1 %v713_v23  ;;  %v793_v23 = vand.u32 4294901760, %v10431_v60  ;;  %v12342_v9 = vand.u32 4294901760, %v10433_v3  ;;  %v10452_v11 = vsub.f32 %v6872_v4, %v6872_v4 }
 0x14d   :  { %8772 = vmatpush3.bf16.msra.mxu1 %v10290_v48  ;;  %7730 = vmatprep.mubr.f32.mxu1 %v10347_v20  ;;  %12430 = vst [vmem:[#allocation21_spill] sm:$0xff] %v10439_v18  ;;  %v10459_v58 = vpack.c.bf16 %v777_v36, %v771_v19  ;;  %v789_v56 = vand.u32 4294901760, %v788_v21 }
 0x14e   :  { %7905 = vmatprep.mubr.f32.mxu0 %v1293_v47  ;;  %8774 = vmatprep.subr.bf16.mxu1 %v10414_v26  ;;  %v10454_v47 = vsub.f32 %v6873_v5, %v6873_v5  ;;  %v794_v59 = vsub.f32 %v10431_v60, %v793_v23  ;;  %v800_v4 = vsub.f32 %v10433_v3, %v12342_v9  ;;  %v805_v5 = vand.u32 4294901760, %v10452_v11 }
 0x14f   :  { %7906 = vmatmul.mubr.f32.vlgmr.msra.gmra.mrb[2].mxu0 %v1303_v55  ;;  %12431 = vst [vmem:[#allocation22_spill] sm:$0xff] %v10459_v58  ;;  %v783_v55 = vand.u32 4294901760, %v782_v27 }
 0x150   :  { %8964 = vmatpush3.bf16.msra.mxu0 %v10290_v48  ;;  %7940 = vmatprep.mubr.f32.mxu0 %v10367_v28  ;;  %v12343_v57 = vand.u32 4294901760, %v10454_v47  ;;  %v795_v36 = vand.u32 4294901760, %v794_v59  ;;  %v801_v27 = vand.u32 4294901760, %v800_v4  ;;  %v806_v21 = vsub.f32 %v10452_v11, %v805_v5 }
 0x151   :  { %8776 = vmatpush3.bf16.msra.mxu1 %v10414_v26  ;;  %8966 = vmatprep.subr.bf16.mxu0 %v10414_v26  ;;  %v10473_v19 = vpack.c.bf16 %v789_v56, %v783_v55 }
 0x152   :  { %8778 = vmatprep.subr.bf16.mxu1 %v10418_v1  ;;  %v812_v9 = vsub.f32 %v10454_v47, %v12343_v57  ;;  %v10486_v55 = vpack.c.bf16 %v801_v27, %v795_v36  ;;  %v807_v59 = vand.u32 4294901760, %v806_v21  ;;  %v10514_v36 = vpack.c.bf16 %v10320_v0, %v10318_v63 }
 0x153   :  { %12432 = vst [vmem:[#allocation23_spill] sm:$0xff] %v10473_v19  ;;  %v10524_v27 = vpack.c.bf16 %v10334_v14, %v10330_v12  ;;  %v10532_v21 = vpack.c.bf16 %v10380_v46, %v10374_v37  ;;  %v10556_v57 = vpack.c.bf16 %v10454_v47, %v10452_v11  ;;  %v12452_v0 = vand.u32 4294901760, %v10404_v17  ;;  %v10689_v37 = vld [vmem:[#allocation7] sm:$0xff]  }
 0x154   :  { %8968 = vmatpush3.bf16.msra.mxu0 %v10414_v26  ;;  %12433 = vst [vmem:[#allocation24_spill] sm:$0xff] %v10486_v55  ;;  %v813_v56 = vand.u32 4294901760, %v812_v9  ;;  %v10504_v9 = vpack.c.bf16 %v10316_v62, %v10314_v61  ;;  %12436 = vst [vmem:[#allocation27_spill] sm:$0xff] %v10514_v36  ;;  %v12449_v61 = vand.u32 4294901760, %v10334_v14 }
 0x155   :  { %8780 = vmatpush3.bf16.msra.mxu1 %v10418_v1  ;;  %8970 = vmatprep.subr.bf16.mxu0 %v10418_v1  ;;  %12437 = vst [vmem:[#allocation28_spill] sm:$0xff] %v10524_v27  ;;  %12438 = vst [vmem:[#allocation29_spill] sm:$0xff] %v10532_v21 }
 0x156   :  { %8782 = vmatprep.subr.bf16.mxu1 %v10439_v18  ;;  %v10492_v4 = vpack.c.bf16 %v813_v56, %v807_v59  ;;  %12435 = vst [vmem:[#allocation26_spill] sm:$0xff] %v10504_v9  ;;  %v10540_v59 = vpack.c.bf16 %v10412_v22, %v10404_v17  ;;  %v10548_v56 = vpack.c.bf16 %v10433_v3, %v10431_v60  ;;  %12441 = vst [vmem:[#allocation32_spill] sm:$0xff] %v10556_v57  ;;  %v10784_v17 = vld [vmem:[%s12328_s2 + $0x38] sm:$0xff] }
 0x158   :  { %8972 = vmatpush3.bf16.msra.mxu0 %v10418_v1  ;;  %12434 = vst [vmem:[#allocation25_spill] sm:$0xff] %v10492_v4  ;;  %12439 = vst [vmem:[#allocation30_spill] sm:$0xff] %v10540_v59 }
 0x159   :  { %8784 = vmatpush3.bf16.msra.mxu1 %v10439_v18  ;;  %8974 = vmatprep.subr.bf16.mxu0 %v10439_v18  ;;  %12440 = vst [vmem:[#allocation31_spill] sm:$0xff] %v10548_v56 }
 0x15a   :  { %8786 = vmatprep.subr.bf16.mxu1 %v10459_v58 }
 0x15c   :  { %8976 = vmatpush3.bf16.msra.mxu0 %v10439_v18  ;;  %v11050_v18 = vsub.s32 2, %v10298_v51 }
 0x15d   :  { %8788 = vmatpush3.bf16.msra.mxu1 %v10459_v58  ;;  %8978 = vmatprep.subr.bf16.mxu0 %v10459_v58 }
 0x15e   :  { %8790 = vmatprep.subr.bf16.mxu1 %v10473_v19 }
 0x160   :  { %8980 = vmatpush3.bf16.msra.mxu0 %v10459_v58  ;;  %v1828_v58 = vsub.s32 1, %v10298_v51 }
 0x161   :  { %8792 = vmatpush3.bf16.msra.mxu1 %v10473_v19  ;;  %8982 = vmatprep.subr.bf16.mxu0 %v10473_v19 }
 0x162   :  { %8794 = vmatprep.subr.bf16.mxu1 %v10486_v55  ;;  %v1829_v26 = vrot.slane %v10307_v54, %v1828_v58 }
 0x164   :  { %8984 = vmatpush3.bf16.msra.mxu0 %v10473_v19 }
 0x165   :  { %8796 = vmatpush3.bf16.msra.mxu1 %v10486_v55  ;;  %8986 = vmatprep.subr.bf16.mxu0 %v10486_v55 }
 0x166   :  { %8798 = vmatprep.subr.bf16.mxu1 %v10492_v4 }
 0x168   :  { %8988 = vmatpush3.bf16.msra.mxu0 %v10486_v55 }
 0x169   :  { %8800 = vmatpush3.bf16.msra.mxu1 %v10492_v4  ;;  %8990 = vmatprep.subr.bf16.mxu0 %v10492_v4 }
 0x16a   :  { %8802 = vmatprep.subr.bf16.mxu1 %v10296_v49 }
 0x16c   :  { %8992 = vmatpush3.bf16.msra.mxu0 %v10492_v4  ;;  %7731 = vmatmul.mubr.f32.vlgmr.msra.gmra.mrb[2].mxu1 %v10338_v16 }
 0x16d   :  { %8804 = vmatpush3.bf16.msra.mxu1 %v10296_v49  ;;  %7765 = vmatprep.mubr.f32.mxu1 %v10371_v29 }
 0x16e   :  { %8994 = vmatprep.subr.bf16.mxu0 %v10296_v49  ;;  %8806 = vmatprep.subr.bf16.mxu1 %v10504_v9 }
 0x16f   :  { %7941 = vmatmul.mubr.f32.vlgmr.msra.gmra.mrb[2].mxu0 %v10361_v25 }
 0x170   :  { %8996 = vmatpush3.bf16.msra.mxu0 %v10296_v49  ;;  %7975 = vmatprep.mubr.f32.mxu0 %v10385_v53  ;;  %v1853_v53 = vld [vmem:[%s12328_s2 + $0x28] sm:$0xff] }
 0x171   :  { %8808 = vmatpush3.bf16.msra.mxu1 %v10504_v9  ;;  %8998 = vmatprep.subr.bf16.mxu0 %v10504_v9 }
 0x172   :  { %8810 = vmatprep.subr.bf16.mxu1 %v10514_v36 }
 0x174   :  { %9000 = vmatpush3.bf16.msra.mxu0 %v10504_v9 }
 0x175   :  { %8812 = vmatpush3.bf16.msra.mxu1 %v10514_v36  ;;  %9002 = vmatprep.subr.bf16.mxu0 %v10514_v36 }
 0x176   :  { %8814 = vmatprep.subr.bf16.mxu1 %v10524_v27 }
 0x178   :  { %9004 = vmatpush3.bf16.msra.mxu0 %v10514_v36 }
 0x179   :  { %8816 = vmatpush3.bf16.msra.mxu1 %v10524_v27  ;;  %9006 = vmatprep.subr.bf16.mxu0 %v10524_v27 }
 0x17a   :  { %8818 = vmatprep.subr.bf16.mxu1 %v10532_v21 }
 0x17c   :  { %9008 = vmatpush3.bf16.msra.mxu0 %v10524_v27 }
 0x17d   :  { %8820 = vmatpush3.bf16.msra.mxu1 %v10532_v21  ;;  %9010 = vmatprep.subr.bf16.mxu0 %v10532_v21 }
 0x17e   :  { %8822 = vmatprep.subr.bf16.mxu1 %v10540_v59 }
 0x180   :  { %9012 = vmatpush3.bf16.msra.mxu0 %v10532_v21 }
 0x181   :  { %8824 = vmatpush3.bf16.msra.mxu1 %v10540_v59  ;;  %9014 = vmatprep.subr.bf16.mxu0 %v10540_v59 }
 0x182   :  { %8826 = vmatprep.subr.bf16.mxu1 %v10548_v56 }
 0x184   :  { %9016 = vmatpush3.bf16.msra.mxu0 %v10540_v59 }
 0x185   :  { %8828 = vmatpush3.bf16.msra.mxu1 %v10548_v56  ;;  %9018 = vmatprep.subr.bf16.mxu0 %v10548_v56 }
 0x186   :  { %8830 = vmatprep.subr.bf16.mxu1 %v10556_v57 }
 0x188   :  { %9020 = vmatpush3.bf16.msra.mxu0 %v10548_v56 }
 0x189   :  { %8832 = vmatpush3.bf16.msra.mxu1 %v10556_v57  ;;  %9022 = vmatprep.subr.bf16.mxu0 %v10556_v57 }
 0x18a   :  { %8834 = vmatprep.subr.bf16.mxu1 %v10228_v30 }
 0x18c   :  { %9024 = vmatpush3.bf16.msra.mxu0 %v10556_v57  ;;  %7766 = vmatmul.mubr.f32.vlgmr.msra.gmra.mrb[2].mxu1 %v10359_v24  ;;  %v12457_v24 = vand.u32 4294901760, %v10454_v47 }
 0x18d   :  { %8836 = vmatpush3.bf16.msra.mxu1 %v10228_v30  ;;  %7800 = vmatprep.mubr.f32.mxu1 %v701_v50  ;;  %v1852_v50 = vld [vmem:[%s12328_s2 + $0x20] sm:$0xff] }
 0x18e   :  { %9026 = vmatprep.subr.bf16.mxu0 %v10228_v30  ;;  %8838 = vmatprep.subr.bf16.mxu1 %v10232_v31  ;;  %v10680_v29 = vpack.c.bf16 %v12457_v24, %v805_v5 }
 0x18f   :  { %7976 = vmatmul.mubr.f32.vlgmr.msra.gmra.mrb[2].mxu0 %v10378_v45 }
 0x190   :  { %9028 = vmatpush3.bf16.msra.mxu0 %v10228_v30  ;;  %8010 = vmatprep.mubr.f32.mxu0 %v1291_v2  ;;  %v10604_v30 = vpack.c.bf16 %v727_v43, %v721_v42  ;;  %v12447_v42 = vand.u32 4294901760, %v10378_v45  ;;  %v12448_v43 = vand.u32 4294901760, %v10330_v12  ;;  %v12455_v12 = vand.u32 4294901760, %v10433_v3  ;;  %12458 = vst [vmem:[#allocation40_spill] sm:$0xff] %v10680_v29  ;;  %v10705_v45 = vld [vmem:[#allocation7 + $0x10] sm:$0xff]  }
 0x191   :  { %8840 = vmatpush3.bf16.msra.mxu1 %v10232_v31  ;;  %9030 = vmatprep.subr.bf16.mxu0 %v10232_v31  ;;  %12460 = vst [vmem:[#allocation42_spill] sm:$0xff] %v10705_v45  ;;  %v1881_v2 = vand.u32 4294901760, %v1852_v50  ;;  %v1890_v3 = vand.u32 4294901760, %v10784_v17 }
 0x192   :  { %8842 = vmatprep.subr.bf16.mxu1 %v10236_v32  ;;  %12442 = vst [vmem:[#allocation33_spill] sm:$0xff] %v10604_v30  ;;  %v10640_v62 = vpack.c.bf16 %v12449_v61, %v12448_v43  ;;  %v10670_v14 = vpack.c.bf16 %v12455_v12, %v793_v23  ;;  %v10797_v23 = vld [vmem:[%s12328_s2 + $0x48] sm:$0xff] }
 0x193   :  { %v12344_v5 = vand.u32 4294901760, %v10797_v23  ;;  %v10834_v12 = vld [vmem:[%s12328_s2 + $0x68] sm:$0xff] }
 0x194   :  { %9032 = vmatpush3.bf16.msra.mxu0 %v10232_v31  ;;  %v10614_v31 = vpack.c.bf16 %v739_v8, %v733_v6  ;;  %12450 = vst [vmem:[#allocation36_spill] sm:$0xff] %v10640_v62  ;;  %v12453_v6 = vand.u32 4294901760, %v10412_v22  ;;  %12456 = vst [vmem:[#allocation39_spill] sm:$0xff] %v10670_v14  ;;  %v10789_v22 = vld [vmem:[%s12328_s2 + $0x40] sm:$0xff] }
 0x195   :  { %8844 = vmatpush3.bf16.msra.mxu1 %v10236_v32  ;;  %9034 = vmatprep.subr.bf16.mxu0 %v10236_v32  ;;  %v12345_v47 = vand.u32 4294901760, %v10789_v22 }
 0x196   :  { %8846 = vmatprep.subr.bf16.mxu1 %v10246_v33  ;;  %12443 = vst [vmem:[#allocation34_spill] sm:$0xff] %v10614_v31  ;;  %v10660_v8 = vpack.c.bf16 %v12453_v6, %v12452_v0  ;;  %v10829_v6 = vld [vmem:[%s12328_s2 + $0x60] sm:$0xff] }
 0x197   :  { %v10822_v43 = vpack.c.bf16 %v12344_v5, %v12345_v47  ;;  %v12361_v5 = vand.u32 4294901760, %v10829_v6  ;;  %v12360_v47 = vand.u32 4294901760, %v10834_v12 }
 0x198   :  { %9036 = vmatpush3.bf16.msra.mxu0 %v10236_v32  ;;  %v12444_v32 = vand.u32 4294901760, %v10318_v63  ;;  %v10650_v63 = vpack.c.bf16 %v775_v15, %v769_v7  ;;  %12454 = vst [vmem:[#allocation38_spill] sm:$0xff] %v10660_v8  ;;  %v1884_v7 = vand.u32 4294901760, %v1853_v53  ;;  %v10779_v15 = vld [vmem:[%s12328_s2 + $0x30] sm:$0xff] }
 0x199   :  { %8848 = vmatpush3.bf16.msra.mxu1 %v10246_v33  ;;  %9038 = vmatprep.subr.bf16.mxu0 %v10246_v33  ;;  %v1887_v60 = vand.u32 4294901760, %v10779_v15 }
 0x19a   :  { %8850 = vmatprep.subr.bf16.mxu1 %v10252_v34  ;;  %v10627_v39 = vpack.c.bf16 %v12445_v38, %v12444_v32  ;;  %12451 = vst [vmem:[#allocation37_spill] sm:$0xff] %v10650_v63  ;;  %v10799_v11 = vpack.c.bf16 %v1884_v7, %v1881_v2  ;;  %v10808_v38 = vld [vmem:[%s12328_s2 + $0x50] sm:$0xff] }
 0x19b   :  { %v10803_v32 = vpack.c.bf16 %v1890_v3, %v1887_v60  ;;  %v12351_v61 = vand.u32 4294901760, %v10808_v38 }
 0x19c   :  { %9040 = vmatpush3.bf16.msra.mxu0 %v10246_v33  ;;  %12446 = vst [vmem:[#allocation35_spill] sm:$0xff] %v10627_v39 }
 0x19d   :  { %8852 = vmatpush3.bf16.msra.mxu1 %v10252_v34  ;;  %9042 = vmatprep.subr.bf16.mxu0 %v10252_v34 }
 0x19e   :  { %8854 = vmatprep.subr.bf16.mxu1 %v10258_v35 }
 0x1a0   :  { %9044 = vmatpush3.bf16.msra.mxu0 %v10252_v34 }
 0x1a1   :  { %8856 = vmatpush3.bf16.msra.mxu1 %v10258_v35  ;;  %9046 = vmatprep.subr.bf16.mxu0 %v10258_v35 }
 0x1a2   :  { %8858 = vmatprep.subr.bf16.mxu1 %v10270_v40 }
 0x1a4   :  { %9048 = vmatpush3.bf16.msra.mxu0 %v10258_v35 }
 0x1a5   :  { %8860 = vmatpush3.bf16.msra.mxu1 %v10270_v40  ;;  %9050 = vmatprep.subr.bf16.mxu0 %v10270_v40 }
 0x1a6   :  { %8862 = vmatprep.subr.bf16.mxu1 %v10274_v41 }
 0x1a8   :  { %9052 = vmatpush3.bf16.msra.mxu0 %v10270_v40 }
 0x1a9   :  { %8864 = vmatpush3.bf16.msra.mxu1 %v10274_v41  ;;  %9054 = vmatprep.subr.bf16.mxu0 %v10274_v41 }
 0x1aa   :  { %8866 = vmatprep.subr.bf16.mxu1 %v10604_v30 }
 0x1ac   :  { %9056 = vmatpush3.bf16.msra.mxu0 %v10274_v41  ;;  %7801 = vmatmul.mubr.f32.vlgmr.msra.gmra.mrb[2].mxu1 %v711_v44  ;;  %v10697_v44 = vld [vmem:[#allocation7 + $0x8] sm:$0xff]  }
 0x1ad   :  { %8868 = vmatpush3.bf16.msra.mxu1 %v10604_v30  ;;  %7835 = vmatprep.mubr.f32.mxu1 %v10347_v20  ;;  %12459 = vst [vmem:[#allocation41_spill] sm:$0xff] %v10697_v44 }
 0x1ae   :  { %9058 = vmatprep.subr.bf16.mxu0 %v10604_v30  ;;  %8870 = vmatprep.subr.bf16.mxu1 %v10614_v31 }
 0x1af   :  { %8011 = vmatmul.mubr.f32.vlgmr.msra.gmra.mrb[2].mxu0 %v12447_v42  ;;  %v10813_v42 = vld [vmem:[%s12328_s2 + $0x58] sm:$0xff] }
 0x1b0   :  { %9060 = vmatpush3.bf16.msra.mxu0 %v10604_v30  ;;  %8045 = vmatprep.mubr.f32.mxu0 %v10367_v28  ;;  %v12350_v0 = vand.u32 4294901760, %v10813_v42 }
 0x1b1   :  { %8872 = vmatpush3.bf16.msra.mxu1 %v10614_v31  ;;  %9062 = vmatprep.subr.bf16.mxu0 %v10614_v31 }
 0x1b2   :  { %8874 = vmatprep.subr.bf16.mxu1 %v10627_v39  ;;  %v10842_v24 = vpack.c.bf16 %v12350_v0, %v12351_v61  ;;  %v10862_v0 = vpack.c.bf16 %v12360_v47, %v12361_v5  ;;  %v12365_v61 = vand.u32 4294901760, %v10849_v52 }
 0x1b4   :  { %9064 = vmatpush3.bf16.msra.mxu0 %v10614_v31 }
 0x1b5   :  { %8876 = vmatpush3.bf16.msra.mxu1 %v10627_v39  ;;  %9066 = vmatprep.subr.bf16.mxu0 %v10627_v39 }
 0x1b6   :  { %8878 = vmatprep.subr.bf16.mxu1 %v10640_v62 }
 0x1b8   :  { %9068 = vmatpush3.bf16.msra.mxu0 %v10627_v39 }
 0x1b9   :  { %8880 = vmatpush3.bf16.msra.mxu1 %v10640_v62  ;;  %9070 = vmatprep.subr.bf16.mxu0 %v10640_v62 }
 0x1ba   :  { %8882 = vmatprep.subr.bf16.mxu1 %v10650_v63 }
 0x1bc   :  { %9072 = vmatpush3.bf16.msra.mxu0 %v10640_v62 }
 0x1bd   :  { %8884 = vmatpush3.bf16.msra.mxu1 %v10650_v63  ;;  %9074 = vmatprep.subr.bf16.mxu0 %v10650_v63 }
 0x1be   :  { %8886 = vmatprep.subr.bf16.mxu1 %v10660_v8 }
 0x1c0   :  { %9076 = vmatpush3.bf16.msra.mxu0 %v10650_v63 }
 0x1c1   :  { %8888 = vmatpush3.bf16.msra.mxu1 %v10660_v8  ;;  %9078 = vmatprep.subr.bf16.mxu0 %v10660_v8 }
 0x1c2   :  { %8890 = vmatprep.subr.bf16.mxu1 %v10670_v14 }
 0x1c4   :  { %9080 = vmatpush3.bf16.msra.mxu0 %v10660_v8 }
 0x1c5   :  { %8892 = vmatpush3.bf16.msra.mxu1 %v10670_v14  ;;  %9082 = vmatprep.subr.bf16.mxu0 %v10670_v14 }
 0x1c6   :  { %8894 = vmatprep.subr.bf16.mxu1 %v10680_v29 }
 0x1c8   :  { %9084 = vmatpush3.bf16.msra.mxu0 %v10670_v14 }
 0x1c9   :  { %8896 = vmatpush3.bf16.msra.mxu1 %v10680_v29  ;;  %9086 = vmatprep.subr.bf16.mxu0 %v10680_v29 }
 0x1ca   :  { %8898 = vmatprep.subr.bf16.mxu1 %v10689_v37 }
 0x1cc   :  { %9088 = vmatpush3.bf16.msra.mxu0 %v10680_v29  ;;  %7836 = vmatmul.mubr.f32.vlgmr.msra.gmra.mrb[2].mxu1 %v10338_v16  ;;  %v10854_v29 = vld [vmem:[%s12328_s2 + $0x78] sm:$0xff] }
 0x1cd   :  { %8900 = vmatpush3.bf16.msra.mxu1 %v10689_v37  ;;  %7870 = vmatprep.mubr.f32.mxu1 %v10347_v20  ;;  %v12364_v14 = vand.u32 4294901760, %v10854_v29 }
 0x1ce   :  { %9090 = vmatprep.subr.bf16.mxu0 %v10689_v37  ;;  %8902 = vmatprep.subr.bf16.mxu1 %v10697_v44 }
 0x1cf   :  { %8046 = vmatmul.mubr.f32.vlgmr.msra.gmra.mrb[2].mxu0 %v10361_v25  ;;  %v10872_v8 = vpack.c.bf16 %v12364_v14, %v12365_v61 }
 0x1d0   :  { %9092 = vmatpush3.bf16.msra.mxu0 %v10689_v37  ;;  %8080 = vmatprep.mubr.f32.mxu0 %v10367_v28 }
 0x1d1   :  { %8904 = vmatpush3.bf16.msra.mxu1 %v10697_v44  ;;  %9094 = vmatprep.subr.bf16.mxu0 %v10697_v44 }
 0x1d2   :  { %8906 = vmatprep.subr.bf16.mxu1 %v10705_v45 }
 0x1d4   :  { %9096 = vmatpush3.bf16.msra.mxu0 %v10697_v44 }
 0x1d5   :  { %8908 = vmatpush3.bf16.msra.mxu1 %v10705_v45  ;;  %9098 = vmatprep.subr.bf16.mxu0 %v10705_v45 }
 0x1d6   :  { %8910 = vmatprep.subr.bf16.mxu1 %v10246_v33 }
 0x1d8   :  { %9100 = vmatpush3.bf16.msra.mxu0 %v10705_v45 }
 0x1d9   :  { %8912 = vmatpush3.bf16.msra.mxu1 %v10246_v33  ;;  %9102 = vmatprep.subr.bf16.mxu0 %v10246_v33 }
 0x1da   :  { %8914 = vmatprep.subr.bf16.mxu1 %v10252_v34 }
 0x1dc   :  { %9104 = vmatpush3.bf16.msra.mxu0 %v10246_v33 }
 0x1dd   :  { %8916 = vmatpush3.bf16.msra.mxu1 %v10252_v34  ;;  %9106 = vmatprep.subr.bf16.mxu0 %v10252_v34 }
 0x1de   :  { %8918 = vmatprep.subr.bf16.mxu1 %v10258_v35 }
 0x1e0   :  { %9108 = vmatpush3.bf16.msra.mxu0 %v10252_v34 }
 0x1e1   :  { %8920 = vmatpush3.bf16.msra.mxu1 %v10258_v35  ;;  %9110 = vmatprep.subr.bf16.mxu0 %v10258_v35 }
 0x1e2   :  { %8922 = vmatprep.subr.bf16.mxu1 %v10270_v40 }
 0x1e4   :  { %9112 = vmatpush3.bf16.msra.mxu0 %v10258_v35 }
 0x1e5   :  { %8924 = vmatpush3.bf16.msra.mxu1 %v10270_v40  ;;  %9114 = vmatprep.subr.bf16.mxu0 %v10270_v40 }
 0x1e6   :  { %8926 = vmatprep.subr.bf16.mxu1 %v10274_v41 }
 0x1e8   :  { %9116 = vmatpush3.bf16.msra.mxu0 %v10270_v40 }
 0x1e9   :  { %8928 = vmatpush3.bf16.msra.mxu1 %v10274_v41  ;;  %9118 = vmatprep.subr.bf16.mxu0 %v10274_v41 }
 0x1ec   :  { %9120 = vmatpush3.bf16.msra.mxu0 %v10274_v41  ;;  %7871 = vmatmul.mubr.f32.vlgmr.msra.gmra.mrb[2].mxu1 %v10338_v16 }
 0x1ed   :  { %9314 = vmatprep.subr.bf16.mxu0 %v10689_v37 }
 0x1ef   :  { %8081 = vmatmul.mubr.f32.vlgmr.msra.gmra.mrb[2].mxu0 %v10361_v25 }
 0x1f0   :  { %9316 = vmatpush3.bf16.msra.mxu0 %v10689_v37 }
 0x1f1   :  { %9318 = vmatprep.subr.bf16.mxu0 %v10697_v44 }
 0x1f4   :  { %9320 = vmatpush3.bf16.msra.mxu0 %v10697_v44 }
 0x1f5   :  { %9322 = vmatprep.subr.bf16.mxu0 %v10705_v45 }
 0x1f8   :  { %9324 = vmatpush3.bf16.msra.mxu0 %v10705_v45 }
 0x1f9   :  { %9326 = vmatprep.subr.bf16.mxu0 %v10246_v33 }
 0x1fc   :  { %9328 = vmatpush3.bf16.msra.mxu0 %v10246_v33  ;;  %v1848_v33 = vld [vmem:[%s12328_s2] sm:$0xff] }
 0x1fd   :  { %9330 = vmatprep.subr.bf16.mxu0 %v10252_v34  ;;  %v1869_v16 = vand.u32 4294901760, %v1848_v33 }
 0x1ff   :  { %v10874_v63 = vsub.f32 %v1848_v33, %v1869_v16 }
 0x200   :  { %9332 = vmatpush3.bf16.msra.mxu0 %v10252_v34  ;;  %v1849_v34 = vld [vmem:[%s12328_s2 + $0x8] sm:$0xff] }
 0x201   :  { %9334 = vmatprep.subr.bf16.mxu0 %v10258_v35  ;;  %v12370_v47 = vand.u32 4294901760, %v10874_v63 }
 0x203   :  { %v1973_v39 = vsub.f32 %v10874_v63, %v12370_v47 }
 0x204   :  { %9336 = vmatpush3.bf16.msra.mxu0 %v10258_v35  ;;  %v1872_v35 = vand.u32 4294901760, %v1849_v34 }
 0x205   :  { %9338 = vmatprep.subr.bf16.mxu0 %v10270_v40 }
 0x206   :  { %v10757_v20 = vpack.c.bf16 %v1872_v35, %v1869_v16  ;;  %v10876_v62 = vsub.f32 %v1849_v34, %v1872_v35  ;;  %v1974_v16 = vand.u32 4294901760, %v1973_v39  ;;  %v10905_v39 = vsub.f32 %v1853_v53, %v1884_v7 }
 0x207   :  { %v10919_v53 = vsub.f32 %v10779_v15, %v1887_v60 }
 0x208   :  { %9340 = vmatpush3.bf16.msra.mxu0 %v10270_v40  ;;  %v1850_v40 = vld [vmem:[%s12328_s2 + $0x10] sm:$0xff]  ;;  %9122 = vmatprep.subr.bf16.mxu1 %v10757_v20  ;;  %v12378_v5 = vand.u32 4294901760, %v10876_v62 }
 0x209   :  { %9342 = vmatprep.subr.bf16.mxu0 %v10274_v41  ;;  %v1875_v25 = vand.u32 4294901760, %v1850_v40  ;;  %9124 = vmatpush3.bf16.msra.mxu1 %v10757_v20 }
 0x20a   :  { %v1980_v14 = vsub.f32 %v10876_v62, %v12378_v5 }
 0x20b   :  { %v10888_v33 = vsub.f32 %v1850_v40, %v1875_v25 }
 0x20c   :  { %9344 = vmatpush3.bf16.msra.mxu0 %v10274_v41  ;;  %v1851_v41 = vld [vmem:[%s12328_s2 + $0x18] sm:$0xff]  ;;  %v1981_v35 = vand.u32 4294901760, %v1980_v14 }
 0x20d   :  { %9346 = vmatprep.subr.bf16.mxu0 %v10290_v48  ;;  %v1878_v28 = vand.u32 4294901760, %v1851_v41  ;;  %v12371_v61 = vand.u32 4294901760, %v10888_v33 }
 0x20e   :  { %v10895_v30 = vpack.c.bf16 %v1981_v35, %v1974_v16  ;;  %v12373_v16 = vand.u32 4294901760, %v10905_v39 }
 0x20f   :  { %v10767_v46 = vpack.c.bf16 %v1878_v28, %v1875_v25  ;;  %v10890_v34 = vsub.f32 %v1851_v41, %v1878_v28  ;;  %v1987_v47 = vsub.f32 %v10888_v33, %v12371_v61  ;;  %v10903_v41 = vsub.f32 %v1852_v50, %v1881_v2 }
 0x210   :  { %v2008_v50 = vsub.f32 %v10905_v39, %v12373_v16  ;;  %v10922_v2 = vsub.f32 %v10784_v17, %v1890_v3  ;;  %v12461_v16 = vand.u32 4294901760, %v10789_v22  ;;  %v12462_v17 = vand.u32 4294901760, %v10797_v23 }
 0x211   :  { %9126 = vmatprep.subr.bf16.mxu1 %v10767_v46  ;;  %v12376_v31 = vand.u32 4294901760, %v10890_v34  ;;  %v1988_v14 = vand.u32 4294901760, %v1987_v47  ;;  %v12372_v28 = vand.u32 4294901760, %v10903_v41 }
 0x212   :  { %9128 = vmatpush3.bf16.msra.mxu1 %v10767_v46  ;;  %v2009_v47 = vand.u32 4294901760, %v2008_v50  ;;  %v10934_v15 = vsub.f32 %v10789_v22, %v12461_v16  ;;  %v10939_v60 = vsub.f32 %v10797_v23, %v12462_v17  ;;  %v12463_v23 = vand.u32 4294901760, %v10808_v38 }
 0x213   :  { %9130 = vmatprep.subr.bf16.mxu1 %v10799_v11  ;;  %v1994_v40 = vsub.f32 %v10890_v34, %v12376_v31  ;;  %v2001_v61 = vsub.f32 %v10903_v41, %v12372_v28 }
 0x214   :  { %v12377_v50 = vand.u32 4294901760, %v10934_v15  ;;  %v10955_v17 = vsub.f32 %v10808_v38, %v12463_v23 }
 0x215   :  { %v1995_v25 = vand.u32 4294901760, %v1994_v40  ;;  %v2002_v7 = vand.u32 4294901760, %v2001_v61  ;;  %v12375_v40 = vand.u32 4294901760, %v10919_v53 }
 0x216   :  { %9132 = vmatpush3.bf16.msra.mxu1 %v10799_v11  ;;  %v2029_v22 = vsub.f32 %v10934_v15, %v12377_v50  ;;  %v12381_v50 = vand.u32 4294901760, %v10955_v17 }
 0x217   :  { %9134 = vmatprep.subr.bf16.mxu1 %v10803_v32  ;;  %v10910_v35 = vpack.c.bf16 %v1995_v25, %v1988_v14  ;;  %v12374_v14 = vand.u32 4294901760, %v10922_v2  ;;  %v10926_v25 = vpack.c.bf16 %v2009_v47, %v2002_v7  ;;  %v2015_v28 = vsub.f32 %v10919_v53, %v12375_v40 }
 0x218   :  { %v12384_v7 = vand.u32 4294901760, %v10939_v60  ;;  %v2043_v38 = vsub.f32 %v10955_v17, %v12381_v50 }
 0x219   :  { %v2022_v3 = vsub.f32 %v10922_v2, %v12374_v14  ;;  %v2016_v61 = vand.u32 4294901760, %v2015_v28  ;;  %v12464_v28 = vand.u32 4294901760, %v10813_v42 }
 0x21a   :  { %9136 = vmatpush3.bf16.msra.mxu1 %v10803_v32  ;;  %v2036_v16 = vsub.f32 %v10939_v60, %v12384_v7 }
 0x21b   :  { %9138 = vmatprep.subr.bf16.mxu1 %v10822_v43  ;;  %v2023_v47 = vand.u32 4294901760, %v2022_v3  ;;  %v10960_v14 = vsub.f32 %v10813_v42, %v12464_v28  ;;  %v2030_v3 = vand.u32 4294901760, %v2029_v22  ;;  %v12465_v42 = vand.u32 4294901760, %v10829_v6 }
 0x21c   :  { %v2037_v31 = vand.u32 4294901760, %v2036_v16 }
 0x21d   :  { %v10962_v40 = vpack.c.bf16 %v2023_v47, %v2016_v61  ;;  %v12382_v5 = vand.u32 4294901760, %v10960_v14  ;;  %v10977_v61 = vsub.f32 %v10829_v6, %v12465_v42  ;;  %v12466_v47 = vand.u32 4294901760, %v10834_v12 }
 0x21e   :  { %9140 = vmatpush3.bf16.msra.mxu1 %v10822_v43  ;;  %v10966_v57 = vpack.c.bf16 %v2037_v31, %v2030_v3  ;;  %v2044_v31 = vand.u32 4294901760, %v2043_v38  ;;  %v12467_v6 = vand.u32 4294901760, %v10849_v52 }
 0x21f   :  { %9142 = vmatprep.subr.bf16.mxu1 %v10842_v24  ;;  %v2050_v23 = vsub.f32 %v10960_v14, %v12382_v5  ;;  %v10982_v22 = vsub.f32 %v10834_v12, %v12466_v47  ;;  %v12383_v28 = vand.u32 4294901760, %v10977_v61  ;;  %v12468_v12 = vand.u32 4294901760, %v10854_v29 }
 0x220   :  { %v10994_v42 = vsub.f32 %v10849_v52, %v12467_v6 }
 0x221   :  { %v2051_v16 = vand.u32 4294901760, %v2050_v23  ;;  %v12389_v3 = vand.u32 4294901760, %v10982_v22  ;;  %v2057_v5 = vsub.f32 %v10977_v61, %v12383_v28  ;;  %v10999_v38 = vsub.f32 %v10854_v29, %v12468_v12 }
 0x222   :  { %9144 = vmatpush3.bf16.msra.mxu1 %v10842_v24 }
 0x223   :  { %9146 = vmatprep.subr.bf16.mxu1 %v10862_v0  ;;  %v10986_v50 = vpack.c.bf16 %v2051_v16, %v2044_v31  ;;  %v2064_v23 = vsub.f32 %v10982_v22, %v12389_v3  ;;  %v2058_v47 = vand.u32 4294901760, %v2057_v5  ;;  %v12387_v31 = vand.u32 4294901760, %v10994_v42 }
 0x224   :  { %v12388_v16 = vand.u32 4294901760, %v10999_v38  ;;  %v11018_v5 = vpack.c.bf16 %v10876_v62, %v10874_v63 }
 0x225   :  { %v2065_v28 = vand.u32 4294901760, %v2064_v23  ;;  %v2071_v52 = vsub.f32 %v10994_v42, %v12387_v31  ;;  %v11022_v23 = vpack.c.bf16 %v10890_v34, %v10888_v33  ;;  %v11026_v31 = vpack.c.bf16 %v10905_v39, %v10903_v41 }
 0x226   :  { %9148 = vmatpush3.bf16.msra.mxu1 %v10862_v0  ;;  %v2078_v6 = vsub.f32 %v10999_v38, %v12388_v16 }
 0x227   :  { %9150 = vmatprep.subr.bf16.mxu1 %v10872_v8  ;;  %v11012_v29 = vpack.c.bf16 %v2065_v28, %v2058_v47  ;;  %v2072_v12 = vand.u32 4294901760, %v2071_v52  ;;  %v11030_v28 = vpack.c.bf16 %v10922_v2, %v10919_v53  ;;  %v11038_v47 = vpack.c.bf16 %v10960_v14, %v10955_v17 }
 0x228   :  { %v2079_v7 = vand.u32 4294901760, %v2078_v6  ;;  %v11042_v52 = vpack.c.bf16 %v10982_v22, %v10977_v61  ;;  %v11046_v6 = vpack.c.bf16 %v10999_v38, %v10994_v42 }
 0x22a   :  { %9152 = vmatpush3.bf16.msra.mxu1 %v10872_v8  ;;  %v11014_v56 = vpack.c.bf16 %v2079_v7, %v2072_v12  ;;  %v11034_v7 = vpack.c.bf16 %v10939_v60, %v10934_v15 }
 0x22b   :  { %9154 = vmatprep.subr.bf16.mxu1 %v10895_v30 }
 0x2bf   :  { %v7872_v12 = vpop.f32.mrb[2].mxu1 }
 0x2c0   :  { %v1813_v16 = vmul.f32 %v7872_v12, %v7872_v12  ;;  %v1212_v3 = vpop.f32.mrb[3].mxu1  ;;  %v1819_v1 = vsub.f32 %v10327_v10, %v7872_v12 }
 0x2c1   :  { %v1812_v59 = vmul.f32 %v1212_v3, %v1212_v3 }
 0x2c2   :  { %v8082_v21 = vpop.f32.mrb[2].mxu0 }
 0x2c3   :  { %v1815_v27 = vsub.f32 %v8082_v21, %v1813_v16  ;;  %v1802_v36 = vpop.f32.mrb[3].mxu0  ;;  %v1818_v21 = vsub.f32 %v10332_v13, %v1212_v3 }
 0x2c4   :  { %v1814_v9 = vsub.f32 %v1802_v36, %v1812_v59 }
 0x2c5   :  { %v1817_v49 = vmax.f32 %v1815_v27, 0.0 }
 0x2c6   :  { %v1816_v4 = vmax.f32 %v1814_v9, 0.0 }
 0x2c7   :  { %v1821_v55 = vadd.f32 1e-05, %v1817_v49  ;;  %v1835_v49 = vrot.slane %v10307_v54, %v11050_v18 }
 0x2c8   :  { %v1820_v19 = vadd.f32 1e-05, %v1816_v4 }
 0x2c9   :  { %9899 = vrsqrt.f32 %v1821_v55 }
 0x2ca   :  { %9901 = vrsqrt.f32 %v1820_v19 }
 0x2d3   :  { %v9900_v48 = vpop.eup %9899 }
 0x2d4   :  { %v9902_v16 = vpop.eup %9901  ;;  %v1825_v36 = vmul.f32 %v9900_v48, %v1819_v1 }
 0x2d5   :  { %v1824_v4 = vmul.f32 %v9902_v16, %v1818_v21 }
 0x2d6   :  { %v1831_v55 = vmul.f32 %v1829_v26, %v1825_v36 }
 0x2d7   :  { %v1830_v19 = vmul.f32 %v1829_v26, %v1824_v4 }
 0x2d8   :  { %v1837_v9 = vadd.f32 %v1835_v49, %v1831_v55 }
 0x2d9   :  { %v1836_v27 = vadd.f32 %v1835_v49, %v1830_v19 }
 0x2da   :  { %v1841_v59 = vmul.f32 0.70710677, %v1837_v9  ;;  %v1839_v58 = vmul.f32 0.5, %v1837_v9 }
 0x2db   :  { %v1840_v51 = vmul.f32 0.70710677, %v1836_v27  ;;  %v1838_v44 = vmul.f32 0.5, %v1836_v27 }
 0x2dc   :  { %9903 = verf.f32 %v1841_v59 }
 0x2dd   :  { %9905 = verf.f32 %v1840_v51 }
 0x2e6   :  { %v9904_v10 = vpop.eup %9903 }
 0x2e7   :  { %v9906_v12 = vpop.eup %9905  ;;  %v1845_v45 = vadd.f32 1.0, %v9904_v10 }
 0x2e8   :  { %v1844_v13 = vadd.f32 1.0, %v9906_v12 }
 0x2e9   :  { %v1847_v3 = vmul.f32 %v1845_v45, %v1839_v58 }
 0x2ea   :  { %v1846_v48 = vmul.f32 %v1844_v13, %v1838_v44  ;;  %v12471_v44 = vand.u32 4294901760, %v10888_v33  ;;  %v12476_v33 = vand.u32 4294901760, %v10922_v2  ;;  %v12482_v2 = vand.u32 4294901760, %v10982_v22 }
 0x2eb   :  { %v11057_v1 = vand.u32 4294901760, %v1847_v3 }
 0x2ec   :  { %v11059_v54 = vand.u32 4294901760, %v1846_v48 }
 0x2ed   :  { %v11062_v26 = vsub.f32 %v1847_v3, %v11057_v1 }
 0x2ee   :  { %v1950_v21 = vsub.f32 %v1846_v48, %v11059_v54 }
 0x2ef   :  { %v1961_v16 = vand.u32 4294901760, %v11062_v26 }
 0x2f0   :  { %v1951_v51 = vand.u32 4294901760, %v1950_v21 }
 0x2f1   :  { %v1962_v36 = vsub.f32 %v11062_v26, %v1961_v16 }
 0x2f2   :  { %v1952_v49 = vsub.f32 %v1950_v21, %v1951_v51 }
 0x2f3   :  { %v1963_v45 = vand.u32 4294901760, %v1962_v36 }
 0x2f4   :  { %v1953_v4 = vand.u32 4294901760, %v1952_v49 }
 0x2f6   :  { %8115 = vmatprep.mubr.f32.mxu1 %v1953_v4 }
 0x2f7   :  { %8116 = vmatmul.mubr.f32.vlgmr.msra.gmra.mrb[4].mxu1 %v1963_v45 }
 0x2f8   :  { %9156 = vmatpush3.bf16.msra.mxu1 %v10895_v30  ;;  %8150 = vmatprep.mubr.f32.mxu1 %v11059_v54 }
 0x2f9   :  { %9158 = vmatprep.subr.bf16.mxu1 %v10910_v35 }
 0x2fc   :  { %9160 = vmatpush3.bf16.msra.mxu1 %v10910_v35  ;;  %v12472_v35 = vand.u32 4294901760, %v10890_v34 }
 0x2fd   :  { %9162 = vmatprep.subr.bf16.mxu1 %v10926_v25 }
 0x300   :  { %9164 = vmatpush3.bf16.msra.mxu1 %v10926_v25 }
 0x301   :  { %9166 = vmatprep.subr.bf16.mxu1 %v10962_v40 }
 0x304   :  { %9168 = vmatpush3.bf16.msra.mxu1 %v10962_v40  ;;  %v9253_v40 = vpack.c.bf16 %v12472_v35, %v12471_v44  ;;  %v12492_v44 = vld [vmem:[#allocation22_spill] sm:$0xff]  ;;  %v12493_v35 = vld [vmem:[#allocation23_spill] sm:$0xff] }
 0x305   :  { %9170 = vmatprep.subr.bf16.mxu1 %v10966_v57 }
 0x308   :  { %9172 = vmatpush3.bf16.msra.mxu1 %v10966_v57  ;;  %v12469_v57 = vand.u32 4294901760, %v10874_v63  ;;  %v12473_v63 = vand.u32 4294901760, %v10903_v41  ;;  %v12479_v41 = vand.u32 4294901760, %v10955_v17 }
 0x309   :  { %9174 = vmatprep.subr.bf16.mxu1 %v10986_v50 }
 0x30c   :  { %9176 = vmatpush3.bf16.msra.mxu1 %v10986_v50  ;;  %v12475_v50 = vand.u32 4294901760, %v10919_v53  ;;  %v12481_v53 = vand.u32 4294901760, %v10977_v61  ;;  %v11204_v61 = vld [vmem:[%s12333_s7] sm:$0xff] }
 0x30d   :  { %9178 = vmatprep.subr.bf16.mxu1 %v11012_v29 }
 0x30e   :  { %v9261_v34 = vpack.c.bf16 %v12476_v33, %v12475_v50  ;;  %v12498_v50 = vld [vmem:[#allocation27_spill] sm:$0xff]  ;;  %v12499_v33 = vld [vmem:[#allocation28_spill] sm:$0xff] }
 0x310   :  { %9180 = vmatpush3.bf16.msra.mxu1 %v11012_v29  ;;  %v12478_v29 = vand.u32 4294901760, %v10939_v60  ;;  %v12484_v60 = vand.u32 4294901760, %v10999_v38 }
 0x311   :  { %9182 = vmatprep.subr.bf16.mxu1 %v11014_v56 }
 0x314   :  { %9184 = vmatpush3.bf16.msra.mxu1 %v11014_v56  ;;  %v12470_v56 = vand.u32 4294901760, %v10876_v62  ;;  %v12474_v62 = vand.u32 4294901760, %v10905_v39  ;;  %v12480_v39 = vand.u32 4294901760, %v10960_v14  ;;  %v12488_v14 = vld [vmem:[#allocation17_spill] sm:$0xff] }
 0x315   :  { %9186 = vmatprep.subr.bf16.mxu1 %v11018_v5  ;;  %v1866_v17 = vsub.s32 3, %v12488_v14 }
 0x316   :  { %v9249_v30 = vpack.c.bf16 %v12470_v56, %v12469_v57  ;;  %v9257_v25 = vpack.c.bf16 %v12474_v62, %v12473_v63  ;;  %v12489_v57 = vld [vmem:[#allocation19_spill] sm:$0xff]  ;;  %v12490_v56 = vld [vmem:[#allocation20_spill] sm:$0xff]  ;;  %v12495_v63 = vld [vmem:[#allocation25_spill] sm:$0xff] }
 0x317   :  { %8151 = vmatmul.mubr.f32.vlgmr.msra.gmra.mrb[4].mxu1 %v11057_v1  ;;  %v1867_v22 = vrot.slane %v11204_v61, %v1866_v17  ;;  %v12496_v62 = vld [vmem:[#allocation16_spill] sm:$0xff] }
 0x318   :  { %9188 = vmatpush3.bf16.msra.mxu1 %v11018_v5  ;;  %8185 = vmatprep.mubr.f32.mxu1 %v1950_v21 }
 0x319   :  { %9190 = vmatprep.subr.bf16.mxu1 %v11022_v23 }
 0x31c   :  { %9192 = vmatpush3.bf16.msra.mxu1 %v11022_v23  ;;  %v9269_v23 = vpack.c.bf16 %v12480_v39, %v12479_v41  ;;  %v12505_v41 = vld [vmem:[#allocation34_spill] sm:$0xff]  ;;  %v12506_v39 = vld [vmem:[#allocation35_spill] sm:$0xff] }
 0x31d   :  { %9194 = vmatprep.subr.bf16.mxu1 %v11026_v31 }
 0x320   :  { %9196 = vmatpush3.bf16.msra.mxu1 %v11026_v31  ;;  %v12477_v31 = vand.u32 4294901760, %v10934_v15  ;;  %v12483_v15 = vand.u32 4294901760, %v10994_v42 }
 0x321   :  { %9198 = vmatprep.subr.bf16.mxu1 %v11030_v28 }
 0x322   :  { %v9265_v5 = vpack.c.bf16 %v12478_v29, %v12477_v31  ;;  %v12501_v31 = vld [vmem:[#allocation30_spill] sm:$0xff]  ;;  %v12502_v29 = vld [vmem:[#allocation31_spill] sm:$0xff] }
 0x324   :  { %9200 = vmatpush3.bf16.msra.mxu1 %v11030_v28  ;;  %v9273_v28 = vpack.c.bf16 %v12482_v2, %v12481_v53  ;;  %v12508_v53 = vld [vmem:[#allocation37_spill] sm:$0xff]  ;;  %v12509_v2 = vld [vmem:[#allocation38_spill] sm:$0xff] }
 0x325   :  { %9202 = vmatprep.subr.bf16.mxu1 %v11034_v7 }
 0x328   :  { %9204 = vmatpush3.bf16.msra.mxu1 %v11034_v7  ;;  %v9277_v7 = vpack.c.bf16 %v12484_v60, %v12483_v15  ;;  %v12511_v15 = vld [vmem:[#allocation40_spill] sm:$0xff]  ;;  %v9988_v60 = vld [vmem:[#allocation7] sm:$0xff]  }
 0x329   :  { %9206 = vmatprep.subr.bf16.mxu1 %v11038_v47 }
 0x32c   :  { %9208 = vmatpush3.bf16.msra.mxu1 %v11038_v47 }
 0x32d   :  { %9210 = vmatprep.subr.bf16.mxu1 %v11042_v52 }
 0x330   :  { %9212 = vmatpush3.bf16.msra.mxu1 %v11042_v52 }
 0x331   :  { %9214 = vmatprep.subr.bf16.mxu1 %v11046_v6 }
 0x334   :  { %9216 = vmatpush3.bf16.msra.mxu1 %v11046_v6 }
 0x335   :  { %9218 = vmatprep.subr.bf16.mxu1 %v10757_v20 }
 0x337   :  { %8186 = vmatmul.mubr.f32.vlgmr.msra.gmra.mrb[4].mxu1 %v11062_v26 }
 0x338   :  { %9220 = vmatpush3.bf16.msra.mxu1 %v10757_v20  ;;  %8220 = vmatprep.mubr.f32.mxu1 %v1951_v51 }
 0x339   :  { %9222 = vmatprep.subr.bf16.mxu1 %v10767_v46 }
 0x33c   :  { %9224 = vmatpush3.bf16.msra.mxu1 %v10767_v46 }
 0x33d   :  { %9226 = vmatprep.subr.bf16.mxu1 %v10799_v11 }
 0x340   :  { %9228 = vmatpush3.bf16.msra.mxu1 %v10799_v11 }
 0x341   :  { %9230 = vmatprep.subr.bf16.mxu1 %v10803_v32 }
 0x344   :  { %9232 = vmatpush3.bf16.msra.mxu1 %v10803_v32 }
 0x345   :  { %9234 = vmatprep.subr.bf16.mxu1 %v10822_v43 }
 0x348   :  { %9236 = vmatpush3.bf16.msra.mxu1 %v10822_v43 }
 0x349   :  { %9238 = vmatprep.subr.bf16.mxu1 %v10842_v24 }
 0x34c   :  { %9240 = vmatpush3.bf16.msra.mxu1 %v10842_v24 }
 0x34d   :  { %9242 = vmatprep.subr.bf16.mxu1 %v10862_v0 }
 0x350   :  { %9244 = vmatpush3.bf16.msra.mxu1 %v10862_v0 }
 0x351   :  { %9246 = vmatprep.subr.bf16.mxu1 %v10872_v8 }
 0x354   :  { %9248 = vmatpush3.bf16.msra.mxu1 %v10872_v8 }
 0x355   :  { %9250 = vmatprep.subr.bf16.mxu1 %v9249_v30 }
 0x357   :  { %8221 = vmatmul.mubr.f32.vlgmr.msra.gmra.mrb[4].mxu1 %v1961_v16 }
 0x358   :  { %9252 = vmatpush3.bf16.msra.mxu1 %v9249_v30  ;;  %8255 = vmatprep.mubr.f32.mxu1 %v11059_v54  ;;  %v12491_v30 = vld [vmem:[#allocation21_spill] sm:$0xff] }
 0x359   :  { %9254 = vmatprep.subr.bf16.mxu1 %v9253_v40 }
 0x35c   :  { %9256 = vmatpush3.bf16.msra.mxu1 %v9253_v40  ;;  %v12494_v40 = vld [vmem:[#allocation24_spill] sm:$0xff] }
 0x35d   :  { %9258 = vmatprep.subr.bf16.mxu1 %v9257_v25 }
 0x360   :  { %9260 = vmatpush3.bf16.msra.mxu1 %v9257_v25  ;;  %v12497_v25 = vld [vmem:[#allocation26_spill] sm:$0xff] }
 0x361   :  { %9262 = vmatprep.subr.bf16.mxu1 %v9261_v34 }
 0x364   :  { %9264 = vmatpush3.bf16.msra.mxu1 %v9261_v34  ;;  %v12500_v34 = vld [vmem:[#allocation29_spill] sm:$0xff] }
 0x365   :  { %9266 = vmatprep.subr.bf16.mxu1 %v9265_v5 }
 0x368   :  { %9268 = vmatpush3.bf16.msra.mxu1 %v9265_v5  ;;  %v12503_v5 = vld [vmem:[#allocation32_spill] sm:$0xff] }
 0x369   :  { %9270 = vmatprep.subr.bf16.mxu1 %v9269_v23 }
 0x36c   :  { %9272 = vmatpush3.bf16.msra.mxu1 %v9269_v23  ;;  %v12507_v23 = vld [vmem:[#allocation36_spill] sm:$0xff] }
 0x36d   :  { %9274 = vmatprep.subr.bf16.mxu1 %v9273_v28 }
 0x370   :  { %9276 = vmatpush3.bf16.msra.mxu1 %v9273_v28  ;;  %v12510_v28 = vld [vmem:[#allocation39_spill] sm:$0xff] }
 0x371   :  { %9278 = vmatprep.subr.bf16.mxu1 %v9277_v7 }
 0x374   :  { %9280 = vmatpush3.bf16.msra.mxu1 %v9277_v7  ;;  %v9989_v7 = vld [vmem:[#allocation7 + $0x8] sm:$0xff]  }
 0x375   :  { %9282 = vmatprep.subr.bf16.mxu1 %v10757_v20 }
 0x377   :  { %8256 = vmatmul.mubr.f32.vlgmr.msra.gmra.mrb[4].mxu1 %v11057_v1 }
 0x378   :  { %9284 = vmatpush3.bf16.msra.mxu1 %v10757_v20  ;;  %8290 = vmatprep.mubr.f32.mxu1 %v11059_v54  ;;  %v12485_v20 = vld [vmem:[#allocation41_spill] sm:$0xff] }
 0x379   :  { %9286 = vmatprep.subr.bf16.mxu1 %v10767_v46 }
 0x37c   :  { %9288 = vmatpush3.bf16.msra.mxu1 %v10767_v46  ;;  %v12486_v46 = vld [vmem:[#allocation42_spill] sm:$0xff] }
 0x37d   :  { %9290 = vmatprep.subr.bf16.mxu1 %v10799_v11 }
 0x380   :  { %9292 = vmatpush3.bf16.msra.mxu1 %v10799_v11  ;;  %v11179_v11 = vld [vmem:[#allocation7 + $0x18] sm:$0xff]  }
 0x381   :  { %9294 = vmatprep.subr.bf16.mxu1 %v10803_v32 }
 0x384   :  { %9296 = vmatpush3.bf16.msra.mxu1 %v10803_v32  ;;  %v11187_v32 = vld [vmem:[#allocation7 + $0x28] sm:$0xff]  }
 0x385   :  { %9298 = vmatprep.subr.bf16.mxu1 %v10822_v43 }
 0x388   :  { %9300 = vmatpush3.bf16.msra.mxu1 %v10822_v43  ;;  %v11191_v43 = vld [vmem:[#allocation7 + $0x30] sm:$0xff]  }
 0x389   :  { %9302 = vmatprep.subr.bf16.mxu1 %v10842_v24 }
 0x38c   :  { %9304 = vmatpush3.bf16.msra.mxu1 %v10842_v24  ;;  %v12487_v24 = vld [vmem:[#allocation15_spill] sm:$0xff] }
 0x38d   :  { %9306 = vmatprep.subr.bf16.mxu1 %v10862_v0 }
 0x390   :  { %9308 = vmatpush3.bf16.msra.mxu1 %v10862_v0  ;;  %v11195_v0 = vld [vmem:[#allocation7 + $0x38] sm:$0xff]  }
 0x391   :  { %9310 = vmatprep.subr.bf16.mxu1 %v10872_v8 }
 0x394   :  { %9312 = vmatpush3.bf16.msra.mxu1 %v10872_v8  ;;  %v11183_v8 = vld [vmem:[#allocation7 + $0x20] sm:$0xff]  }
 0x395   :  { %9506 = vmatprep.subr.bf16.mxu1 %v10689_v37 }
 0x397   :  { %8291 = vmatmul.mubr.f32.vlgmr.msra.gmra.mrb[4].mxu1 %v11057_v1 }
 0x398   :  { %9508 = vmatpush3.bf16.msra.mxu1 %v10689_v37 }
 0x399   :  { %9510 = vmatprep.subr.bf16.mxu1 %v12485_v20 }
 0x39c   :  { %9512 = vmatpush3.bf16.msra.mxu1 %v12485_v20 }
 0x39d   :  { %9514 = vmatprep.subr.bf16.mxu1 %v12486_v46 }
 0x3a0   :  { %9516 = vmatpush3.bf16.msra.mxu1 %v12486_v46 }
 0x3a1   :  { %9518 = vmatprep.subr.bf16.mxu1 %v11179_v11 }
 0x3a4   :  { %9520 = vmatpush3.bf16.msra.mxu1 %v11179_v11 }
 0x3a5   :  { %9522 = vmatprep.subr.bf16.mxu1 %v11183_v8 }
 0x3a8   :  { %9524 = vmatpush3.bf16.msra.mxu1 %v11183_v8 }
 0x3a9   :  { %9526 = vmatprep.subr.bf16.mxu1 %v11187_v32 }
 0x3ac   :  { %9528 = vmatpush3.bf16.msra.mxu1 %v11187_v32 }
 0x3ad   :  { %9530 = vmatprep.subr.bf16.mxu1 %v11191_v43 }
 0x3b0   :  { %9532 = vmatpush3.bf16.msra.mxu1 %v11191_v43 }
 0x3b1   :  { %9534 = vmatprep.subr.bf16.mxu1 %v11195_v0 }
 0x3b4   :  { %9536 = vmatpush3.bf16.msra.mxu1 %v11195_v0 }
 0x3b5   :  { %9538 = vmatprep.subr.bf16.mxu1 %v12487_v24 }
 0x46a   :  { %v8292_v42 = vpop.f32.mrb[4].mxu1 }
 0x46b   :  { %v11207_v38 = vadd.f32 %v8292_v42, %v1867_v22  ;;  %v2542_v47 = vpop.f32.mrb[5].mxu1  ;;  %v3790_v42 = vld [vmem:[%s12330_s4 + $0xc0] sm:$0xff] }
 0x46c   :  { %v11209_v52 = vadd.f32 %v2542_v47, %v1867_v22  ;;  %v3782_v22 = vld [vmem:[%s12330_s4 + $0x80] sm:$0xff] }
 0x46d   :  { %v11212_v6 = vand.u32 4294901760, %v11207_v38  ;;  %v3141_v55 = vmul.f32 %v11207_v38, %v11207_v38  ;;  %v6603_v47 = vcombine.high %v3782_v22, %v3790_v42 }
 0x46e   :  { %v11217_v19 = vand.u32 4294901760, %v11209_v52  ;;  %v3140_v9 = vmul.f32 %v11209_v52, %v11209_v52 }
 0x46f   :  { %v11223_v27 = vsub.f32 %v11207_v38, %v11212_v6  ;;  %v11225_v59 = vand.u32 4294901760, %v3141_v55 }
 0x470   :  { %v11229_v10 = vsub.f32 %v11209_v52, %v11217_v19  ;;  %v11231_v12 = vand.u32 4294901760, %v3140_v9 }
 0x471   :  { %v11234_v58 = vsub.f32 %v3141_v55, %v11225_v59  ;;  %v2629_v13 = vand.u32 4294901760, %v11223_v27  ;;  %v3796_v55 = vld [vmem:[%s12330_s4 + $0xf0] sm:$0xff] }
 0x472   :  { %v2619_v3 = vand.u32 4294901760, %v11229_v10  ;;  %v11239_v48 = vsub.f32 %v3140_v9, %v11231_v12 }
 0x473   :  { %v2630_v1 = vsub.f32 %v11223_v27, %v2629_v13  ;;  %v3219_v54 = vand.u32 4294901760, %v11234_v58 }
 0x474   :  { %v2620_v26 = vsub.f32 %v11229_v10, %v2619_v3  ;;  %v3209_v21 = vand.u32 4294901760, %v11239_v48 }
 0x475   :  { %v3220_v36 = vsub.f32 %v11234_v58, %v3219_v54  ;;  %v2631_v49 = vand.u32 4294901760, %v2630_v1 }
 0x476   :  { %v2621_v16 = vand.u32 4294901760, %v2620_v26  ;;  %v3210_v51 = vsub.f32 %v11239_v48, %v3209_v21  ;;  %v3822_v26 = vld [vmem:[%s12330_s4 + $0x1c0] sm:$0xff] }
 0x477   :  { %v3221_v45 = vand.u32 4294901760, %v3220_v36 }
 0x478   :  { %8325 = vmatprep.mubr.f32.mxu0 %v2621_v16  ;;  %v3211_v4 = vand.u32 4294901760, %v3210_v51  ;;  %v3820_v16 = vld [vmem:[%s12330_s4 + $0x1b0] sm:$0xff] }
 0x479   :  { %8326 = vmatmul.mubr.f32.vlgmr.msra.gmra.mrb[4].mxu0 %v2631_v49  ;;  %v3828_v51 = vld [vmem:[%s12330_s4 + $0x1f0] sm:$0xff] }
 0x47a   :  { %9348 = vmatpush3.bf16.msra.mxu0 %v12487_v24  ;;  %8360 = vmatprep.mubr.f32.mxu0 %v11217_v19  ;;  %v6647_v49 = vcombine.high %v3820_v16, %v3828_v51 }
 0x47b   :  { %8535 = vmatprep.mubr.f32.mxu1 %v3211_v4  ;;  %9350 = vmatprep.subr.bf16.mxu0 %v12489_v57  ;;  %v6646_v4 = vcombine.low %v3820_v16, %v3828_v51 }
 0x47c   :  { %8536 = vmatmul.mubr.f32.vlgmr.msra.gmra.mrb[6].mxu1 %v3221_v45  ;;  %v3830_v45 = vld [vmem:[%s12330_s4 + $0x200] sm:$0xff] }
 0x47d   :  { %9540 = vmatpush3.bf16.msra.mxu1 %v12487_v24  ;;  %8570 = vmatprep.mubr.f32.mxu1 %v11231_v12 }
 0x47e   :  { %9352 = vmatpush3.bf16.msra.mxu0 %v12489_v57  ;;  %9542 = vmatprep.subr.bf16.mxu1 %v12489_v57 }
 0x47f   :  { %9354 = vmatprep.subr.bf16.mxu0 %v12490_v56 }
 0x481   :  { %9544 = vmatpush3.bf16.msra.mxu1 %v12489_v57  ;;  %v3838_v57 = vld [vmem:[%s12330_s4 + $0x240] sm:$0xff] }
 0x482   :  { %9356 = vmatpush3.bf16.msra.mxu0 %v12490_v56  ;;  %9546 = vmatprep.subr.bf16.mxu1 %v12490_v56 }
 0x483   :  { %9358 = vmatprep.subr.bf16.mxu0 %v12491_v30 }
 0x485   :  { %9548 = vmatpush3.bf16.msra.mxu1 %v12490_v56  ;;  %v6651_v56 = vcombine.high %v3830_v45, %v3838_v57 }
 0x486   :  { %9360 = vmatpush3.bf16.msra.mxu0 %v12491_v30  ;;  %9550 = vmatprep.subr.bf16.mxu1 %v12491_v30 }
 0x487   :  { %9362 = vmatprep.subr.bf16.mxu0 %v12492_v44 }
 0x489   :  { %9552 = vmatpush3.bf16.msra.mxu1 %v12491_v30  ;;  %v3836_v30 = vld [vmem:[%s12330_s4 + $0x230] sm:$0xff] }
 0x48a   :  { %9364 = vmatpush3.bf16.msra.mxu0 %v12492_v44  ;;  %9554 = vmatprep.subr.bf16.mxu1 %v12492_v44 }
 0x48b   :  { %9366 = vmatprep.subr.bf16.mxu0 %v12493_v35 }
 0x48d   :  { %9556 = vmatpush3.bf16.msra.mxu1 %v12492_v44  ;;  %v3844_v44 = vld [vmem:[%s12330_s4 + $0x270] sm:$0xff] }
 0x48e   :  { %9368 = vmatpush3.bf16.msra.mxu0 %v12493_v35  ;;  %9558 = vmatprep.subr.bf16.mxu1 %v12493_v35 }
 0x48f   :  { %9370 = vmatprep.subr.bf16.mxu0 %v12494_v40 }
 0x491   :  { %9560 = vmatpush3.bf16.msra.mxu1 %v12493_v35  ;;  %v6650_v35 = vcombine.low %v3830_v45, %v3838_v57 }
 0x492   :  { %9372 = vmatpush3.bf16.msra.mxu0 %v12494_v40  ;;  %9562 = vmatprep.subr.bf16.mxu1 %v12494_v40 }
 0x493   :  { %9374 = vmatprep.subr.bf16.mxu0 %v12495_v63 }
 0x495   :  { %9564 = vmatpush3.bf16.msra.mxu1 %v12494_v40  ;;  %v6663_v40 = vcombine.high %v3836_v30, %v3844_v44 }
 0x496   :  { %9376 = vmatpush3.bf16.msra.mxu0 %v12495_v63  ;;  %9566 = vmatprep.subr.bf16.mxu1 %v12495_v63 }
 0x497   :  { %9378 = vmatprep.subr.bf16.mxu0 %v12496_v62 }
 0x499   :  { %9568 = vmatpush3.bf16.msra.mxu1 %v12495_v63  ;;  %8361 = vmatmul.mubr.f32.vlgmr.msra.gmra.mrb[4].mxu0 %v11212_v6  ;;  %v6662_v63 = vcombine.low %v3836_v30, %v3844_v44 }
 0x49a   :  { %9380 = vmatpush3.bf16.msra.mxu0 %v12496_v62  ;;  %8395 = vmatprep.mubr.f32.mxu0 %v11229_v10  ;;  %v3806_v10 = vld [vmem:[%s12330_s4 + $0x140] sm:$0xff] }
 0x49b   :  { %9570 = vmatprep.subr.bf16.mxu1 %v12496_v62  ;;  %9382 = vmatprep.subr.bf16.mxu0 %v12497_v25 }
 0x49c   :  { %8571 = vmatmul.mubr.f32.vlgmr.msra.gmra.mrb[6].mxu1 %v11225_v59 }
 0x49d   :  { %9572 = vmatpush3.bf16.msra.mxu1 %v12496_v62  ;;  %8605 = vmatprep.mubr.f32.mxu1 %v11239_v48  ;;  %v3846_v62 = vld [vmem:[%s12330_s4 + $0x280] sm:$0xff] }
 0x49e   :  { %9384 = vmatpush3.bf16.msra.mxu0 %v12497_v25  ;;  %9574 = vmatprep.subr.bf16.mxu1 %v12497_v25 }
 0x49f   :  { %9386 = vmatprep.subr.bf16.mxu0 %v12498_v50 }
 0x4a1   :  { %9576 = vmatpush3.bf16.msra.mxu1 %v12497_v25  ;;  %v3854_v25 = vld [vmem:[%s12330_s4 + $0x2c0] sm:$0xff] }
 0x4a2   :  { %9388 = vmatpush3.bf16.msra.mxu0 %v12498_v50  ;;  %9578 = vmatprep.subr.bf16.mxu1 %v12498_v50 }
 0x4a3   :  { %9390 = vmatprep.subr.bf16.mxu0 %v12499_v33 }
 0x4a5   :  { %9580 = vmatpush3.bf16.msra.mxu1 %v12498_v50  ;;  %v6667_v50 = vcombine.high %v3846_v62, %v3854_v25 }
 0x4a6   :  { %9392 = vmatpush3.bf16.msra.mxu0 %v12499_v33  ;;  %9582 = vmatprep.subr.bf16.mxu1 %v12499_v33 }
 0x4a7   :  { %9394 = vmatprep.subr.bf16.mxu0 %v12500_v34 }
 0x4a9   :  { %9584 = vmatpush3.bf16.msra.mxu1 %v12499_v33  ;;  %v3852_v33 = vld [vmem:[%s12330_s4 + $0x2b0] sm:$0xff] }
 0x4aa   :  { %9396 = vmatpush3.bf16.msra.mxu0 %v12500_v34  ;;  %9586 = vmatprep.subr.bf16.mxu1 %v12500_v34 }
 0x4ab   :  { %9398 = vmatprep.subr.bf16.mxu0 %v12501_v31 }
 0x4ad   :  { %9588 = vmatpush3.bf16.msra.mxu1 %v12500_v34  ;;  %v3860_v34 = vld [vmem:[%s12330_s4 + $0x2f0] sm:$0xff] }
 0x4ae   :  { %9400 = vmatpush3.bf16.msra.mxu0 %v12501_v31  ;;  %9590 = vmatprep.subr.bf16.mxu1 %v12501_v31 }
 0x4af   :  { %9402 = vmatprep.subr.bf16.mxu0 %v12502_v29 }
 0x4b1   :  { %9592 = vmatpush3.bf16.msra.mxu1 %v12501_v31  ;;  %v6666_v31 = vcombine.low %v3846_v62, %v3854_v25 }
 0x4b2   :  { %9404 = vmatpush3.bf16.msra.mxu0 %v12502_v29  ;;  %9594 = vmatprep.subr.bf16.mxu1 %v12502_v29 }
 0x4b3   :  { %9406 = vmatprep.subr.bf16.mxu0 %v12503_v5 }
 0x4b5   :  { %9596 = vmatpush3.bf16.msra.mxu1 %v12502_v29  ;;  %v6679_v29 = vcombine.high %v3852_v33, %v3860_v34 }
 0x4b6   :  { %9408 = vmatpush3.bf16.msra.mxu0 %v12503_v5  ;;  %9598 = vmatprep.subr.bf16.mxu1 %v12503_v5 }
 0x4b7   :  { %9410 = vmatprep.subr.bf16.mxu0 %v10689_v37 }
 0x4b9   :  { %9600 = vmatpush3.bf16.msra.mxu1 %v12503_v5  ;;  %8396 = vmatmul.mubr.f32.vlgmr.msra.gmra.mrb[4].mxu0 %v11223_v27  ;;  %v6678_v5 = vcombine.low %v3852_v33, %v3860_v34  ;;  %v3791_v33 = vld [vmem:[%s12330_s4 + $0xc8] sm:$0xff] }
 0x4ba   :  { %9412 = vmatpush3.bf16.msra.mxu0 %v10689_v37  ;;  %8430 = vmatprep.mubr.f32.mxu0 %v2619_v3 }
 0x4bb   :  { %9602 = vmatprep.subr.bf16.mxu1 %v10689_v37  ;;  %9414 = vmatprep.subr.bf16.mxu0 %v12485_v20 }
 0x4bc   :  { %8606 = vmatmul.mubr.f32.vlgmr.msra.gmra.mrb[6].mxu1 %v11234_v58  ;;  %v3804_v58 = vld [vmem:[%s12330_s4 + $0x130] sm:$0xff] }
 0x4bd   :  { %9604 = vmatpush3.bf16.msra.mxu1 %v10689_v37  ;;  %8640 = vmatprep.mubr.f32.mxu1 %v3209_v21  ;;  %v12504_v37 = vld [vmem:[#allocation33_spill] sm:$0xff] }
 0x4be   :  { %9416 = vmatpush3.bf16.msra.mxu0 %v12485_v20  ;;  %9606 = vmatprep.subr.bf16.mxu1 %v12485_v20 }
 0x4bf   :  { %9418 = vmatprep.subr.bf16.mxu0 %v12486_v46 }
 0x4c1   :  { %9608 = vmatpush3.bf16.msra.mxu1 %v12485_v20  ;;  %v9990_v20 = vld [vmem:[#allocation7 + $0x10] sm:$0xff]  }
 0x4c2   :  { %9420 = vmatpush3.bf16.msra.mxu0 %v12486_v46  ;;  %9610 = vmatprep.subr.bf16.mxu1 %v12486_v46 }
 0x4c3   :  { %9422 = vmatprep.subr.bf16.mxu0 %v11179_v11 }
 0x4c5   :  { %9612 = vmatpush3.bf16.msra.mxu1 %v12486_v46  ;;  %v3766_v46 = vld [vmem:[%s12330_s4] sm:$0xff] }
 0x4c6   :  { %9424 = vmatpush3.bf16.msra.mxu0 %v11179_v11  ;;  %9614 = vmatprep.subr.bf16.mxu1 %v11179_v11 }
 0x4c7   :  { %9426 = vmatprep.subr.bf16.mxu0 %v11183_v8 }
 0x4c9   :  { %9616 = vmatpush3.bf16.msra.mxu1 %v11179_v11 }
 0x4ca   :  { %9428 = vmatpush3.bf16.msra.mxu0 %v11183_v8  ;;  %9618 = vmatprep.subr.bf16.mxu1 %v11183_v8 }
 0x4cb   :  { %9430 = vmatprep.subr.bf16.mxu0 %v11187_v32 }
 0x4cd   :  { %9620 = vmatpush3.bf16.msra.mxu1 %v11183_v8 }
 0x4ce   :  { %9432 = vmatpush3.bf16.msra.mxu0 %v11187_v32  ;;  %9622 = vmatprep.subr.bf16.mxu1 %v11187_v32 }
 0x4cf   :  { %9434 = vmatprep.subr.bf16.mxu0 %v11191_v43 }
 0x4d1   :  { %9624 = vmatpush3.bf16.msra.mxu1 %v11187_v32 }
 0x4d2   :  { %9436 = vmatpush3.bf16.msra.mxu0 %v11191_v43  ;;  %9626 = vmatprep.subr.bf16.mxu1 %v11191_v43 }
 0x4d3   :  { %9438 = vmatprep.subr.bf16.mxu0 %v11195_v0 }
 0x4d5   :  { %9628 = vmatpush3.bf16.msra.mxu1 %v11191_v43 }
 0x4d6   :  { %9440 = vmatpush3.bf16.msra.mxu0 %v11195_v0  ;;  %9630 = vmatprep.subr.bf16.mxu1 %v11195_v0 }
 0x4d7   :  { %9442 = vmatprep.subr.bf16.mxu0 %v12504_v37 }
 0x4d9   :  { %9632 = vmatpush3.bf16.msra.mxu1 %v11195_v0  ;;  %8431 = vmatmul.mubr.f32.vlgmr.msra.gmra.mrb[4].mxu0 %v2629_v13  ;;  %v3812_v13 = vld [vmem:[%s12330_s4 + $0x170] sm:$0xff] }
 0x4da   :  { %9444 = vmatpush3.bf16.msra.mxu0 %v12504_v37  ;;  %8465 = vmatprep.mubr.f32.mxu0 %v11217_v19  ;;  %v6631_v48 = vcombine.high %v3804_v58, %v3812_v13  ;;  %v6630_v1 = vcombine.low %v3804_v58, %v3812_v13 }
 0x4db   :  { %9634 = vmatprep.subr.bf16.mxu1 %v12504_v37  ;;  %9446 = vmatprep.subr.bf16.mxu0 %v12505_v41 }
 0x4dc   :  { %8641 = vmatmul.mubr.f32.vlgmr.msra.gmra.mrb[6].mxu1 %v3219_v54  ;;  %v3814_v54 = vld [vmem:[%s12330_s4 + $0x180] sm:$0xff] }
 0x4dd   :  { %9636 = vmatpush3.bf16.msra.mxu1 %v12504_v37  ;;  %8675 = vmatprep.mubr.f32.mxu1 %v11231_v12  ;;  %v6635_v21 = vcombine.high %v3814_v54, %v3822_v26  ;;  %v6634_v36 = vcombine.low %v3814_v54, %v3822_v26  ;;  %v3862_v37 = vld [vmem:[%s12330_s4 + $0x300] sm:$0xff] }
 0x4de   :  { %9448 = vmatpush3.bf16.msra.mxu0 %v12505_v41  ;;  %9638 = vmatprep.subr.bf16.mxu1 %v12505_v41 }
 0x4df   :  { %9450 = vmatprep.subr.bf16.mxu0 %v12506_v39 }
 0x4e1   :  { %9640 = vmatpush3.bf16.msra.mxu1 %v12505_v41  ;;  %v3870_v41 = vld [vmem:[%s12330_s4 + $0x340] sm:$0xff] }
 0x4e2   :  { %9452 = vmatpush3.bf16.msra.mxu0 %v12506_v39  ;;  %9642 = vmatprep.subr.bf16.mxu1 %v12506_v39 }
 0x4e3   :  { %9454 = vmatprep.subr.bf16.mxu0 %v12507_v23 }
 0x4e5   :  { %9644 = vmatpush3.bf16.msra.mxu1 %v12506_v39  ;;  %v6683_v39 = vcombine.high %v3862_v37, %v3870_v41 }
 0x4e6   :  { %9456 = vmatpush3.bf16.msra.mxu0 %v12507_v23  ;;  %9646 = vmatprep.subr.bf16.mxu1 %v12507_v23 }
 0x4e7   :  { %9458 = vmatprep.subr.bf16.mxu0 %v12508_v53 }
 0x4e9   :  { %9648 = vmatpush3.bf16.msra.mxu1 %v12507_v23  ;;  %v3868_v23 = vld [vmem:[%s12330_s4 + $0x330] sm:$0xff] }
 0x4ea   :  { %9460 = vmatpush3.bf16.msra.mxu0 %v12508_v53  ;;  %9650 = vmatprep.subr.bf16.mxu1 %v12508_v53 }
 0x4eb   :  { %9462 = vmatprep.subr.bf16.mxu0 %v12509_v2 }
 0x4ed   :  { %9652 = vmatpush3.bf16.msra.mxu1 %v12508_v53  ;;  %v3876_v53 = vld [vmem:[%s12330_s4 + $0x370] sm:$0xff] }
 0x4ee   :  { %9464 = vmatpush3.bf16.msra.mxu0 %v12509_v2  ;;  %9654 = vmatprep.subr.bf16.mxu1 %v12509_v2 }
 0x4ef   :  { %9466 = vmatprep.subr.bf16.mxu0 %v12510_v28 }
 0x4f1   :  { %9656 = vmatpush3.bf16.msra.mxu1 %v12509_v2  ;;  %v6682_v2 = vcombine.low %v3862_v37, %v3870_v41  ;;  %v3807_v37 = vld [vmem:[%s12330_s4 + $0x148] sm:$0xff] }
 0x4f2   :  { %9468 = vmatpush3.bf16.msra.mxu0 %v12510_v28  ;;  %9658 = vmatprep.subr.bf16.mxu1 %v12510_v28 }
 0x4f3   :  { %9470 = vmatprep.subr.bf16.mxu0 %v12511_v15 }
 0x4f5   :  { %9660 = vmatpush3.bf16.msra.mxu1 %v12510_v28  ;;  %v6695_v28 = vcombine.high %v3868_v23, %v3876_v53 }
 0x4f6   :  { %9472 = vmatpush3.bf16.msra.mxu0 %v12511_v15  ;;  %9662 = vmatprep.subr.bf16.mxu1 %v12511_v15 }
 0x4f7   :  { %9474 = vmatprep.subr.bf16.mxu0 %v9988_v60 }
 0x4f9   :  { %9664 = vmatpush3.bf16.msra.mxu1 %v12511_v15  ;;  %8466 = vmatmul.mubr.f32.vlgmr.msra.gmra.mrb[4].mxu0 %v11212_v6  ;;  %v6694_v15 = vcombine.low %v3868_v23, %v3876_v53  ;;  %v3815_v23 = vld [vmem:[%s12330_s4 + $0x188] sm:$0xff] }
 0x4fa   :  { %9476 = vmatpush3.bf16.msra.mxu0 %v9988_v60  ;;  %8500 = vmatprep.mubr.f32.mxu0 %v11217_v19  ;;  %v6602_v19 = vcombine.low %v3782_v22, %v3790_v42  ;;  %v10118_v42 = vmov 0   ;;  %v3823_v53 = vld [vmem:[%s12330_s4 + $0x1c8] sm:$0xff] }
 0x4fb   :  { %9666 = vmatprep.subr.bf16.mxu1 %v9988_v60  ;;  %9478 = vmatprep.subr.bf16.mxu0 %v9989_v7 }
 0x4fc   :  { %8676 = vmatmul.mubr.f32.vlgmr.msra.gmra.mrb[6].mxu1 %v11225_v59 }
 0x4fd   :  { %9668 = vmatpush3.bf16.msra.mxu1 %v9988_v60  ;;  %8710 = vmatprep.mubr.f32.mxu1 %v11231_v12  ;;  %v3878_v60 = vld [vmem:[%s12330_s4 + $0x380] sm:$0xff] }
 0x4fe   :  { %9480 = vmatpush3.bf16.msra.mxu0 %v9989_v7  ;;  %9670 = vmatprep.subr.bf16.mxu1 %v9989_v7 }
 0x4ff   :  { %9482 = vmatprep.subr.bf16.mxu0 %v9990_v20 }
 0x501   :  { %9672 = vmatpush3.bf16.msra.mxu1 %v9989_v7  ;;  %v3886_v7 = vld [vmem:[%s12330_s4 + $0x3c0] sm:$0xff] }
 0x502   :  { %9484 = vmatpush3.bf16.msra.mxu0 %v9990_v20  ;;  %9674 = vmatprep.subr.bf16.mxu1 %v9990_v20 }
 0x503   :  { %9486 = vmatprep.subr.bf16.mxu0 %v11179_v11 }
 0x505   :  { %9676 = vmatpush3.bf16.msra.mxu1 %v9990_v20  ;;  %v6699_v20 = vcombine.high %v3878_v60, %v3886_v7 }
 0x506   :  { %9488 = vmatpush3.bf16.msra.mxu0 %v11179_v11  ;;  %9678 = vmatprep.subr.bf16.mxu1 %v11179_v11 }
 0x507   :  { %9490 = vmatprep.subr.bf16.mxu0 %v11183_v8 }
 0x509   :  { %9680 = vmatpush3.bf16.msra.mxu1 %v11179_v11  ;;  %v3774_v11 = vld [vmem:[%s12330_s4 + $0x40] sm:$0xff] }
 0x50a   :  { %9492 = vmatpush3.bf16.msra.mxu0 %v11183_v8  ;;  %9682 = vmatprep.subr.bf16.mxu1 %v11183_v8 }
 0x50b   :  { %9494 = vmatprep.subr.bf16.mxu0 %v11187_v32 }
 0x50d   :  { %9684 = vmatpush3.bf16.msra.mxu1 %v11183_v8  ;;  %v6587_v8 = vcombine.high %v3766_v46, %v3774_v11 }
 0x50e   :  { %9496 = vmatpush3.bf16.msra.mxu0 %v11187_v32  ;;  %9686 = vmatprep.subr.bf16.mxu1 %v11187_v32 }
 0x50f   :  { %9498 = vmatprep.subr.bf16.mxu0 %v11191_v43 }
 0x511   :  { %9688 = vmatpush3.bf16.msra.mxu1 %v11187_v32  ;;  %v3772_v32 = vld [vmem:[%s12330_s4 + $0x30] sm:$0xff] }
 0x512   :  { %9500 = vmatpush3.bf16.msra.mxu0 %v11191_v43  ;;  %9690 = vmatprep.subr.bf16.mxu1 %v11191_v43 }
 0x513   :  { %9502 = vmatprep.subr.bf16.mxu0 %v11195_v0 }
 0x515   :  { %9692 = vmatpush3.bf16.msra.mxu1 %v11191_v43  ;;  %v3780_v43 = vld [vmem:[%s12330_s4 + $0x70] sm:$0xff] }
 0x516   :  { %9504 = vmatpush3.bf16.msra.mxu0 %v11195_v0  ;;  %9694 = vmatprep.subr.bf16.mxu1 %v11195_v0  ;;  %v6599_v24 = vcombine.high %v3772_v32, %v3780_v43  ;;  %v6598_v17 = vcombine.low %v3772_v32, %v3780_v43 }
 0x517   :  { %4689 = vmatprep.subr.bf16.mxu0 %v6587_v8  ;;  %v6698_v8 = vcombine.low %v3878_v60, %v3886_v7  ;;  %v3839_v60 = vld [vmem:[%s12330_s4 + $0x248] sm:$0xff]  ;;  %v6636_v7 = vcombine.low %v3815_v23, %v3823_v53 }
 0x519   :  { %9696 = vmatpush3.bf16.msra.mxu1 %v11195_v0  ;;  %8501 = vmatmul.mubr.f32.vlgmr.msra.gmra.mrb[4].mxu0 %v11212_v6  ;;  %v6586_v0 = vcombine.low %v3766_v46, %v3774_v11  ;;  %v3788_v6 = vld [vmem:[%s12330_s4 + $0xb0] sm:$0xff] }
 0x51a   :  { %4947 = vmatprep.subr.bf16.mxu1 %v6599_v24  ;;  %v6615_v9 = vcombine.high %v3788_v6, %v3796_v55  ;;  %v6614_v27 = vcombine.low %v3788_v6, %v3796_v55  ;;  %v3884_v46 = vld [vmem:[%s12330_s4 + $0x3b0] sm:$0xff]  ;;  %v3775_v24 = vld [vmem:[%s12330_s4 + $0x48] sm:$0xff]  ;;  %4721 = vmatprep.mubr.bf16.mxu0 %v10118_v42 }
 0x51b   :  { %4690 = vmatpush1.bf16.msra.mxu0 %v6586_v0  ;;  %v3892_v11 = vld [vmem:[%s12330_s4 + $0x3f0] sm:$0xff]  ;;  %v3767_v0 = vld [vmem:[%s12330_s4 + $0x8] sm:$0xff] }
 0x51c   :  { %8711 = vmatmul.mubr.f32.vlgmr.msra.gmra.mrb[6].mxu1 %v11225_v59  ;;  %4691 = vmatprep.subr.bf16.mxu0 %v6603_v47  ;;  %v3798_v59 = vld [vmem:[%s12330_s4 + $0x100] sm:$0xff]  ;;  %v6711_v32 = vcombine.high %v3884_v46, %v3892_v11  ;;  %v6710_v43 = vcombine.low %v3884_v46, %v3892_v11  ;;  %v6588_v22 = vcombine.low %v3767_v0, %v3775_v24  ;;  %v3847_v46 = vld [vmem:[%s12330_s4 + $0x288] sm:$0xff] }
 0x51d   :  { %4948 = vmatpush1.bf16.msra.mxu1 %v6598_v17  ;;  %v6619_v12 = vcombine.high %v3798_v59, %v3806_v10  ;;  %v6618_v3 = vcombine.low %v3798_v59, %v3806_v10  ;;  %v6589_v17 = vcombine.high %v3767_v0, %v3775_v24  ;;  %4979 = vmatprep.mubr.bf16.mxu1 %v10118_v42  ;;  %v3855_v11 = vld [vmem:[%s12330_s4 + $0x2c8] sm:$0xff] }
 0x51e   :  { %4949 = vmatprep.subr.bf16.mxu1 %v6615_v9  ;;  %v3871_v0 = vld [vmem:[%s12330_s4 + $0x348] sm:$0xff]  ;;  %v6668_v24 = vcombine.low %v3847_v46, %v3855_v11 }
 0x51f   :  { %4692 = vmatpush1.bf16.msra.mxu0 %v6602_v19 }
 0x520   :  { %4693 = vmatprep.subr.bf16.mxu0 %v6619_v12 }
 0x521   :  { %4950 = vmatpush1.bf16.msra.mxu1 %v6614_v27 }
 0x522   :  { %4951 = vmatprep.subr.bf16.mxu1 %v6631_v48  ;;  %v11530_v48 = vsub.s32 4, %v12488_v14 }
 0x523   :  { %4694 = vmatpush1.bf16.msra.mxu0 %v6618_v3 }
 0x524   :  { %4695 = vmatprep.subr.bf16.mxu0 %v6635_v21  ;;  %v3747_v26 = vrot.slane %v11204_v61, %v11530_v48 }
 0x525   :  { %4952 = vmatpush1.bf16.msra.mxu1 %v6630_v1  ;;  %v3752_v1 = vsub.s32 5, %v12488_v14 }
 0x526   :  { %4953 = vmatprep.subr.bf16.mxu1 %v6647_v49 }
 0x527   :  { %4696 = vmatpush1.bf16.msra.mxu0 %v6634_v36  ;;  %v3753_v49 = vrot.slane %v11204_v61, %v3752_v1  ;;  %v3783_v61 = vld [vmem:[%s12330_s4 + $0x88] sm:$0xff]  ;;  %v3808_v1 = vld [vmem:[%s12330_s4 + $0x150] sm:$0xff] }
 0x528   :  { %4697 = vmatprep.subr.bf16.mxu0 %v6651_v56  ;;  %v6604_v41 = vcombine.low %v3783_v61, %v3791_v33 }
 0x529   :  { %4954 = vmatpush1.bf16.msra.mxu1 %v6646_v4 }
 0x52a   :  { %4955 = vmatprep.subr.bf16.mxu1 %v6663_v40 }
 0x52b   :  { %4698 = vmatpush1.bf16.msra.mxu0 %v6650_v35 }
 0x52c   :  { %4699 = vmatprep.subr.bf16.mxu0 %v6667_v50 }
 0x52d   :  { %4956 = vmatpush1.bf16.msra.mxu1 %v6662_v63 }
 0x52e   :  { %4957 = vmatprep.subr.bf16.mxu1 %v6679_v29  ;;  %v6605_v29 = vcombine.high %v3783_v61, %v3791_v33  ;;  %v3769_v33 = vld [vmem:[%s12330_s4 + $0x18] sm:$0xff] }
 0x52f   :  { %4700 = vmatpush1.bf16.msra.mxu0 %v6666_v31 }
 0x530   :  { %4701 = vmatprep.subr.bf16.mxu0 %v6683_v39 }
 0x531   :  { %4958 = vmatpush1.bf16.msra.mxu1 %v6678_v5  ;;  %v3799_v5 = vld [vmem:[%s12330_s4 + $0x108] sm:$0xff] }
 0x532   :  { %4959 = vmatprep.subr.bf16.mxu1 %v6695_v28  ;;  %v6621_v39 = vcombine.high %v3799_v5, %v3807_v37  ;;  %v6637_v28 = vcombine.high %v3815_v23, %v3823_v53  ;;  %v3801_v53 = vld [vmem:[%s12330_s4 + $0x118] sm:$0xff] }
 0x533   :  { %4702 = vmatpush1.bf16.msra.mxu0 %v6682_v2  ;;  %v6620_v2 = vcombine.low %v3799_v5, %v3807_v37  ;;  %v3785_v37 = vld [vmem:[%s12330_s4 + $0x98] sm:$0xff] }
 0x534   :  { %4703 = vmatprep.subr.bf16.mxu0 %v6699_v20 }
 0x535   :  { %4960 = vmatpush1.bf16.msra.mxu1 %v6694_v15  ;;  %v3831_v15 = vld [vmem:[%s12330_s4 + $0x208] sm:$0xff] }
 0x536   :  { %4961 = vmatprep.subr.bf16.mxu1 %v6711_v32  ;;  %v6653_v20 = vcombine.high %v3831_v15, %v3839_v60  ;;  %v6669_v32 = vcombine.high %v3847_v46, %v3855_v11  ;;  %v3817_v46 = vld [vmem:[%s12330_s4 + $0x198] sm:$0xff] }
 0x537   :  { %4704 = vmatpush1.bf16.msra.mxu0 %v6698_v8  ;;  %v6652_v8 = vcombine.low %v3831_v15, %v3839_v60  ;;  %v9772_v15 = vld [vmem:[%s12332_s6] sm:$0xff]   ;;  %v9773_v60 = vld [vmem:[%s12332_s6 + $0x48] sm:$0xff]   ;;  %v3825_v11 = vld [vmem:[%s12330_s4 + $0x1d8] sm:$0xff] }
 0x538   :  { %4732 = vmatprep.subr.bf16.mxu0 %v6589_v17 }
 0x539   :  { %4962 = vmatpush1.bf16.msra.mxu1 %v6710_v43  ;;  %v3863_v43 = vld [vmem:[%s12330_s4 + $0x308] sm:$0xff] }
 0x53a   :  { %v6685_v17 = vcombine.high %v3863_v43, %v3871_v0 }
 0x5ec   :  { %v8502_v47 = vpop.f32.mrb[4].mxu0 }
 0x5ed   :  { %v3731_v6 = vmul.f32 %v8502_v47, %v8502_v47  ;;  %v3130_v55 = vpop.f32.mrb[5].mxu0  ;;  %v3737_v54 = vsub.f32 %v11207_v38, %v8502_v47  ;;  %v3887_v47 = vld [vmem:[%s12330_s4 + $0x3c8] sm:$0xff] }
 0x5ee   :  { %v3730_v19 = vmul.f32 %v3130_v55, %v3130_v55  ;;  %v3736_v16 = vsub.f32 %v11209_v52, %v3130_v55 }
 0x5ef   :  { %v8712_v9 = vpop.f32.mrb[6].mxu1 }
 0x5f0   :  { %v3733_v27 = vsub.f32 %v8712_v9, %v3731_v6  ;;  %v3720_v59 = vpop.f32.mrb[7].mxu1  ;;  %v6684_v6 = vcombine.low %v3863_v43, %v3871_v0  ;;  %v3776_v9 = vld [vmem:[%s12330_s4 + $0x50] sm:$0xff]  ;;  %v6641_v43 = vcombine.high %v3817_v46, %v3825_v11  ;;  %v3833_v0 = vld [vmem:[%s12330_s4 + $0x218] sm:$0xff] }
 0x5f1   :  { %v3732_v10 = vsub.f32 %v3720_v59, %v3730_v19  ;;  %v3768_v19 = vld [vmem:[%s12330_s4 + $0x10] sm:$0xff] }
 0x5f2   :  { %v3735_v12 = vmax.f32 %v3733_v27, 0.0  ;;  %v6591_v59 = vcombine.high %v3768_v19, %v3776_v9 }
 0x5f3   :  { %v3734_v58 = vmax.f32 %v3732_v10, 0.0  ;;  %v3784_v10 = vld [vmem:[%s12330_s4 + $0x90] sm:$0xff] }
 0x5f4   :  { %v3739_v13 = vadd.f32 1e-05, %v3735_v12  ;;  %v3792_v12 = vld [vmem:[%s12330_s4 + $0xd0] sm:$0xff] }
 0x5f5   :  { %v3738_v3 = vadd.f32 1e-05, %v3734_v58  ;;  %v6590_v58 = vcombine.low %v3768_v19, %v3776_v9  ;;  %v3865_v9 = vld [vmem:[%s12330_s4 + $0x318] sm:$0xff] }
 0x5f6   :  { %9907 = vrsqrt.f32 %v3739_v13  ;;  %v6607_v13 = vcombine.high %v3784_v10, %v3792_v12 }
 0x5f7   :  { %9909 = vrsqrt.f32 %v3738_v3  ;;  %v3800_v3 = vld [vmem:[%s12330_s4 + $0x110] sm:$0xff] }
 0x600   :  { %v9908_v21 = vpop.eup %9907 }
 0x601   :  { %v9910_v51 = vpop.eup %9909  ;;  %v3743_v36 = vmul.f32 %v9908_v21, %v3737_v54  ;;  %v6606_v54 = vcombine.low %v3784_v10, %v3792_v12  ;;  %v3816_v21 = vld [vmem:[%s12330_s4 + $0x190] sm:$0xff]  ;;  %v3881_v12 = vld [vmem:[%s12330_s4 + $0x398] sm:$0xff] }
 0x602   :  { %v3742_v4 = vmul.f32 %v9910_v51, %v3736_v16  ;;  %v3824_v16 = vld [vmem:[%s12330_s4 + $0x1d0] sm:$0xff]  ;;  %v6622_v51 = vcombine.low %v3800_v3, %v3808_v1 }
 0x603   :  { %v3749_v45 = vmul.f32 %v3747_v26, %v3743_v36  ;;  %v6639_v36 = vcombine.high %v3816_v21, %v3824_v16 }
 0x604   :  { %v3748_v57 = vmul.f32 %v3747_v26, %v3742_v4  ;;  %v6623_v26 = vcombine.high %v3800_v3, %v3808_v1  ;;  %v3840_v4 = vld [vmem:[%s12330_s4 + $0x250] sm:$0xff] }
 0x605   :  { %v3755_v56 = vadd.f32 %v3753_v49, %v3749_v45  ;;  %v6638_v45 = vcombine.low %v3816_v21, %v3824_v16  ;;  %v9775_v1 = vld [vmem:[%s12332_s6 + $0x50] sm:$0xff]  }
 0x606   :  { %v3754_v30 = vadd.f32 %v3753_v49, %v3748_v57  ;;  %v3832_v49 = vld [vmem:[%s12330_s4 + $0x210] sm:$0xff] }
 0x607   :  { %v3759_v44 = vmul.f32 0.70710677, %v3755_v56  ;;  %v3757_v63 = vmul.f32 0.5, %v3755_v56  ;;  %v6655_v57 = vcombine.high %v3832_v49, %v3840_v4  ;;  %v3848_v56 = vld [vmem:[%s12330_s4 + $0x290] sm:$0xff] }
 0x608   :  { %v3758_v35 = vmul.f32 0.70710677, %v3754_v30  ;;  %v3756_v25 = vmul.f32 0.5, %v3754_v30  ;;  %v3856_v30 = vld [vmem:[%s12330_s4 + $0x2d0] sm:$0xff] }
 0x609   :  { %9911 = verf.f32 %v3759_v44  ;;  %v6654_v44 = vcombine.low %v3832_v49, %v3840_v4  ;;  %v9776_v21 = vld [vmem:[%s12332_s6 + $0x10] sm:$0xff]   ;;  %v3794_v49 = vld [vmem:[%s12330_s4 + $0xe0] sm:$0xff]  ;;  %v9777_v4 = vld [vmem:[%s12332_s6 + $0x58] sm:$0xff]  }
 0x60a   :  { %9913 = verf.f32 %v3758_v35  ;;  %v6671_v35 = vcombine.high %v3848_v56, %v3856_v30 }
 0x613   :  { %v9912_v38 = vpop.eup %9911 }
 0x614   :  { %v9914_v40 = vpop.eup %9913  ;;  %v3763_v62 = vadd.f32 1.0, %v9912_v38  ;;  %v3864_v38 = vld [vmem:[%s12330_s4 + $0x310] sm:$0xff] }
 0x615   :  { %v3762_v50 = vadd.f32 1.0, %v9914_v40  ;;  %v3872_v40 = vld [vmem:[%s12330_s4 + $0x350] sm:$0xff] }
 0x616   :  { %v3765_v52 = vmul.f32 %v3763_v62, %v3757_v63  ;;  %v6670_v63 = vcombine.low %v3848_v56, %v3856_v30  ;;  %v6687_v62 = vcombine.high %v3864_v38, %v3872_v40  ;;  %v3802_v30 = vld [vmem:[%s12330_s4 + $0x120] sm:$0xff] }
 0x617   :  { %v3764_v34 = vmul.f32 %v3762_v50, %v3756_v25  ;;  %v3880_v25 = vld [vmem:[%s12330_s4 + $0x390] sm:$0xff] }
 0x618   :  { %v3888_v50 = vld [vmem:[%s12330_s4 + $0x3d0] sm:$0xff] }
 0x619   :  { %v11544_v31 = vpack.c.bf16 %v3765_v52, %v3764_v34  ;;  %v6686_v52 = vcombine.low %v3864_v38, %v3872_v40  ;;  %v6703_v61 = vcombine.high %v3880_v25, %v3888_v50  ;;  %v3777_v34 = vld [vmem:[%s12330_s4 + $0x58] sm:$0xff]  ;;  %v9780_v38 = vld [vmem:[%s12332_s6 + $0x20] sm:$0xff]  }
 0x61a   :  { %v6593_v5 = vcombine.high %v3769_v33, %v3777_v34 }
 0x61b   :  { %4722 = vmatmul.mubr.bf16.vlgmr.msra.gmra.mrb[8].mxu0 %v11544_v31  ;;  %4980 = vmatmul.mubr.bf16.vlgmr.msra.gmra.mrb[8].mxu1 %v11544_v31 }
 0x61c   :  { %4733 = vmatpush1.bf16.msra.mxu0 %v6588_v22  ;;  %4764 = vmatprep.mubr.bf16.mxu0 %v10118_v42  ;;  %v3879_v22 = vld [vmem:[%s12330_s4 + $0x388] sm:$0xff] }
 0x61d   :  { %4734 = vmatprep.subr.bf16.mxu0 %v6605_v29  ;;  %v6701_v55 = vcombine.high %v3879_v22, %v3887_v47  ;;  %v6700_v27 = vcombine.low %v3879_v22, %v3887_v47  ;;  %v6702_v29 = vcombine.low %v3880_v25, %v3888_v50  ;;  %v3849_v47 = vld [vmem:[%s12330_s4 + $0x298] sm:$0xff]  ;;  %v3826_v25 = vld [vmem:[%s12330_s4 + $0x1e0] sm:$0xff]  ;;  %v9781_v50 = vld [vmem:[%s12332_s6 + $0x68] sm:$0xff]  }
 0x620   :  { %4735 = vmatpush1.bf16.msra.mxu0 %v6604_v41  ;;  %v3793_v41 = vld [vmem:[%s12330_s4 + $0xd8] sm:$0xff] }
 0x621   :  { %4736 = vmatprep.subr.bf16.mxu0 %v6621_v39  ;;  %v6592_v39 = vcombine.low %v3769_v33, %v3777_v34  ;;  %v6609_v23 = vcombine.high %v3785_v37, %v3793_v41  ;;  %v3834_v34 = vld [vmem:[%s12330_s4 + $0x220] sm:$0xff] }
 0x624   :  { %4737 = vmatpush1.bf16.msra.mxu0 %v6620_v2  ;;  %v3809_v2 = vld [vmem:[%s12330_s4 + $0x158] sm:$0xff] }
 0x625   :  { %4738 = vmatprep.subr.bf16.mxu0 %v6637_v28  ;;  %v9771_v28 = vld [vmem:[%s12332_s6 + $0x40] sm:$0xff]  }
 0x626   :  { %7445 = vmatprep.subr.bf16.mxu1 %v9771_v28  ;;  %v9786_v28 = vld [vmem:[%s12332_s6 + $0x38] sm:$0xff]  }
 0x627   :  { %7446 = vmatpush3.bf16.msra.mxu1 %v9772_v15 }
 0x628   :  { %4739 = vmatpush1.bf16.msra.mxu0 %v6636_v7  ;;  %v6608_v7 = vcombine.low %v3785_v37, %v3793_v41  ;;  %7447 = vmatprep.subr.bf16.mxu1 %v9773_v60  ;;  %v9784_v37 = vld [vmem:[%s12332_s6 + $0x30] sm:$0xff]  }
 0x629   :  { %4740 = vmatprep.subr.bf16.mxu0 %v6653_v20  ;;  %v6625_v20 = vcombine.high %v3801_v53, %v3809_v2 }
 0x62c   :  { %4741 = vmatpush1.bf16.msra.mxu0 %v6652_v8  ;;  %v9774_v8 = vld [vmem:[%s12332_s6 + $0x8] sm:$0xff]  }
 0x62d   :  { %4742 = vmatprep.subr.bf16.mxu0 %v6669_v32  ;;  %v6624_v32 = vcombine.low %v3801_v53, %v3809_v2  ;;  %7448 = vmatpush3.bf16.msra.mxu1 %v9774_v8  ;;  %v3858_v53 = vld [vmem:[%s12330_s4 + $0x2e0] sm:$0xff]  ;;  %v9785_v2 = vld [vmem:[%s12332_s6 + $0x78] sm:$0xff]  }
 0x62e   :  { %7449 = vmatprep.subr.bf16.mxu1 %v9775_v1  ;;  %v3882_v8 = vld [vmem:[%s12330_s4 + $0x3a0] sm:$0xff] }
 0x630   :  { %4743 = vmatpush1.bf16.msra.mxu0 %v6668_v24  ;;  %v3841_v24 = vld [vmem:[%s12330_s4 + $0x258] sm:$0xff] }
 0x631   :  { %4744 = vmatprep.subr.bf16.mxu0 %v6685_v17  ;;  %v6640_v17 = vcombine.low %v3817_v46, %v3825_v11  ;;  %v6657_v22 = vcombine.high %v3833_v0, %v3841_v24  ;;  %7450 = vmatpush3.bf16.msra.mxu1 %v9776_v21 }
 0x632   :  { %7451 = vmatprep.subr.bf16.mxu1 %v9777_v4  ;;  %v9803_v4 = vld [vmem:[%s12332_s6 + $0x140] sm:$0xff]  }
 0x634   :  { %4745 = vmatpush1.bf16.msra.mxu0 %v6684_v6  ;;  %v3857_v6 = vld [vmem:[%s12330_s4 + $0x2d8] sm:$0xff] }
 0x635   :  { %4746 = vmatprep.subr.bf16.mxu0 %v6701_v55  ;;  %v6656_v55 = vcombine.low %v3833_v0, %v3841_v24  ;;  %v6673_v19 = vcombine.high %v3849_v47, %v3857_v6  ;;  %v3771_v24 = vld [vmem:[%s12330_s4 + $0x28] sm:$0xff] }
 0x638   :  { %4747 = vmatpush1.bf16.msra.mxu0 %v6700_v27  ;;  %v3873_v27 = vld [vmem:[%s12330_s4 + $0x358] sm:$0xff] }
 0x639   :  { %4775 = vmatprep.subr.bf16.mxu0 %v6591_v59  ;;  %v6672_v59 = vcombine.low %v3849_v47, %v3857_v6  ;;  %v6689_v10 = vcombine.high %v3865_v9, %v3873_v27  ;;  %v3787_v6 = vld [vmem:[%s12330_s4 + $0xa8] sm:$0xff] }
 0x63b   :  { %4765 = vmatmul.mubr.bf16.vlgmr.msra.gmra.mrb[12].mxu0 %v11544_v31 }
 0x63c   :  { %4776 = vmatpush1.bf16.msra.mxu0 %v6590_v58  ;;  %4807 = vmatprep.mubr.bf16.mxu0 %v10118_v42  ;;  %v3889_v58 = vld [vmem:[%s12330_s4 + $0x3d8] sm:$0xff] }
 0x63d   :  { %4777 = vmatprep.subr.bf16.mxu0 %v6607_v13  ;;  %v6688_v13 = vcombine.low %v3865_v9, %v3873_v27  ;;  %v6705_v3 = vcombine.high %v3881_v12, %v3889_v58  ;;  %v6704_v16 = vcombine.low %v3881_v12, %v3889_v58  ;;  %v3803_v27 = vld [vmem:[%s12330_s4 + $0x128] sm:$0xff] }
 0x63e   :  { %v3819_v58 = vld [vmem:[%s12330_s4 + $0x1a8] sm:$0xff] }
 0x640   :  { %4778 = vmatpush1.bf16.msra.mxu0 %v6606_v54  ;;  %v3770_v54 = vld [vmem:[%s12330_s4 + $0x20] sm:$0xff] }
 0x641   :  { %4779 = vmatprep.subr.bf16.mxu0 %v6623_v26  ;;  %v3778_v26 = vld [vmem:[%s12330_s4 + $0x60] sm:$0xff] }
 0x644   :  { %4780 = vmatpush1.bf16.msra.mxu0 %v6622_v51  ;;  %v6595_v51 = vcombine.high %v3770_v54, %v3778_v26 }
 0x645   :  { %4781 = vmatprep.subr.bf16.mxu0 %v6639_v36  ;;  %v3786_v36 = vld [vmem:[%s12330_s4 + $0xa0] sm:$0xff] }
 0x646   :  { %v6611_v56 = vcombine.high %v3786_v36, %v3794_v49  ;;  %v6610_v40 = vcombine.low %v3786_v36, %v3794_v49  ;;  %v3859_v36 = vld [vmem:[%s12330_s4 + $0x2e8] sm:$0xff] }
 0x648   :  { %4782 = vmatpush1.bf16.msra.mxu0 %v6638_v45  ;;  %v9778_v45 = vld [vmem:[%s12332_s6 + $0x18] sm:$0xff]  }
 0x649   :  { %4783 = vmatprep.subr.bf16.mxu0 %v6655_v57  ;;  %v6594_v57 = vcombine.low %v3770_v54, %v3778_v26  ;;  %7452 = vmatpush3.bf16.msra.mxu1 %v9778_v45  ;;  %v3835_v54 = vld [vmem:[%s12330_s4 + $0x228] sm:$0xff] }
 0x64a   :  { %v3843_v26 = vld [vmem:[%s12330_s4 + $0x268] sm:$0xff] }
 0x64b   :  { %v6660_v49 = vcombine.low %v3835_v54, %v3843_v26 }
 0x64c   :  { %4784 = vmatpush1.bf16.msra.mxu0 %v6654_v44  ;;  %v3810_v44 = vld [vmem:[%s12330_s4 + $0x160] sm:$0xff] }
 0x64d   :  { %4785 = vmatprep.subr.bf16.mxu0 %v6671_v35  ;;  %v9779_v35 = vld [vmem:[%s12332_s6 + $0x60] sm:$0xff]  }
 0x64e   :  { %7453 = vmatprep.subr.bf16.mxu1 %v9779_v35  ;;  %v3883_v35 = vld [vmem:[%s12330_s4 + $0x3a8] sm:$0xff] }
 0x64f   :  { %7454 = vmatpush3.bf16.msra.mxu1 %v9780_v38  ;;  %v3891_v38 = vld [vmem:[%s12330_s4 + $0x3e8] sm:$0xff] }
 0x650   :  { %4786 = vmatpush1.bf16.msra.mxu0 %v6670_v63  ;;  %v6627_v63 = vcombine.high %v3802_v30, %v3810_v44  ;;  %7455 = vmatprep.subr.bf16.mxu1 %v9781_v50  ;;  %v6708_v50 = vcombine.low %v3883_v35, %v3891_v38 }
 0x651   :  { %4787 = vmatprep.subr.bf16.mxu0 %v6687_v62  ;;  %v3818_v62 = vld [vmem:[%s12330_s4 + $0x1a0] sm:$0xff] }
 0x652   :  { %v6643_v33 = vcombine.high %v3818_v62, %v3826_v25  ;;  %v6642_v41 = vcombine.low %v3818_v62, %v3826_v25  ;;  %v3773_v62 = vld [vmem:[%s12330_s4 + $0x38] sm:$0xff] }
 0x653   :  { %v3781_v25 = vld [vmem:[%s12330_s4 + $0x78] sm:$0xff] }
 0x654   :  { %4788 = vmatpush1.bf16.msra.mxu0 %v6686_v52  ;;  %v9782_v52 = vld [vmem:[%s12332_s6 + $0x28] sm:$0xff]  }
 0x655   :  { %4789 = vmatprep.subr.bf16.mxu0 %v6703_v61  ;;  %v6626_v61 = vcombine.low %v3802_v30, %v3810_v44  ;;  %7456 = vmatpush3.bf16.msra.mxu1 %v9782_v52  ;;  %v6601_v52 = vcombine.high %v3773_v62, %v3781_v25 }
 0x658   :  { %4790 = vmatpush1.bf16.msra.mxu0 %v6702_v29  ;;  %v3842_v29 = vld [vmem:[%s12330_s4 + $0x260] sm:$0xff] }
 0x659   :  { %4818 = vmatprep.subr.bf16.mxu0 %v6593_v5  ;;  %v9783_v5 = vld [vmem:[%s12332_s6 + $0x70] sm:$0xff]   ;;  %v6658_v15 = vcombine.low %v3834_v34, %v3842_v29 }
 0x65a   :  { %7457 = vmatprep.subr.bf16.mxu1 %v9783_v5  ;;  %v3805_v5 = vld [vmem:[%s12330_s4 + $0x138] sm:$0xff] }
 0x65b   :  { %4808 = vmatmul.mubr.bf16.vlgmr.msra.gmra.mrb[16].mxu0 %v11544_v31  ;;  %7458 = vmatpush3.bf16.msra.mxu1 %v9784_v37  ;;  %v3813_v37 = vld [vmem:[%s12330_s4 + $0x178] sm:$0xff] }
 0x65c   :  { %4819 = vmatpush1.bf16.msra.mxu0 %v6592_v39  ;;  %4850 = vmatprep.mubr.bf16.mxu0 %v10118_v42  ;;  %v6659_v39 = vcombine.high %v3834_v34, %v3842_v29  ;;  %v6600_v34 = vcombine.low %v3773_v62, %v3781_v25 }
 0x65d   :  { %4820 = vmatprep.subr.bf16.mxu0 %v6609_v23  ;;  %v3850_v23 = vld [vmem:[%s12330_s4 + $0x2a0] sm:$0xff]  ;;  %7459 = vmatprep.subr.bf16.mxu1 %v9785_v2  ;;  %v6632_v2 = vcombine.low %v3805_v5, %v3813_v37 }
 0x65e   :  { %v6675_v60 = vcombine.high %v3850_v23, %v3858_v53  ;;  %v6674_v46 = vcombine.low %v3850_v23, %v3858_v53  ;;  %v3821_v23 = vld [vmem:[%s12330_s4 + $0x1b8] sm:$0xff] }
 0x65f   :  { %7460 = vmatpush3.bf16.msra.mxu1 %v9786_v28  ;;  %v3829_v53 = vld [vmem:[%s12330_s4 + $0x1f8] sm:$0xff] }
 0x660   :  { %4821 = vmatpush1.bf16.msra.mxu0 %v6608_v7  ;;  %v3866_v7 = vld [vmem:[%s12330_s4 + $0x320] sm:$0xff]  ;;  %7489 = vmatprep.subr.bf16.mxu1 %v9803_v4  ;;  %v6649_v28 = vcombine.high %v3821_v23, %v3829_v53 }
 0x661   :  { %4822 = vmatprep.subr.bf16.mxu0 %v6625_v20  ;;  %v3874_v20 = vld [vmem:[%s12330_s4 + $0x360] sm:$0xff] }
 0x662   :  { %v6691_v11 = vcombine.high %v3866_v7, %v3874_v20  ;;  %v9796_v4 = vld [vmem:[%s12332_s6 + $0xa0] sm:$0xff]  }
 0x664   :  { %4823 = vmatpush1.bf16.msra.mxu0 %v6624_v32  ;;  %v3890_v32 = vld [vmem:[%s12330_s4 + $0x3e0] sm:$0xff] }
 0x665   :  { %4824 = vmatprep.subr.bf16.mxu0 %v6641_v43  ;;  %v6690_v43 = vcombine.low %v3866_v7, %v3874_v20  ;;  %v6707_v0 = vcombine.high %v3882_v8, %v3890_v32  ;;  %v3853_v20 = vld [vmem:[%s12330_s4 + $0x2b8] sm:$0xff] }
 0x668   :  { %4825 = vmatpush1.bf16.msra.mxu0 %v6640_v17  ;;  %v3779_v17 = vld [vmem:[%s12330_s4 + $0x68] sm:$0xff] }
 0x669   :  { %4826 = vmatprep.subr.bf16.mxu0 %v6657_v22  ;;  %v6706_v22 = vcombine.low %v3882_v8, %v3890_v32  ;;  %v6597_v47 = vcombine.high %v3771_v24, %v3779_v17  ;;  %v3869_v32 = vld [vmem:[%s12330_s4 + $0x338] sm:$0xff] }
 0x66c   :  { %4827 = vmatpush1.bf16.msra.mxu0 %v6656_v55  ;;  %v3795_v55 = vld [vmem:[%s12330_s4 + $0xe8] sm:$0xff] }
 0x66d   :  { %4828 = vmatprep.subr.bf16.mxu0 %v6673_v19  ;;  %v6596_v19 = vcombine.low %v3771_v24, %v3779_v17  ;;  %v6613_v9 = vcombine.high %v3787_v6, %v3795_v55  ;;  %v3885_v17 = vld [vmem:[%s12330_s4 + $0x3b8] sm:$0xff] }
 0x670   :  { %4829 = vmatpush1.bf16.msra.mxu0 %v6672_v59  ;;  %v3811_v59 = vld [vmem:[%s12330_s4 + $0x168] sm:$0xff] }
 0x671   :  { %4830 = vmatprep.subr.bf16.mxu0 %v6689_v10  ;;  %v6612_v10 = vcombine.low %v3787_v6, %v3795_v55  ;;  %v6629_v12 = vcombine.high %v3803_v27, %v3811_v59 }
 0x674   :  { %4831 = vmatpush1.bf16.msra.mxu0 %v6688_v13  ;;  %v3827_v13 = vld [vmem:[%s12330_s4 + $0x1e8] sm:$0xff] }
 0x675   :  { %4832 = vmatprep.subr.bf16.mxu0 %v6705_v3  ;;  %v6628_v3 = vcombine.low %v3803_v27, %v3811_v59  ;;  %v6645_v1 = vcombine.high %v3819_v58, %v3827_v13  ;;  %v6644_v21 = vcombine.low %v3819_v58, %v3827_v13  ;;  %v9789_v27 = vld [vmem:[%s12332_s6 + $0xc8] sm:$0xff]   ;;  %v9792_v13 = vld [vmem:[%s12332_s6 + $0x90] sm:$0xff]  }
 0x676   :  { %v9790_v59 = vld [vmem:[%s12332_s6 + $0x88] sm:$0xff]  }
 0x677   :  { %v11904_v58 = vld [vmem:[#allocation8 + $0x8] sm:$0xff] }
 0x678   :  { %4833 = vmatpush1.bf16.msra.mxu0 %v6704_v16  ;;  %v6661_v16 = vcombine.high %v3835_v54, %v3843_v26  ;;  %v9794_v54 = vld [vmem:[%s12332_s6 + $0x98] sm:$0xff]   ;;  %v9795_v26 = vld [vmem:[%s12332_s6 + $0xe0] sm:$0xff]  }
 0x679   :  { %4861 = vmatprep.subr.bf16.mxu0 %v6595_v51  ;;  %v3851_v51 = vld [vmem:[%s12330_s4 + $0x2a8] sm:$0xff] }
 0x67a   :  { %v6677_v45 = vcombine.high %v3851_v51, %v3859_v36  ;;  %v6676_v30 = vcombine.low %v3851_v51, %v3859_v36 }
 0x67b   :  { %4851 = vmatmul.mubr.bf16.vlgmr.msra.gmra.mrb[20].mxu0 %v11544_v31 }
 0x67c   :  { %4862 = vmatpush1.bf16.msra.mxu0 %v6594_v57  ;;  %4893 = vmatprep.mubr.bf16.mxu0 %v10118_v42  ;;  %v3867_v57 = vld [vmem:[%s12330_s4 + $0x328] sm:$0xff] }
 0x67d   :  { %4863 = vmatprep.subr.bf16.mxu0 %v6611_v56  ;;  %v3875_v56 = vld [vmem:[%s12330_s4 + $0x368] sm:$0xff] }
 0x67e   :  { %v6693_v44 = vcombine.high %v3867_v57, %v3875_v56 }
 0x680   :  { %4864 = vmatpush1.bf16.msra.mxu0 %v6610_v40  ;;  %v6692_v40 = vcombine.low %v3867_v57, %v3875_v56 }
 0x681   :  { %4865 = vmatprep.subr.bf16.mxu0 %v6627_v63  ;;  %v6709_v63 = vcombine.high %v3883_v35, %v3891_v38  ;;  %v9798_v35 = vld [vmem:[%s12332_s6 + $0xa8] sm:$0xff]   ;;  %v9799_v38 = vld [vmem:[%s12332_s6 + $0xf0] sm:$0xff]  }
 0x684   :  { %4866 = vmatpush1.bf16.msra.mxu0 %v6626_v61  ;;  %v3789_v61 = vld [vmem:[%s12330_s4 + $0xb8] sm:$0xff] }
 0x685   :  { %4867 = vmatprep.subr.bf16.mxu0 %v6643_v33  ;;  %v3797_v33 = vld [vmem:[%s12330_s4 + $0xf8] sm:$0xff] }
 0x686   :  { %v6617_v29 = vcombine.high %v3789_v61, %v3797_v33 }
 0x688   :  { %4868 = vmatpush1.bf16.msra.mxu0 %v6642_v41  ;;  %v6616_v41 = vcombine.low %v3789_v61, %v3797_v33 }
 0x689   :  { %4869 = vmatprep.subr.bf16.mxu0 %v6659_v39  ;;  %v6633_v39 = vcombine.high %v3805_v5, %v3813_v37  ;;  %v9800_v5 = vld [vmem:[%s12332_s6 + $0xb0] sm:$0xff]  }
 0x68c   :  { %4870 = vmatpush1.bf16.msra.mxu0 %v6658_v15  ;;  %v3837_v15 = vld [vmem:[%s12330_s4 + $0x238] sm:$0xff] }
 0x68d   :  { %4871 = vmatprep.subr.bf16.mxu0 %v6675_v60  ;;  %v6648_v60 = vcombine.low %v3821_v23, %v3829_v53 }
 0x690   :  { %4872 = vmatpush1.bf16.msra.mxu0 %v6674_v46  ;;  %v3861_v46 = vld [vmem:[%s12330_s4 + $0x2f8] sm:$0xff] }
 0x691   :  { %4873 = vmatprep.subr.bf16.mxu0 %v6691_v11  ;;  %v6681_v8 = vcombine.high %v3853_v20, %v3861_v46 }
 0x694   :  { %4874 = vmatpush1.bf16.msra.mxu0 %v6690_v43  ;;  %v3877_v43 = vld [vmem:[%s12330_s4 + $0x378] sm:$0xff] }
 0x695   :  { %4875 = vmatprep.subr.bf16.mxu0 %v6707_v0  ;;  %v6680_v0 = vcombine.low %v3853_v20, %v3861_v46  ;;  %v6697_v24 = vcombine.high %v3869_v32, %v3877_v43  ;;  %v9802_v20 = vld [vmem:[%s12332_s6 + $0xb8] sm:$0xff]  }
 0x698   :  { %4876 = vmatpush1.bf16.msra.mxu0 %v6706_v22  ;;  %v3893_v22 = vld [vmem:[%s12330_s4 + $0x3f8] sm:$0xff] }
 0x699   :  { %4904 = vmatprep.subr.bf16.mxu0 %v6597_v47  ;;  %v6696_v47 = vcombine.low %v3869_v32, %v3877_v43  ;;  %v6713_v6 = vcombine.high %v3885_v17, %v3893_v22  ;;  %v6712_v55 = vcombine.low %v3885_v17, %v3893_v22 }
 0x69b   :  { %4894 = vmatmul.mubr.bf16.vlgmr.msra.gmra.mrb[24].mxu0 %v11544_v31 }
 0x69c   :  { %4905 = vmatpush1.bf16.msra.mxu0 %v6596_v19  ;;  %4936 = vmatprep.mubr.bf16.mxu0 %v10118_v42  ;;  %v9787_v19 = vld [vmem:[%s12332_s6 + $0xc0] sm:$0xff]  }
 0x69d   :  { %4906 = vmatprep.subr.bf16.mxu0 %v6613_v9  ;;  %v9788_v9 = vld [vmem:[%s12332_s6 + $0x80] sm:$0xff]  }
 0x6a0   :  { %4907 = vmatpush1.bf16.msra.mxu0 %v6612_v10  ;;  %v9791_v10 = vld [vmem:[%s12332_s6 + $0xd0] sm:$0xff]  }
 0x6a1   :  { %4908 = vmatprep.subr.bf16.mxu0 %v6629_v12  ;;  %v11902_v12 = vld [vmem:[#allocation8] sm:$0xff] }
 0x6a4   :  { %4909 = vmatpush1.bf16.msra.mxu0 %v6628_v3  ;;  %v11913_v3 = vunpack.c.l.bf16 %v11902_v12 }
 0x6a5   :  { %4910 = vmatprep.subr.bf16.mxu0 %v6645_v1  ;;  %v11916_v1 = vunpack.c.h.bf16 %v11904_v58 }
 0x6a6   :  { %v3912_v36 = vrot.slane %v11913_v3, %v11050_v18 }
 0x6a8   :  { %4911 = vmatpush1.bf16.msra.mxu0 %v6644_v21  ;;  %v12512_v21 = vld [vmem:[#allocation18_spill] sm:$0xff] }
 0x6a9   :  { %4912 = vmatprep.subr.bf16.mxu0 %v6661_v16  ;;  %v3908_v16 = vrot.slane %v11913_v3, %v12512_v21  ;;  %v3956_v51 = vrot.slane %v11916_v1, %v12512_v21 }
 0x6ab   :  { %v3988_v57 = vrot.slane %v3908_v16, %v12512_v21  ;;  %v4036_v56 = vrot.slane %v3956_v51, %v12512_v21 }
 0x6ac   :  { %4913 = vmatpush1.bf16.msra.mxu0 %v6660_v49  ;;  %v3960_v49 = vrot.slane %v11916_v1, %v11050_v18 }
 0x6ad   :  { %4914 = vmatprep.subr.bf16.mxu0 %v6677_v45  ;;  %v9797_v45 = vld [vmem:[%s12332_s6 + $0xe8] sm:$0xff]  }
 0x6b0   :  { %4915 = vmatpush1.bf16.msra.mxu0 %v6676_v30  ;;  %v3992_v30 = vrot.slane %v3912_v36, %v12512_v21 }
 0x6b1   :  { %4916 = vmatprep.subr.bf16.mxu0 %v6693_v44  ;;  %v4040_v44 = vrot.slane %v3960_v49, %v12512_v21 }
 0x6b4   :  { %4917 = vmatpush1.bf16.msra.mxu0 %v6692_v40 }
 0x6b5   :  { %4918 = vmatprep.subr.bf16.mxu0 %v6709_v63 }
 0x6b8   :  { %4919 = vmatpush1.bf16.msra.mxu0 %v6708_v50 }
 0x6b9   :  { %4990 = vmatprep.subr.bf16.mxu0 %v6601_v52 }
 0x6bb   :  { %4937 = vmatmul.mubr.bf16.vlgmr.msra.gmra.mrb[28].mxu0 %v11544_v31 }
 0x6bc   :  { %4991 = vmatpush1.bf16.msra.mxu0 %v6600_v34  ;;  %5022 = vmatprep.mubr.bf16.mxu0 %v10118_v42  ;;  %v3845_v42 = vld [vmem:[%s12330_s4 + $0x278] sm:$0xff] }
 0x6bd   :  { %4992 = vmatprep.subr.bf16.mxu0 %v6617_v29  ;;  %v6665_v7 = vcombine.high %v3837_v15, %v3845_v42  ;;  %v6664_v11 = vcombine.low %v3837_v15, %v3845_v42 }
 0x6c0   :  { %4993 = vmatpush1.bf16.msra.mxu0 %v6616_v41 }
 0x6c1   :  { %4994 = vmatprep.subr.bf16.mxu0 %v6633_v39  ;;  %v9801_v39 = vld [vmem:[%s12332_s6 + $0xf8] sm:$0xff]  }
 0x6c4   :  { %4995 = vmatpush1.bf16.msra.mxu0 %v6632_v2 }
 0x6c5   :  { %4996 = vmatprep.subr.bf16.mxu0 %v6649_v28 }
 0x6c8   :  { %4997 = vmatpush1.bf16.msra.mxu0 %v6648_v60 }
 0x6c9   :  { %4998 = vmatprep.subr.bf16.mxu0 %v6665_v7 }
 0x6cc   :  { %4999 = vmatpush1.bf16.msra.mxu0 %v6664_v11  ;;  %v9819_v11 = vld [vmem:[%s12332_s6 + $0x1c0] sm:$0xff]  }
 0x6cd   :  { %5000 = vmatprep.subr.bf16.mxu0 %v6681_v8 }
 0x6d0   :  { %5001 = vmatpush1.bf16.msra.mxu0 %v6680_v0 }
 0x6d1   :  { %5002 = vmatprep.subr.bf16.mxu0 %v6697_v24 }
 0x6d4   :  { %5003 = vmatpush1.bf16.msra.mxu0 %v6696_v47 }
 0x6d5   :  { %5004 = vmatprep.subr.bf16.mxu0 %v6713_v6 }
 0x6d8   :  { %5005 = vmatpush1.bf16.msra.mxu0 %v6712_v55 }
 0x6d9   :  { %7467 = vmatprep.subr.bf16.mxu0 %v9787_v19 }
 0x6db   :  { %5023 = vmatmul.mubr.bf16.vlgmr.msra.gmra.mrb[32].mxu0 %v11544_v31  ;;  %v9793_v31 = vld [vmem:[%s12332_s6 + $0xd8] sm:$0xff]  }
 0x6dc   :  { %7468 = vmatpush3.bf16.msra.mxu0 %v9788_v9 }
 0x6dd   :  { %7469 = vmatprep.subr.bf16.mxu0 %v9789_v27  ;;  %v11961_v27 = vsub.s32 6, %v12488_v14 }
 0x6e0   :  { %7470 = vmatpush3.bf16.msra.mxu0 %v9790_v59 }
 0x6e1   :  { %7471 = vmatprep.subr.bf16.mxu0 %v9791_v10 }
 0x6e4   :  { %7472 = vmatpush3.bf16.msra.mxu0 %v9792_v13 }
 0x6e5   :  { %7473 = vmatprep.subr.bf16.mxu0 %v9793_v31 }
 0x6e8   :  { %7474 = vmatpush3.bf16.msra.mxu0 %v9794_v54 }
 0x6e9   :  { %7475 = vmatprep.subr.bf16.mxu0 %v9795_v26 }
 0x6ec   :  { %7476 = vmatpush3.bf16.msra.mxu0 %v9796_v4 }
 0x6ed   :  { %7477 = vmatprep.subr.bf16.mxu0 %v9797_v45 }
 0x6ee   :  { %v4723_v40 = vpop.f32.mrb[8].mxu0  ;;  %v4981_v63 = vpop.f32.mrb[8].mxu1 }
 0x6ef   :  { %v4724_v62 = vadd.f32 %v4723_v40, %v3988_v57  ;;  %v4982_v25 = vadd.f32 %v4981_v63, %v4036_v56  ;;  %v4725_v50 = vpop.f32.mrb[9].mxu0  ;;  %v4983_v52 = vpop.f32.mrb[9].mxu1 }
 0x6f0   :  { %v4726_v61 = vadd.f32 %v4725_v50, %v3992_v30  ;;  %v4984_v33 = vadd.f32 %v4983_v52, %v4040_v44  ;;  %v4727_v34 = vpop.f32.mrb[10].mxu0  ;;  %v4985_v29 = vpop.f32.mrb[10].mxu1  ;;  %7478 = vmatpush3.bf16.msra.mxu0 %v9798_v35 }
 0x6f1   :  { %v5065_v37 = vmul.f32 0.70710677, %v4724_v62  ;;  %v5077_v41 = vmul.f32 0.70710677, %v4982_v25  ;;  %7479 = vmatprep.subr.bf16.mxu0 %v9799_v38  ;;  %v4728_v2 = vadd.f32 %v4727_v34, %v3988_v57  ;;  %v4986_v28 = vadd.f32 %v4985_v29, %v4036_v56  ;;  %v4729_v15 = vpop.f32.mrb[11].mxu0  ;;  %v4987_v42 = vpop.f32.mrb[11].mxu1 }
 0x6f2   :  { %v5066_v23 = vmul.f32 0.70710677, %v4726_v61  ;;  %v5078_v53 = vmul.f32 0.70710677, %v4984_v33  ;;  %v4730_v60 = vadd.f32 %v4729_v15, %v3992_v30  ;;  %v4988_v7 = vadd.f32 %v4987_v42, %v4040_v44  ;;  %v9804_v29 = vld [vmem:[%s12332_s6 + $0x100] sm:$0xff]  }
 0x6f3   :  { %9915 = verf.f32 %v5065_v37  ;;  %v5081_v46 = vmul.f32 0.70710677, %v4728_v2  ;;  %v5093_v8 = vmul.f32 0.70710677, %v4986_v28  ;;  %v5033_v55 = vmul.f32 0.5, %v4724_v62 }
 0x6f4   :  { %9917 = verf.f32 %v5077_v41  ;;  %7480 = vmatpush3.bf16.msra.mxu0 %v9800_v5  ;;  %v5082_v32 = vmul.f32 0.70710677, %v4730_v60  ;;  %v5094_v43 = vmul.f32 0.70710677, %v4988_v7  ;;  %v5045_v19 = vmul.f32 0.5, %v4982_v25  ;;  %v9805_v5 = vld [vmem:[%s12332_s6 + $0x148] sm:$0xff]  }
 0x6f5   :  { %9919 = verf.f32 %v5066_v23  ;;  %7481 = vmatprep.subr.bf16.mxu0 %v9801_v39  ;;  %v5034_v10 = vmul.f32 0.5, %v4726_v61  ;;  %v5049_v31 = vmul.f32 0.5, %v4728_v2  ;;  %v5046_v16 = vmul.f32 0.5, %v4984_v33  ;;  %v9807_v23 = vld [vmem:[%s12332_s6 + $0x150] sm:$0xff]  }
 0x6f6   :  { %9921 = verf.f32 %v5078_v53  ;;  %v5061_v36 = vmul.f32 0.5, %v4986_v28  ;;  %v5050_v56 = vmul.f32 0.5, %v4730_v60  ;;  %v5062_v14 = vmul.f32 0.5, %v4988_v7  ;;  %v9808_v60 = vld [vmem:[%s12332_s6 + $0x110] sm:$0xff]  }
 0x6f7   :  { %9923 = verf.f32 %v5081_v46  ;;  %v3916_v61 = vrot.slane %v11913_v3, %v11530_v48  ;;  %v3920_v34 = vrot.slane %v11913_v3, %v11961_v27  ;;  %v9806_v3 = vld [vmem:[%s12332_s6 + $0x108] sm:$0xff]  }
 0x6f8   :  { %9925 = verf.f32 %v5093_v8  ;;  %7482 = vmatpush3.bf16.msra.mxu0 %v9802_v20 }
 0x6f9   :  { %9927 = verf.f32 %v5082_v32  ;;  %7511 = vmatprep.subr.bf16.mxu0 %v9819_v11  ;;  %v3996_v41 = vrot.slane %v3916_v61, %v12512_v21  ;;  %v4000_v39 = vrot.slane %v3920_v34, %v12512_v21  ;;  %v9809_v11 = vld [vmem:[%s12332_s6 + $0x158] sm:$0xff]   ;;  %v9820_v61 = vld [vmem:[%s12332_s6 + $0x180] sm:$0xff]  }
 0x6fa   :  { %9929 = verf.f32 %v5094_v43 }
 0x6fd   :  { %v9916_v0 = vpop.eup %9915 }
 0x6fe   :  { %v9918_v24 = vpop.eup %9917  ;;  %v5129_v47 = vadd.f32 1.0, %v9916_v0 }
 0x6ff   :  { %v9920_v17 = vpop.eup %9919  ;;  %v5141_v9 = vadd.f32 1.0, %v9918_v24  ;;  %v9810_v24 = vld [vmem:[%s12332_s6 + $0x118] sm:$0xff]  }
 0x700   :  { %v9922_v22 = vpop.eup %9921  ;;  %v5130_v13 = vadd.f32 1.0, %v9920_v17  ;;  %v5161_v45 = vmul.f32 %v5129_v47, %v5033_v55  ;;  %v9811_v17 = vld [vmem:[%s12332_s6 + $0x160] sm:$0xff]   ;;  %v9813_v47 = vld [vmem:[%s12332_s6 + $0x168] sm:$0xff]  }
 0x701   :  { %v9924_v6 = vpop.eup %9923  ;;  %v5142_v51 = vadd.f32 1.0, %v9922_v22  ;;  %v11963_v44 = vmul.f32 %v5141_v9, %v5045_v19  ;;  %v9812_v22 = vld [vmem:[%s12332_s6 + $0x120] sm:$0xff]   ;;  %v9815_v19 = vld [vmem:[%s12332_s6 + $0x170] sm:$0xff]  }
 0x702   :  { %v9926_v59 = vpop.eup %9925  ;;  %v5145_v54 = vadd.f32 1.0, %v9924_v6  ;;  %v5162_v40 = vmul.f32 %v5130_v13, %v5034_v10  ;;  %v9814_v6 = vld [vmem:[%s12332_s6 + $0x128] sm:$0xff]  }
 0x703   :  { %v9928_v26 = vpop.eup %9927  ;;  %v5157_v49 = vadd.f32 1.0, %v9926_v59  ;;  %v11967_v25 = vmul.f32 %v5142_v51, %v5046_v16  ;;  %v9816_v51 = vld [vmem:[%s12332_s6 + $0x130] sm:$0xff]  }
 0x704   :  { %v9930_v4 = vpop.eup %9929  ;;  %v5177_v57 = vmul.f32 %v5145_v54, %v5049_v31  ;;  %v5146_v30 = vadd.f32 1.0, %v9928_v26 }
 0x705   :  { %v11965_v35 = vmul.f32 %v5157_v49, %v5061_v36  ;;  %v5158_v38 = vadd.f32 1.0, %v9930_v4 }
 0x706   :  { %v5449_v63 = vpack.c.bf16 %v5177_v57, %v5161_v45  ;;  %v5178_v62 = vmul.f32 %v5146_v30, %v5050_v56  ;;  %v9817_v45 = vld [vmem:[%s12332_s6 + $0x178] sm:$0xff]  }
 0x707   :  { %v5461_v50 = vpack.c.bf16 %v11965_v35, %v11963_v44  ;;  %v11971_v52 = vmul.f32 %v5158_v38, %v5062_v14  ;;  %v12024_v38 = vunpack.c.h.bf16 %v11902_v12  ;;  %v9821_v12 = vld [vmem:[%s12332_s6 + $0x1c8] sm:$0xff]   ;;  %v9888_v44 = vld [vmem:[%s12332_s6 + $0x390] sm:$0xff]   ;;  %v9889_v35 = vld [vmem:[%s12332_s6 + $0x3d8] sm:$0xff]  }
 0x708   :  { %v5450_v33 = vpack.c.bf16 %v5178_v62, %v5162_v40 }
 0x709   :  { %v5462_v37 = vpack.c.bf16 %v11971_v52, %v11967_v25  ;;  %v3924_v34 = vrot.slane %v12024_v38, %v12512_v21  ;;  %v9863_v52 = vld [vmem:[%s12332_s6 + $0x358] sm:$0xff]  }
 0x70a   :  { %6269 = vmatprep.mubr.bf16.mxu1 %v5450_v33  ;;  %v9835_v33 = vld [vmem:[%s12332_s6 + $0x240] sm:$0xff]  }
 0x70b   :  { %6270 = vmatmul.mubr.bf16.vlgmr.msra.gmra.mrb[12].mxu1 %v5449_v63  ;;  %v9818_v63 = vld [vmem:[%s12332_s6 + $0x138] sm:$0xff]  }
 0x70c   :  { %7490 = vmatpush3.bf16.msra.mxu1 %v9804_v29  ;;  %v3928_v29 = vrot.slane %v12024_v38, %v11050_v18 }
 0x70d   :  { %7491 = vmatprep.subr.bf16.mxu1 %v9805_v5  ;;  %v9822_v5 = vld [vmem:[%s12332_s6 + $0x188] sm:$0xff]  }
 0x70e   :  { %v4766_v53 = vpop.f32.mrb[12].mxu0 }
 0x70f   :  { %v4767_v2 = vadd.f32 %v4766_v53, %v3996_v41  ;;  %v4768_v28 = vpop.f32.mrb[13].mxu0 }
 0x710   :  { %v4769_v15 = vadd.f32 %v4768_v28, %v4000_v39  ;;  %v4770_v42 = vpop.f32.mrb[14].mxu0  ;;  %7492 = vmatpush3.bf16.msra.mxu1 %v9806_v3  ;;  %v4008_v3 = vrot.slane %v3928_v29, %v12512_v21  ;;  %v9838_v29 = vld [vmem:[%s12332_s6 + $0x208] sm:$0xff]  }
 0x711   :  { %v5067_v7 = vmul.f32 0.70710677, %v4767_v2  ;;  %v4771_v20 = vadd.f32 %v4770_v42, %v3996_v41  ;;  %v4772_v46 = vpop.f32.mrb[15].mxu0  ;;  %7493 = vmatprep.subr.bf16.mxu1 %v9807_v23  ;;  %v5035_v54 = vmul.f32 0.5, %v4767_v2  ;;  %v9823_v41 = vld [vmem:[%s12332_s6 + $0x1d0] sm:$0xff]   ;;  %v9825_v2 = vld [vmem:[%s12332_s6 + $0x1d8] sm:$0xff]  }
 0x712   :  { %v5068_v8 = vmul.f32 0.70710677, %v4769_v15  ;;  %v4773_v32 = vadd.f32 %v4772_v46, %v4000_v39  ;;  %v5036_v36 = vmul.f32 0.5, %v4769_v15  ;;  %v4004_v39 = vrot.slane %v3924_v34, %v12512_v21  ;;  %v9824_v23 = vld [vmem:[%s12332_s6 + $0x190] sm:$0xff]  }
 0x713   :  { %9931 = verf.f32 %v5067_v7  ;;  %v5083_v43 = vmul.f32 0.70710677, %v4771_v20  ;;  %v5051_v26 = vmul.f32 0.5, %v4771_v20  ;;  %v3936_v34 = vrot.slane %v12024_v38, %v11961_v27 }
 0x714   :  { %9933 = verf.f32 %v5068_v8  ;;  %v5084_v0 = vmul.f32 0.70710677, %v4773_v32  ;;  %7494 = vmatpush3.bf16.msra.mxu1 %v9808_v60  ;;  %v5052_v49 = vmul.f32 0.5, %v4773_v32 }
 0x715   :  { %9935 = verf.f32 %v5083_v43  ;;  %7495 = vmatprep.subr.bf16.mxu1 %v9809_v11  ;;  %v9826_v11 = vld [vmem:[%s12332_s6 + $0x198] sm:$0xff]   ;;  %v9827_v43 = vld [vmem:[%s12332_s6 + $0x1e0] sm:$0xff]  }
 0x716   :  { %9937 = verf.f32 %v5084_v0 }
 0x718   :  { %7496 = vmatpush3.bf16.msra.mxu1 %v9810_v24 }
 0x719   :  { %7497 = vmatprep.subr.bf16.mxu1 %v9811_v17  ;;  %v9828_v17 = vld [vmem:[%s12332_s6 + $0x1a0] sm:$0xff]  }
 0x71c   :  { %7498 = vmatpush3.bf16.msra.mxu1 %v9812_v22  ;;  %v9829_v22 = vld [vmem:[%s12332_s6 + $0x1e8] sm:$0xff]  }
 0x71d   :  { %v9932_v55 = vpop.eup %9931  ;;  %7499 = vmatprep.subr.bf16.mxu1 %v9813_v47  ;;  %v9830_v47 = vld [vmem:[%s12332_s6 + $0x1a8] sm:$0xff]  }
 0x71e   :  { %v9934_v9 = vpop.eup %9933  ;;  %v5131_v59 = vadd.f32 1.0, %v9932_v55 }
 0x71f   :  { %v9936_v10 = vpop.eup %9935  ;;  %v5132_v13 = vadd.f32 1.0, %v9934_v9 }
 0x720   :  { %v9938_v31 = vpop.eup %9937  ;;  %v5147_v16 = vadd.f32 1.0, %v9936_v10  ;;  %7500 = vmatpush3.bf16.msra.mxu1 %v9814_v6  ;;  %v5163_v57 = vmul.f32 %v5131_v59, %v5035_v54  ;;  %v9831_v6 = vld [vmem:[%s12332_s6 + $0x1f0] sm:$0xff]   ;;  %v9833_v10 = vld [vmem:[%s12332_s6 + $0x1f8] sm:$0xff]  }
 0x721   :  { %v5148_v4 = vadd.f32 1.0, %v9938_v31  ;;  %7501 = vmatprep.subr.bf16.mxu1 %v9815_v19  ;;  %v5164_v30 = vmul.f32 %v5132_v13, %v5036_v36  ;;  %v9832_v19 = vld [vmem:[%s12332_s6 + $0x1b0] sm:$0xff]  }
 0x722   :  { %v5179_v56 = vmul.f32 %v5147_v16, %v5051_v26 }
 0x723   :  { %v5180_v14 = vmul.f32 %v5148_v4, %v5052_v49 }
 0x724   :  { %v5451_v40 = vpack.c.bf16 %v5179_v56, %v5163_v57  ;;  %7502 = vmatpush3.bf16.msra.mxu1 %v9816_v51 }
 0x725   :  { %v5452_v62 = vpack.c.bf16 %v5180_v14, %v5164_v30  ;;  %7503 = vmatprep.subr.bf16.mxu1 %v9817_v45  ;;  %v9834_v45 = vld [vmem:[%s12332_s6 + $0x1b8] sm:$0xff]   ;;  %v9852_v30 = vld [vmem:[%s12332_s6 + $0x2c0] sm:$0xff]  }
 0x727   :  { %6310 = vmatprep.mubr.bf16.mxu0 %v5452_v62 }
 0x728   :  { %6311 = vmatmul.mubr.bf16.vlgmr.msra.gmra.mrb[36].mxu0 %v5451_v40  ;;  %7504 = vmatpush3.bf16.msra.mxu1 %v9818_v63 }
 0x729   :  { %7512 = vmatpush3.bf16.msra.mxu0 %v9820_v61  ;;  %7533 = vmatprep.subr.bf16.mxu1 %v9835_v33  ;;  %v9836_v61 = vld [vmem:[%s12332_s6 + $0x200] sm:$0xff]   ;;  %v9837_v33 = vld [vmem:[%s12332_s6 + $0x248] sm:$0xff]  }
 0x72a   :  { %7513 = vmatprep.subr.bf16.mxu0 %v9821_v12  ;;  %v3932_v12 = vrot.slane %v12024_v38, %v11530_v48 }
 0x72d   :  { %7514 = vmatpush3.bf16.msra.mxu0 %v9822_v5  ;;  %v9839_v5 = vld [vmem:[%s12332_s6 + $0x250] sm:$0xff]  }
 0x72e   :  { %v4809_v53 = vpop.f32.mrb[16].mxu0  ;;  %7515 = vmatprep.subr.bf16.mxu0 %v9823_v41  ;;  %v4012_v41 = vrot.slane %v3932_v12, %v12512_v21  ;;  %v9858_v12 = vld [vmem:[%s12332_s6 + $0x288] sm:$0xff]  }
 0x72f   :  { %v4810_v28 = vadd.f32 %v4809_v53, %v4004_v39  ;;  %v4811_v15 = vpop.f32.mrb[17].mxu0 }
 0x730   :  { %v4812_v42 = vadd.f32 %v4811_v15, %v4008_v3  ;;  %v4813_v60 = vpop.f32.mrb[18].mxu0 }
 0x731   :  { %v5069_v7 = vmul.f32 0.70710677, %v4810_v28  ;;  %v4814_v20 = vadd.f32 %v4813_v60, %v4004_v39  ;;  %v4815_v46 = vpop.f32.mrb[19].mxu0  ;;  %7516 = vmatpush3.bf16.msra.mxu0 %v9824_v23  ;;  %v5037_v26 = vmul.f32 0.5, %v4810_v28  ;;  %v4016_v39 = vrot.slane %v3936_v34, %v12512_v21  ;;  %v9841_v23 = vld [vmem:[%s12332_s6 + $0x258] sm:$0xff]   ;;  %v9860_v34 = vld [vmem:[%s12332_s6 + $0x2d0] sm:$0xff]  }
 0x732   :  { %v5070_v8 = vmul.f32 0.70710677, %v4812_v42  ;;  %v4816_v32 = vadd.f32 %v4815_v46, %v4008_v3  ;;  %7517 = vmatprep.subr.bf16.mxu0 %v9825_v2  ;;  %v5038_v36 = vmul.f32 0.5, %v4812_v42  ;;  %v9840_v3 = vld [vmem:[%s12332_s6 + $0x210] sm:$0xff]  }
 0x733   :  { %9939 = verf.f32 %v5069_v7  ;;  %v5085_v0 = vmul.f32 0.70710677, %v4814_v20  ;;  %v5053_v16 = vmul.f32 0.5, %v4814_v20  ;;  %v9842_v20 = vld [vmem:[%s12332_s6 + $0x218] sm:$0xff]  }
 0x734   :  { %9941 = verf.f32 %v5070_v8  ;;  %v5086_v24 = vmul.f32 0.70710677, %v4816_v32  ;;  %v5054_v49 = vmul.f32 0.5, %v4816_v32  ;;  %v9843_v8 = vld [vmem:[%s12332_s6 + $0x260] sm:$0xff]  }
 0x735   :  { %9943 = verf.f32 %v5085_v0  ;;  %7518 = vmatpush3.bf16.msra.mxu0 %v9826_v11  ;;  %v9844_v0 = vld [vmem:[%s12332_s6 + $0x220] sm:$0xff]  }
 0x736   :  { %9945 = verf.f32 %v5086_v24  ;;  %7519 = vmatprep.subr.bf16.mxu0 %v9827_v43  ;;  %v9845_v24 = vld [vmem:[%s12332_s6 + $0x268] sm:$0xff]  }
 0x739   :  { %7520 = vmatpush3.bf16.msra.mxu0 %v9828_v17  ;;  %v9846_v17 = vld [vmem:[%s12332_s6 + $0x228] sm:$0xff]  }
 0x73a   :  { %7521 = vmatprep.subr.bf16.mxu0 %v9829_v22  ;;  %v9847_v22 = vld [vmem:[%s12332_s6 + $0x270] sm:$0xff]  }
 0x73d   :  { %v9940_v55 = vpop.eup %9939  ;;  %7522 = vmatpush3.bf16.msra.mxu0 %v9830_v47 }
 0x73e   :  { %v9942_v9 = vpop.eup %9941  ;;  %v5133_v59 = vadd.f32 1.0, %v9940_v55  ;;  %7523 = vmatprep.subr.bf16.mxu0 %v9831_v6  ;;  %v9848_v6 = vld [vmem:[%s12332_s6 + $0x230] sm:$0xff]  }
 0x73f   :  { %v9944_v13 = vpop.eup %9943  ;;  %v5134_v31 = vadd.f32 1.0, %v9942_v9  ;;  %v9849_v9 = vld [vmem:[%s12332_s6 + $0x278] sm:$0xff]  }
 0x740   :  { %v9946_v54 = vpop.eup %9945  ;;  %v5149_v51 = vadd.f32 1.0, %v9944_v13  ;;  %v5165_v57 = vmul.f32 %v5133_v59, %v5037_v26 }
 0x741   :  { %v5150_v4 = vadd.f32 1.0, %v9946_v54  ;;  %7524 = vmatpush3.bf16.msra.mxu0 %v9832_v19  ;;  %v5166_v14 = vmul.f32 %v5134_v31, %v5038_v36 }
 0x742   :  { %v5181_v56 = vmul.f32 %v5149_v51, %v5053_v16  ;;  %7525 = vmatprep.subr.bf16.mxu0 %v9833_v10 }
 0x743   :  { %v5182_v40 = vmul.f32 %v5150_v4, %v5054_v49  ;;  %v9850_v49 = vld [vmem:[%s12332_s6 + $0x238] sm:$0xff]  }
 0x744   :  { %v5453_v63 = vpack.c.bf16 %v5181_v56, %v5165_v57  ;;  %v9851_v57 = vld [vmem:[%s12332_s6 + $0x340] sm:$0xff]  }
 0x745   :  { %v5454_v62 = vpack.c.bf16 %v5182_v40, %v5166_v14  ;;  %7526 = vmatpush3.bf16.msra.mxu0 %v9834_v45  ;;  %v12141_v14 = vunpack.c.l.bf16 %v11904_v58 }
 0x746   :  { %7555 = vmatprep.subr.bf16.mxu0 %v9852_v30 }
 0x747   :  { %6351 = vmatprep.mubr.bf16.mxu1 %v5454_v62  ;;  %v9854_v62 = vld [vmem:[%s12332_s6 + $0x280] sm:$0xff]   ;;  %v3944_v58 = vrot.slane %v12141_v14, %v11050_v18 }
 0x748   :  { %6352 = vmatmul.mubr.bf16.vlgmr.msra.gmra.mrb[16].mxu1 %v5453_v63 }
 0x749   :  { %7534 = vmatpush3.bf16.msra.mxu1 %v9836_v61  ;;  %v9856_v61 = vld [vmem:[%s12332_s6 + $0x2c8] sm:$0xff]  }
 0x74a   :  { %7535 = vmatprep.subr.bf16.mxu1 %v9837_v33  ;;  %v3940_v33 = vrot.slane %v12141_v14, %v12512_v21 }
 0x74d   :  { %7536 = vmatpush3.bf16.msra.mxu1 %v9838_v29  ;;  %v4020_v29 = vrot.slane %v3940_v33, %v12512_v21  ;;  %v9859_v33 = vld [vmem:[%s12332_s6 + $0x350] sm:$0xff]  }
 0x74e   :  { %v4852_v38 = vpop.f32.mrb[20].mxu0  ;;  %7537 = vmatprep.subr.bf16.mxu1 %v9839_v5  ;;  %v4024_v5 = vrot.slane %v3944_v58, %v12512_v21 }
 0x74f   :  { %v4853_v53 = vadd.f32 %v4852_v38, %v4012_v41  ;;  %v4854_v2 = vpop.f32.mrb[21].mxu0 }
 0x750   :  { %v4855_v28 = vadd.f32 %v4854_v2, %v4016_v39  ;;  %v4856_v15 = vpop.f32.mrb[22].mxu0 }
 0x751   :  { %v5071_v42 = vmul.f32 0.70710677, %v4853_v53  ;;  %v4857_v60 = vadd.f32 %v4856_v15, %v4012_v41  ;;  %v4858_v7 = vpop.f32.mrb[23].mxu0  ;;  %7538 = vmatpush3.bf16.msra.mxu1 %v9840_v3  ;;  %v5039_v31 = vmul.f32 0.5, %v4853_v53  ;;  %v9862_v41 = vld [vmem:[%s12332_s6 + $0x290] sm:$0xff]  }
 0x752   :  { %v5072_v46 = vmul.f32 0.70710677, %v4855_v28  ;;  %v4859_v11 = vadd.f32 %v4858_v7, %v4016_v39  ;;  %7539 = vmatprep.subr.bf16.mxu1 %v9841_v23  ;;  %v5040_v16 = vmul.f32 0.5, %v4855_v28  ;;  %v9864_v39 = vld [vmem:[%s12332_s6 + $0x2d8] sm:$0xff]  }
 0x753   :  { %9947 = verf.f32 %v5071_v42  ;;  %v5087_v32 = vmul.f32 0.70710677, %v4857_v60  ;;  %v5055_v54 = vmul.f32 0.5, %v4857_v60  ;;  %v9866_v42 = vld [vmem:[%s12332_s6 + $0x298] sm:$0xff]  }
 0x754   :  { %9949 = verf.f32 %v5072_v46  ;;  %v5088_v43 = vmul.f32 0.70710677, %v4859_v11  ;;  %v5056_v51 = vmul.f32 0.5, %v4859_v11 }
 0x755   :  { %9951 = verf.f32 %v5087_v32  ;;  %7540 = vmatpush3.bf16.msra.mxu1 %v9842_v20  ;;  %v9868_v20 = vld [vmem:[%s12332_s6 + $0x2e0] sm:$0xff]   ;;  %v9872_v32 = vld [vmem:[%s12332_s6 + $0x2e8] sm:$0xff]  }
 0x756   :  { %9953 = verf.f32 %v5088_v43  ;;  %7541 = vmatprep.subr.bf16.mxu1 %v9843_v8  ;;  %v9870_v8 = vld [vmem:[%s12332_s6 + $0x2a0] sm:$0xff]   ;;  %v9874_v43 = vld [vmem:[%s12332_s6 + $0x2a8] sm:$0xff]  }
 0x759   :  { %7542 = vmatpush3.bf16.msra.mxu1 %v9844_v0  ;;  %v9876_v0 = vld [vmem:[%s12332_s6 + $0x2f0] sm:$0xff]  }
 0x75a   :  { %7543 = vmatprep.subr.bf16.mxu1 %v9845_v24 }
 0x75d   :  { %v9948_v47 = vpop.eup %9947  ;;  %7544 = vmatpush3.bf16.msra.mxu1 %v9846_v17  ;;  %v9878_v17 = vld [vmem:[%s12332_s6 + $0x2b0] sm:$0xff]  }
 0x75e   :  { %v9950_v55 = vpop.eup %9949  ;;  %v5135_v19 = vadd.f32 1.0, %v9948_v47  ;;  %7545 = vmatprep.subr.bf16.mxu1 %v9847_v22 }
 0x75f   :  { %v9952_v59 = vpop.eup %9951  ;;  %v5136_v10 = vadd.f32 1.0, %v9950_v55 }
 0x760   :  { %v9954_v13 = vpop.eup %9953  ;;  %v5151_v26 = vadd.f32 1.0, %v9952_v59  ;;  %v5167_v4 = vmul.f32 %v5135_v19, %v5039_v31 }
 0x761   :  { %v5152_v36 = vadd.f32 1.0, %v9954_v13  ;;  %7546 = vmatpush3.bf16.msra.mxu1 %v9848_v6  ;;  %v5168_v56 = vmul.f32 %v5136_v10, %v5040_v16  ;;  %v9880_v6 = vld [vmem:[%s12332_s6 + $0x2f8] sm:$0xff]  }
 0x762   :  { %v5183_v45 = vmul.f32 %v5151_v26, %v5055_v54  ;;  %7547 = vmatprep.subr.bf16.mxu1 %v9849_v9  ;;  %v9882_v16 = vld [vmem:[%s12332_s6 + $0x2b8] sm:$0xff]  }
 0x763   :  { %v5184_v30 = vmul.f32 %v5152_v36, %v5056_v51 }
 0x764   :  { %v5455_v40 = vpack.c.bf16 %v5183_v45, %v5167_v4 }
 0x765   :  { %v5456_v63 = vpack.c.bf16 %v5184_v30, %v5168_v56  ;;  %7548 = vmatpush3.bf16.msra.mxu1 %v9850_v49  ;;  %v9883_v49 = vld [vmem:[%s12332_s6 + $0x3c0] sm:$0xff]  }
 0x766   :  { %7577 = vmatprep.subr.bf16.mxu1 %v9851_v57  ;;  %v9853_v30 = vld [vmem:[%s12332_s6 + $0x300] sm:$0xff]  }
 0x767   :  { %6392 = vmatprep.mubr.bf16.mxu0 %v5456_v63  ;;  %v3948_v63 = vrot.slane %v12141_v14, %v11530_v48 }
 0x768   :  { %6393 = vmatmul.mubr.bf16.vlgmr.msra.gmra.mrb[40].mxu0 %v5455_v40  ;;  %v9855_v40 = vld [vmem:[%s12332_s6 + $0x348] sm:$0xff]  }
 0x769   :  { %7556 = vmatpush3.bf16.msra.mxu0 %v9854_v62  ;;  %v3952_v62 = vrot.slane %v12141_v14, %v11961_v27  ;;  %v4028_v58 = vrot.slane %v3948_v63, %v12512_v21  ;;  %v9861_v14 = vld [vmem:[%s12332_s6 + $0x310] sm:$0xff]  }
 0x76a   :  { %7557 = vmatprep.subr.bf16.mxu0 %v9856_v61  ;;  %v9857_v61 = vld [vmem:[%s12332_s6 + $0x308] sm:$0xff]  }
 0x76d   :  { %7558 = vmatpush3.bf16.msra.mxu0 %v9858_v12  ;;  %v4032_v12 = vrot.slane %v3952_v62, %v12512_v21 }
 0x76e   :  { %v4895_v18 = vpop.f32.mrb[24].mxu0  ;;  %7559 = vmatprep.subr.bf16.mxu0 %v9860_v34 }
 0x76f   :  { %v4896_v3 = vadd.f32 %v4895_v18, %v4020_v29  ;;  %v4897_v38 = vpop.f32.mrb[25].mxu0 }
 0x770   :  { %v4898_v23 = vadd.f32 %v4897_v38, %v4024_v5  ;;  %v4899_v53 = vpop.f32.mrb[26].mxu0 }
 0x771   :  { %v5073_v2 = vmul.f32 0.70710677, %v4896_v3  ;;  %v4900_v28 = vadd.f32 %v4899_v53, %v4020_v29  ;;  %v4901_v15 = vpop.f32.mrb[27].mxu0  ;;  %7560 = vmatpush3.bf16.msra.mxu0 %v9862_v41  ;;  %v5041_v59 = vmul.f32 0.5, %v4896_v3  ;;  %v9865_v3 = vld [vmem:[%s12332_s6 + $0x318] sm:$0xff]   ;;  %v9867_v53 = vld [vmem:[%s12332_s6 + $0x360] sm:$0xff]  }
 0x772   :  { %v5074_v60 = vmul.f32 0.70710677, %v4898_v23  ;;  %v4902_v7 = vadd.f32 %v4901_v15, %v4024_v5  ;;  %7561 = vmatprep.subr.bf16.mxu0 %v9864_v39  ;;  %v5042_v31 = vmul.f32 0.5, %v4898_v23  ;;  %v9869_v15 = vld [vmem:[%s12332_s6 + $0x320] sm:$0xff]  }
 0x773   :  { %9955 = verf.f32 %v5073_v2  ;;  %v5089_v46 = vmul.f32 0.70710677, %v4900_v28  ;;  %v5057_v10 = vmul.f32 0.5, %v4900_v28 }
 0x774   :  { %9957 = verf.f32 %v5074_v60  ;;  %v5090_v11 = vmul.f32 0.70710677, %v4902_v7  ;;  %v5058_v54 = vmul.f32 0.5, %v4902_v7  ;;  %v9873_v60 = vld [vmem:[%s12332_s6 + $0x328] sm:$0xff]   ;;  %v9875_v7 = vld [vmem:[%s12332_s6 + $0x370] sm:$0xff]  }
 0x775   :  { %9959 = verf.f32 %v5089_v46  ;;  %7562 = vmatpush3.bf16.msra.mxu0 %v9866_v42  ;;  %v9871_v42 = vld [vmem:[%s12332_s6 + $0x368] sm:$0xff]   ;;  %v9877_v46 = vld [vmem:[%s12332_s6 + $0x330] sm:$0xff]  }
 0x776   :  { %9961 = verf.f32 %v5090_v11  ;;  %7563 = vmatprep.subr.bf16.mxu0 %v9868_v20 }
 0x779   :  { %7564 = vmatpush3.bf16.msra.mxu0 %v9870_v8 }
 0x77a   :  { %7565 = vmatprep.subr.bf16.mxu0 %v9872_v32  ;;  %v9879_v32 = vld [vmem:[%s12332_s6 + $0x378] sm:$0xff]  }
 0x77d   :  { %v9956_v24 = vpop.eup %9955  ;;  %7566 = vmatpush3.bf16.msra.mxu0 %v9874_v43 }
 0x77e   :  { %v9958_v22 = vpop.eup %9957  ;;  %v5137_v47 = vadd.f32 1.0, %v9956_v24  ;;  %7567 = vmatprep.subr.bf16.mxu0 %v9876_v0 }
 0x77f   :  { %v9960_v55 = vpop.eup %9959  ;;  %v5138_v19 = vadd.f32 1.0, %v9958_v22 }
 0x780   :  { %v9962_v9 = vpop.eup %9961  ;;  %v5153_v13 = vadd.f32 1.0, %v9960_v55  ;;  %v5169_v51 = vmul.f32 %v5137_v47, %v5041_v59 }
 0x781   :  { %v5154_v26 = vadd.f32 1.0, %v9962_v9  ;;  %7568 = vmatpush3.bf16.msra.mxu0 %v9878_v17  ;;  %v5170_v4 = vmul.f32 %v5138_v19, %v5042_v31  ;;  %v9881_v9 = vld [vmem:[%s12332_s6 + $0x338] sm:$0xff]  }
 0x782   :  { %v5185_v36 = vmul.f32 %v5153_v13, %v5057_v10  ;;  %7569 = vmatprep.subr.bf16.mxu0 %v9880_v6 }
 0x783   :  { %v5186_v45 = vmul.f32 %v5154_v26, %v5058_v54 }
 0x784   :  { %v5457_v57 = vpack.c.bf16 %v5185_v36, %v5169_v51  ;;  %v9885_v51 = vld [vmem:[%s12332_s6 + $0x3c8] sm:$0xff]   ;;  %v3964_v36 = vrot.slane %v11916_v1, %v11530_v48 }
 0x785   :  { %v5458_v56 = vpack.c.bf16 %v5186_v45, %v5170_v4  ;;  %7570 = vmatpush3.bf16.msra.mxu0 %v9882_v16  ;;  %v9884_v16 = vld [vmem:[%s12332_s6 + $0x380] sm:$0xff]   ;;  %v9886_v4 = vld [vmem:[%s12332_s6 + $0x388] sm:$0xff]   ;;  %v9887_v45 = vld [vmem:[%s12332_s6 + $0x3d0] sm:$0xff]  }
 0x786   :  { %7599 = vmatprep.subr.bf16.mxu0 %v9883_v49  ;;  %v3968_v49 = vrot.slane %v11916_v1, %v11961_v27  ;;  %v4044_v48 = vrot.slane %v3964_v36, %v12512_v21 }
 0x787   :  { %6433 = vmatprep.mubr.bf16.mxu1 %v5458_v56 }
 0x788   :  { %6434 = vmatmul.mubr.bf16.vlgmr.msra.gmra.mrb[20].mxu1 %v5457_v57  ;;  %v4048_v57 = vrot.slane %v3968_v49, %v12512_v21  ;;  %v9890_v21 = vld [vmem:[%s12332_s6 + $0x398] sm:$0xff]  }
 0x789   :  { %7578 = vmatpush3.bf16.msra.mxu1 %v9853_v30  ;;  %6515 = vmatprep.mubr.bf16.mxu1 %v5462_v37 }
 0x78a   :  { %7579 = vmatprep.subr.bf16.mxu1 %v9855_v40 }
 0x78d   :  { %7580 = vmatpush3.bf16.msra.mxu1 %v9857_v61 }
 0x78e   :  { %v4938_v25 = vpop.f32.mrb[28].mxu0  ;;  %7581 = vmatprep.subr.bf16.mxu1 %v9859_v33 }
 0x78f   :  { %v4939_v37 = vadd.f32 %v4938_v25, %v4028_v58  ;;  %v4940_v34 = vpop.f32.mrb[29].mxu0 }
 0x790   :  { %v4941_v29 = vadd.f32 %v4940_v34, %v4032_v12  ;;  %v4942_v5 = vpop.f32.mrb[30].mxu0  ;;  %v9894_v34 = vld [vmem:[%s12332_s6 + $0x3a8] sm:$0xff]  }
 0x791   :  { %v5075_v41 = vmul.f32 0.70710677, %v4939_v37  ;;  %v4943_v18 = vadd.f32 %v4942_v5, %v4028_v58  ;;  %7582 = vmatpush3.bf16.msra.mxu1 %v9861_v14  ;;  %v4944_v39 = vpop.f32.mrb[31].mxu0  ;;  %v5043_v17 = vmul.f32 0.5, %v4939_v37  ;;  %v9893_v37 = vld [vmem:[%s12332_s6 + $0x3e8] sm:$0xff]  }
 0x792   :  { %v5076_v38 = vmul.f32 0.70710677, %v4941_v29  ;;  %v4945_v23 = vadd.f32 %v4944_v39, %v4032_v12  ;;  %7583 = vmatprep.subr.bf16.mxu1 %v9863_v52  ;;  %v5044_v6 = vmul.f32 0.5, %v4941_v29  ;;  %v9891_v12 = vld [vmem:[%s12332_s6 + $0x3e0] sm:$0xff]   ;;  %v9895_v29 = vld [vmem:[%s12332_s6 + $0x3f0] sm:$0xff]  }
 0x793   :  { %9963 = verf.f32 %v5075_v41  ;;  %v5091_v2 = vmul.f32 0.70710677, %v4943_v18  ;;  %v5059_v22 = vmul.f32 0.5, %v4943_v18  ;;  %v9892_v52 = vld [vmem:[%s12332_s6 + $0x3a0] sm:$0xff]   ;;  %v9896_v41 = vld [vmem:[%s12332_s6 + $0x3b0] sm:$0xff]  }
 0x794   :  { %9965 = verf.f32 %v5076_v38  ;;  %v5092_v28 = vmul.f32 0.70710677, %v4945_v23  ;;  %v5060_v55 = vmul.f32 0.5, %v4945_v23 }
 0x795   :  { %9967 = verf.f32 %v5091_v2  ;;  %7584 = vmatpush3.bf16.msra.mxu1 %v9865_v3  ;;  %v9897_v3 = vld [vmem:[%s12332_s6 + $0x3f8] sm:$0xff]  }
 0x796   :  { %9969 = verf.f32 %v5092_v28  ;;  %7585 = vmatprep.subr.bf16.mxu1 %v9867_v53 }
 0x799   :  { %7586 = vmatpush3.bf16.msra.mxu1 %v9869_v15 }
 0x79a   :  { %7587 = vmatprep.subr.bf16.mxu1 %v9871_v42 }
 0x79d   :  { %v9964_v20 = vpop.eup %9963  ;;  %7588 = vmatpush3.bf16.msra.mxu1 %v9873_v60 }
 0x79e   :  { %v9966_v11 = vpop.eup %9965  ;;  %v5139_v8 = vadd.f32 1.0, %v9964_v20  ;;  %7589 = vmatprep.subr.bf16.mxu1 %v9875_v7  ;;  %v9898_v20 = vld [vmem:[%s12332_s6 + $0x3b8] sm:$0xff]   ;;  %s10119_s6 = smov [#allocation10]  }
 0x79f   :  { %v9968_v43 = vpop.eup %9967  ;;  %v5140_v0 = vadd.f32 1.0, %v9966_v11 }
 0x7a0   :  { %v9970_v24 = vpop.eup %9969  ;;  %v5155_v47 = vadd.f32 1.0, %v9968_v43  ;;  %v5171_v59 = vmul.f32 %v5139_v8, %v5043_v17 }
 0x7a1   :  { %v5156_v19 = vadd.f32 1.0, %v9970_v24  ;;  %7590 = vmatpush3.bf16.msra.mxu1 %v9877_v46  ;;  %v5172_v13 = vmul.f32 %v5140_v0, %v5044_v6 }
 0x7a2   :  { %v5187_v10 = vmul.f32 %v5155_v47, %v5059_v22  ;;  %7591 = vmatprep.subr.bf16.mxu1 %v9879_v32 }
 0x7a3   :  { %v5188_v31 = vmul.f32 %v5156_v19, %v5060_v55  ;;  %v9991_v19 = vld [vmem:[%s12333_s7] sm:$0xff]  ;;  %s6572_s7 = sshll.u32 %s10119_s6, 4  ;;  %s6573_s7 = int_to_ptr.vmem [resolvable:$true] %s6572_s7 }
 0x7a4   :  { %v5459_v54 = vpack.c.bf16 %v5187_v10, %v5171_v59  ;;  %s10080_s27 = scalar_lea.vmem %s6573_s7, 256  ;;  %p10085_p5 = scmp.lt.s32.totalorder %s6573_s7, %s6573_s7 }
 0x7a5   :  { %7592 = vmatpush3.bf16.msra.mxu1 %v9881_v9  ;;  %v5460_v26 = vpack.c.bf16 %v5188_v31, %v5172_v13  ;;  %v5468_v9 = vrot.slane %v9991_v19, %v11961_v27  ;;  %p10081_p4 = scmp.ne.s32.totalorder %s6573_s7, %s10080_s27  ;;  %p10086_p6 = scmp.lt.s32.totalorder %s10080_s27, %s10080_s27 }
 0x7a7   :  { %6474 = vmatprep.mubr.bf16.mxu0 %v5460_v26  ;;  %p10087_p7 = por %p10086_p6, %p10085_p5 }
 0x7a8   :  { %6516 = vmatmul.mubr.bf16.vlgmr.msra.gmra.mrb[24].mxu1 %v5461_v50  ;;  %6475 = vmatmul.mubr.bf16.vlgmr.msra.gmra.mrb[44].mxu0 %v5459_v54 }
 0x7a9   :  { %7600 = vmatpush3.bf16.msra.mxu0 %v9884_v16  ;;  %p10088_p8 = pnand %p10087_p7, %p10081_p4 }
 0x7aa   :  { %7601 = vmatprep.subr.bf16.mxu0 %v9885_v51 }
 0x7ad   :  { %7602 = vmatpush3.bf16.msra.mxu0 %v9886_v4 }
 0x7ae   :  { %v5024_v1 = vpop.f32.mrb[32].mxu0  ;;  %7603 = vmatprep.subr.bf16.mxu0 %v9887_v45 }
 0x7af   :  { %v5025_v50 = vadd.f32 %v5024_v1, %v4044_v48  ;;  %v5026_v56 = vpop.f32.mrb[33].mxu0 }
 0x7b0   :  { %v5027_v30 = vadd.f32 %v5026_v56, %v4048_v57  ;;  %v5028_v40 = vpop.f32.mrb[34].mxu0 }
 0x7b1   :  { %v5079_v63 = vmul.f32 0.70710677, %v5025_v50  ;;  %v5029_v62 = vadd.f32 %v5028_v40, %v4044_v48  ;;  %v5030_v61 = vpop.f32.mrb[35].mxu0  ;;  %7604 = vmatpush3.bf16.msra.mxu0 %v9888_v44  ;;  %v5047_v2 = vmul.f32 0.5, %v5025_v50 }
 0x7b2   :  { %v5080_v33 = vmul.f32 0.70710677, %v5027_v30  ;;  %v5031_v58 = vadd.f32 %v5030_v61, %v4048_v57  ;;  %7605 = vmatprep.subr.bf16.mxu0 %v9889_v35  ;;  %v5048_v42 = vmul.f32 0.5, %v5027_v30 }
 0x7b3   :  { %9971 = verf.f32 %v5079_v63  ;;  %v5095_v14 = vmul.f32 0.70710677, %v5029_v62  ;;  %v5063_v28 = vmul.f32 0.5, %v5029_v62 }
 0x7b4   :  { %9973 = verf.f32 %v5080_v33  ;;  %v5096_v25 = vmul.f32 0.70710677, %v5031_v58  ;;  %v5064_v60 = vmul.f32 0.5, %v5031_v58 }
 0x7b5   :  { %9975 = verf.f32 %v5095_v14  ;;  %7606 = vmatpush3.bf16.msra.mxu0 %v9890_v21 }
 0x7b6   :  { %9977 = verf.f32 %v5096_v25  ;;  %7607 = vmatprep.subr.bf16.mxu0 %v9891_v12 }
 0x7b9   :  { %7608 = vmatpush3.bf16.msra.mxu0 %v9892_v52 }
 0x7ba   :  { %7609 = vmatprep.subr.bf16.mxu0 %v9893_v37 }
 0x7bd   :  { %v9972_v5 = vpop.eup %9971  ;;  %7610 = vmatpush3.bf16.msra.mxu0 %v9894_v34 }
 0x7be   :  { %v9974_v18 = vpop.eup %9973  ;;  %v5143_v39 = vadd.f32 1.0, %v9972_v5  ;;  %7611 = vmatprep.subr.bf16.mxu0 %v9895_v29 }
 0x7bf   :  { %v9976_v38 = vpop.eup %9975  ;;  %v5144_v23 = vadd.f32 1.0, %v9974_v18 }
 0x7c0   :  { %v9978_v53 = vpop.eup %9977  ;;  %v5159_v15 = vadd.f32 1.0, %v9976_v38  ;;  %v5175_v46 = vmul.f32 %v5143_v39, %v5047_v2 }
 0x7c1   :  { %v5160_v7 = vadd.f32 1.0, %v9978_v53  ;;  %7612 = vmatpush3.bf16.msra.mxu0 %v9896_v41  ;;  %v5176_v8 = vmul.f32 %v5144_v23, %v5048_v42 }
 0x7c2   :  { %v5191_v11 = vmul.f32 %v5159_v15, %v5063_v28  ;;  %7613 = vmatprep.subr.bf16.mxu0 %v9897_v3 }
 0x7c3   :  { %v5192_v32 = vmul.f32 %v5160_v7, %v5064_v60 }
 0x7c4   :  { %v5463_v43 = vpack.c.bf16 %v5191_v11, %v5175_v46 }
 0x7c5   :  { %7614 = vmatpush3.bf16.msra.mxu0 %v9898_v20  ;;  %v5464_v0 = vpack.c.bf16 %v5192_v32, %v5176_v8 }
 0x7c7   :  { %6556 = vmatprep.mubr.bf16.mxu0 %v5464_v0 }
 0x7c8   :  { %6557 = vmatmul.mubr.bf16.vlgmr.msra.gmra.mrb[48].mxu0 %v5463_v43 }
 0x7de   :  { %v7461_v24 = vpop.f32.mrb[12].mxu1 }
 0x7df   :  { %v7462_v17 = vpop.f32.mrb[13].mxu1 }
 0x7e0   :  { %v7463_v22 = vadd.f32 %v7462_v17, %v7461_v24  ;;  %v7464_v47 = vpop.f32.mrb[14].mxu1 }
 0x7e1   :  { %v7465_v6 = vpop.f32.mrb[15].mxu1 }
 0x7e2   :  { %v7466_v55 = vadd.f32 %v7465_v6, %v7464_v47  ;;  %v6272_v13 = vadd.f32 %v7463_v22, %v5468_v9 }
 0x7e4   :  { %v6275_v16 = vadd.f32 %v7466_v55, %v5468_v9 }
 0x7fb   :  { %v7483_v59 = vpop.f32.mrb[36].mxu0 }
 0x7fc   :  { %v7484_v10 = vpop.f32.mrb[37].mxu0 }
 0x7fd   :  { %v7485_v31 = vadd.f32 %v7484_v10, %v7483_v59  ;;  %v7486_v54 = vpop.f32.mrb[38].mxu0 }
 0x7fe   :  { %v7487_v26 = vpop.f32.mrb[39].mxu0 }
 0x7ff   :  { %v6313_v51 = vadd.f32 %v7485_v31, %v6272_v13  ;;  %v7488_v36 = vadd.f32 %v7487_v26, %v7486_v54 }
 0x801   :  { %v6316_v49 = vadd.f32 %v7488_v36, %v6275_v16 }
 0x81b   :  { %v7505_v4 = vpop.f32.mrb[16].mxu1 }
 0x81c   :  { %v7506_v45 = vpop.f32.mrb[17].mxu1 }
 0x81d   :  { %v7507_v48 = vadd.f32 %v7506_v45, %v7505_v4  ;;  %v7508_v57 = vpop.f32.mrb[18].mxu1 }
 0x81e   :  { %v7509_v44 = vpop.f32.mrb[19].mxu1 }
 0x81f   :  { %v6354_v1 = vadd.f32 %v7507_v48, %v6313_v51  ;;  %v7510_v35 = vadd.f32 %v7509_v44, %v7508_v57 }
 0x821   :  { %v6357_v50 = vadd.f32 %v7510_v35, %v6316_v49 }
 0x83b   :  { %v7527_v56 = vpop.f32.mrb[40].mxu0 }
 0x83c   :  { %v7528_v27 = vpop.f32.mrb[41].mxu0 }
 0x83d   :  { %v7529_v30 = vadd.f32 %v7528_v27, %v7527_v56  ;;  %v7530_v40 = vpop.f32.mrb[42].mxu0 }
 0x83e   :  { %v7531_v63 = vpop.f32.mrb[43].mxu0 }
 0x83f   :  { %v6395_v62 = vadd.f32 %v7529_v30, %v6354_v1  ;;  %v7532_v61 = vadd.f32 %v7531_v63, %v7530_v40 }
 0x841   :  { %v6398_v21 = vadd.f32 %v7532_v61, %v6357_v50 }
 0x85b   :  { %v7549_v33 = vpop.f32.mrb[20].mxu1 }
 0x85c   :  { %v7550_v58 = vpop.f32.mrb[21].mxu1 }
 0x85d   :  { %v7551_v12 = vadd.f32 %v7550_v58, %v7549_v33  ;;  %v7552_v14 = vpop.f32.mrb[22].mxu1 }
 0x85e   :  { %v7553_v25 = vpop.f32.mrb[23].mxu1 }
 0x85f   :  { %v6436_v52 = vadd.f32 %v7551_v12, %v6395_v62  ;;  %v7554_v37 = vadd.f32 %v7553_v25, %v7552_v14 }
 0x861   :  { %v6439_v34 = vadd.f32 %v7554_v37, %v6398_v21 }
 0x87b   :  { %v7593_v29 = vpop.f32.mrb[24].mxu1  ;;  %v7571_v5 = vpop.f32.mrb[44].mxu0 }
 0x87c   :  { %v7594_v41 = vpop.f32.mrb[25].mxu1  ;;  %v7572_v18 = vpop.f32.mrb[45].mxu0 }
 0x87d   :  { %v7595_v39 = vadd.f32 %v7594_v41, %v7593_v29  ;;  %v7573_v3 = vadd.f32 %v7572_v18, %v7571_v5  ;;  %v7596_v38 = vpop.f32.mrb[26].mxu1  ;;  %v7574_v23 = vpop.f32.mrb[46].mxu0 }
 0x87e   :  { %v7597_v53 = vpop.f32.mrb[27].mxu1  ;;  %v7575_v2 = vpop.f32.mrb[47].mxu0 }
 0x87f   :  { %v6477_v28 = vadd.f32 %v7573_v3, %v6436_v52  ;;  %v7598_v15 = vadd.f32 %v7597_v53, %v7596_v38  ;;  %v7576_v42 = vadd.f32 %v7575_v2, %v7574_v23 }
 0x881   :  { %v6480_v60 = vadd.f32 %v7576_v42, %v6439_v34  ;;  %v6518_v7 = vadd.f32 %v7595_v39, %v6477_v28 }
 0x883   :  { %v6521_v20 = vadd.f32 %v7598_v15, %v6480_v60 }
 0x89b   :  { %v7615_v46 = vpop.f32.mrb[48].mxu0 }
 0x89c   :  { %v7616_v11 = vpop.f32.mrb[49].mxu0 }
 0x89d   :  { %v7617_v8 = vadd.f32 %v7616_v11, %v7615_v46  ;;  %v7618_v32 = vpop.f32.mrb[50].mxu0 }
 0x89e   :  { %v7619_v43 = vpop.f32.mrb[51].mxu0 }
 0x89f   :  { %v6559_v0 = vadd.f32 %v7617_v8, %v6518_v7  ;;  %v7620_v24 = vadd.f32 %v7619_v43, %v7618_v32 }
 0x8a1   :  { %6565 = vst.msk [vmem:[#allocation10] sm:$0xff] %vm125_vm0, %v6559_v0  ;;  %v6562_v17 = vadd.f32 %v7620_v24, %v6521_v20 }
 0x8a3   :  { %6566 = vst.msk [vmem:[#allocation10 + $0x8] sm:$0xff] %vm125_vm0, %v6562_v17 }
 0x8a4   :  { %10091 = shalt.err (!%p10088_p8)
}
 0x8a5   :  { %s10092_s28 = scalar_lea.hbm %s12334_s8, 256 }
 0x8a6   :  { %p10093_p9 = scmp.ne.s32.totalorder %s12334_s8, %s10092_s28  ;;  %p10096_p10 = scmp.lt.u32.totalorder %s10092_s28, %s12334_s8 }
 0x8a8   :  { %p10098_p11 = pnand %p10096_p10, %p10093_p9 }
 0x8aa   :  { %10101 = shalt.err (!%p10098_p11)
}
 0x8ab   :  { %6578 = dma.vmem_to_hbm [thread:$0]  %s6573_s7, 256, %s12334_s8, [#allocation4], %s10112_s17, %s10112_s17, %s10113_s18  }
 0x8ac   :  { %10108 = dma.done.wait [#allocation4], 256  }
 0x8ad   :  { %10109 = vsyncadd [#allocation4], 4294967040 }
 0x8ae   :  { %6582 = vsyncpa [#allocation3], 1 }
 0x8af   :  { %6583 = vsyncpa [#allocation6], 1 }
 0x8b0   :  { %6584 = vsyncpa [#allocation9], 1 }
 0x8b1   :  { %6585 = vsyncpa [#allocation4], 1 }

</bundles_post_ra>
